<compile_context>
chip_gen: v6e
topology: v6e:2x2x1
jax: 0.10.0
libtpu: 0.0.40
codegen_flags: <defaults>
</compile_context>

<pallas_src>
from functools import partial

import numpy as np
import jax
import jax.numpy as jnp
from jax.experimental import pallas as pl
from jax.experimental.pallas import tpu as pltpu


def lcmcov_kernel(w_ref, scale_ref, bias_ref, x_ref, out_ref,
                  s_ref, v_ref, piv_ref, *, eps, bt, m_total):
    d = w_ref.shape[0]
    p = 8 if d % 8 == 0 else (d if d <= 8 else 1)        # Cholesky panel height

    mi = pl.program_id(1)
    last = pl.num_programs(1) - 1

    # ---- phase 1: per M-tile accumulation of S = sum(y y^T) and v = sum(y) --------------
    @pl.when(mi == 0)
    def _init():
        s_ref[...] = jnp.zeros_like(s_ref)
        v_ref[...] = jnp.zeros_like(v_ref)

    w = w_ref[...]          # (d, Cin)
    scale = scale_ref[...]  # (d, 1)  folded eval-mode BN scale
    bias = bias_ref[...]    # (d, 1)  folded eval-mode BN bias

    @pl.loop(0, bt)         # loop (not unrolled): bounds the (d, Mt) y temporaries per b
    def _acc(b):
        xb = x_ref[b]                                                  # (Cin, Mt) native dtype
        y = jnp.dot(w, xb, preferred_element_type=jnp.float32)        # DEFAULT: bf16 MXU, f32 acc
        y = jnp.maximum(y * scale + bias, 0.0)
        v_ref[b] = v_ref[b] + jnp.sum(y, axis=1, keepdims=True)
        # covariance term feeds Cholesky + log -> keep it f32-accurate (HIGHEST)
        s_ref[b] = s_ref[b] + jax.lax.dot_general(
            y, y, (((1,), (1,)), ((), ())),
            precision=jax.lax.Precision.HIGHEST,
            preferred_element_type=jnp.float32)

    # ---- finalize on the last M tile: cov -> blocked in-place Cholesky -> LCM output ----
    @pl.when(mi == last)
    def _finalize():
        # iota masks hoisted once (JAX does not CSE broadcast/iota across unrolled loops)
        r = jax.lax.broadcasted_iota(jnp.int32, (d, d), 0)
        c = jax.lax.broadcasted_iota(jnp.int32, (d, d), 1)
        lane = jax.lax.broadcasted_iota(jnp.int32, (1, d), 1)
        sub = jax.lax.broadcasted_iota(jnp.int32, (d, 1), 0)
        psub = jax.lax.broadcasted_iota(jnp.int32, (p, 1), 0)
        eps_eye = jnp.where(r == c, jnp.float32(eps), 0.0)
        inv_m = jnp.float32(1.0 / m_total)

        # A = S/M - mu mu^T + eps*I   (overwrites s_ref in place; s_ref is re-zeroed at mi==0)
        for b in range(bt):
            mu = v_ref[b] * inv_m                                      # (d, 1)
            mu2 = jax.lax.dot_general(                                 # mu mu^T, transpose folded
                mu, mu, (((1,), (1,)), ((), ())),
                precision=jax.lax.Precision.HIGHEST,
                preferred_element_type=jnp.float32)
            s_ref[b] = s_ref[b] * inv_m - mu2 + eps_eye

        # blocked right-looking Cholesky, in place: s_ref[b] becomes U = L^T (upper tri)
        @pl.loop(0, d // p)
        def _panel(pi):
            k0 = pl.multiple_of(pi * p, p)
            for b in range(bt):                                        # unrolled: hides rsqrt chain
                pan = s_ref[b, pl.ds(k0, p), :]                        # (p, d) panel rows
                dacc = jnp.zeros((1, d), jnp.float32)
                for jl in range(p):                                    # static unroll over panel rows
                    j = k0 + jl
                    prow = pan[jl:jl + 1, :]                           # (1, d) = A[j, :]
                    piv = jnp.sum(jnp.where(lane == j, prow, 0.0), axis=1, keepdims=True)
                    # TODO(synk): the clamp turns non-PSD pivots into finite values instead of NaN.
                    piv = jnp.maximum(piv, 1e-30)
                    inv = jax.lax.rsqrt(piv)                           # EUP, off the VPU path
                    row = jnp.where(lane < j, 0.0,
                                    jnp.where(lane == j, piv * inv, prow * inv))   # U[j, :]
                    dacc = jnp.where(lane == j, piv, dacc)
                    # rank-1 column within the panel from the symmetric panel block (one
                    # (p,d) masked lane-reduce - no full (d,d) work, no transpose)
                    colp = jnp.sum(jnp.where(lane == j, pan, 0.0), axis=1, keepdims=True) * inv
                    colp = jnp.where(psub <= jl, 0.0, colp)            # finished rows untouched
                    pan = jnp.where(psub == jl, row, pan - colp * row)
                s_ref[b, pl.ds(k0, p), :] = pan                        # U rows k0..k0+p-1 in place
                piv_ref[b] = jnp.where((lane >= k0) & (lane < k0 + p), dacc, piv_ref[b])

                @pl.when(k0 + p < d)                                   # trailing SYRK on the MXU
                def _():
                    syrk = jax.lax.dot_general(
                        pan, pan, (((0,), (0,)), ((), ())),            # U_p^T U_p, transpose folded
                        precision=jax.lax.Precision.HIGHEST,
                        preferred_element_type=jnp.float32)
                    s_ref[b] = s_ref[b] - jnp.where(sub >= k0 + p, syrk, 0.0)

        # LogI_LCM: strict_tril(L) + strict_tril(L)^T + 2*log(diag(L)) on the diagonal
        for b in range(bt):
            u = s_ref[b]                                               # U = L^T (upper triangular)
            su = jnp.where(r < c, u, 0.0)                              # strict_tril(L)^T
            logd = jnp.log(jnp.maximum(piv_ref[b], 1e-30))             # (1,d): 2*log(sqrt(piv))
            out_ref[b] = su + su.T + jnp.where(r == c, logd, 0.0)


def _pick_mt(M, max_lanes=2048):
    # Largest multiple-of-128 divisor of M (capped) so the x DMA stays lane-dense; fall back
    # to the full extent for small / non-aligned spatial sizes (block dim == full dim).
    if M % 128 != 0:
        return M
    mt = min(M, max_lanes)
    mt -= mt % 128
    while M % mt != 0:
        mt -= 128
    return mt


def _vmem_est(bt, mt, Cin, d, x_itemsize):
    x_blk = 2 * bt * Cin * mt * x_itemsize            # double-buffered input block
    out_blk = 2 * bt * d * d * 4                      # double-buffered output block
    scr = bt * (d * d + 8 + 8 * d) * 4                # S + v + pivots (sublane-padded)
    params = 2 * (d * Cin + 2 * d) * 4                # w / bn scale / bn bias
    return x_blk + out_blk + scr + params + (1 << 16)


def _pick_bt(B, est_fn, budget, prefer_multi_step=True):
    cands = [cand for cand in (8, 4, 2, 1) if B % cand == 0 and est_fn(cand) <= budget]
    if not cands:
        return 1
    preds = [lambda cand: True]
    if prefer_multi_step:
        # Prefer >= 2 grid steps (v7x megacore can split the parallel batch axis) and an even
        # step count (balanced TensorCore load).  On single-TC chips (v5e/v6e) pass
        # prefer_multi_step=False to just take the largest bt that fits the VMEM budget.
        preds = [lambda cand: B // cand >= 2 and (B // cand) % 2 == 0,
                 lambda cand: B // cand >= 2] + preds
    for pred in preds:
        sel = [cand for cand in cands if pred(cand)]
        if sel:
            return sel[0]
    return 1


def lcmcov_pallas(x, w, bn_scale, bn_bias, eps=1e-6, bt=None, mt=None,
                  vmem_budget_bytes=40 * 1024 * 1024, prefer_multi_step=True):
    B, Cin, H, W = x.shape
    M = H * W
    d = w.shape[0]
    # Keep x in its producer dtype (a bf16 producer halves the dominant HBM->VMEM DMA);
    # all accumulation inside the kernel is f32 regardless.
    xr = x.reshape(B, Cin, M)
    itemsize = jnp.dtype(xr.dtype).itemsize

    if mt is None:
        mt = _pick_mt(M)
        while mt > 128 and M % 128 == 0 and _vmem_est(1, mt, Cin, d, itemsize) > vmem_budget_bytes:
            nmt = mt - 128
            while nmt > 128 and M % nmt != 0:
                nmt -= 128
            mt = nmt
    assert M % mt == 0, (M, mt)
    if bt is None:
        bt = _pick_bt(B, lambda cand: _vmem_est(cand, mt, Cin, d, itemsize),
                      vmem_budget_bytes, prefer_multi_step)
    assert B % bt == 0, (B, bt)

    kernel = partial(lcmcov_kernel, eps=eps, bt=bt, m_total=M)
    sym = pl.pallas_call(
        kernel,
        out_shape=jax.ShapeDtypeStruct((B, d, d), jnp.float32),
        grid_spec=pltpu.PrefetchScalarGridSpec(
            num_scalar_prefetch=0,
            grid=(B // bt, M // mt),                               # reduction (M) axis last
            in_specs=[
                pl.BlockSpec((d, Cin), lambda g, m: (0, 0)),       # constant blocks: fetched once
                pl.BlockSpec((d, 1), lambda g, m: (0, 0)),
                pl.BlockSpec((d, 1), lambda g, m: (0, 0)),
                pl.BlockSpec((bt, Cin, mt), lambda g, m: (g, 0, m)),
            ],
            out_specs=pl.BlockSpec((bt, d, d), lambda g, m: (g, 0, 0)),
            scratch_shapes=[
                pltpu.VMEM((bt, d, d), jnp.float32),   # S accumulator -> A -> U (in place)
                pltpu.VMEM((bt, d, 1), jnp.float32),   # per-channel sums of y
                pltpu.VMEM((bt, 1, d), jnp.float32),   # Cholesky pivots (output log-diagonal)
            ],
        ),
        compiler_params=pltpu.CompilerParams(
            dimension_semantics=("parallel", "arbitrary"),
            vmem_limit_bytes=int(min(vmem_budget_bytes + (8 << 20), 96 << 20)),
        ),
    )(w, bn_scale, bn_bias, xr)
    return sym


def triuvec(sym):
    # Matches PyTorch Triuvec: x.reshape(B, d*d)[:, index] with index of shape (nnz, 1)
    # -> output (B, d(d+1)/2, 1), float32.
    B, d, _ = sym.shape
    ri, ci = np.triu_indices(d)
    flat = jnp.asarray(ri * d + ci, dtype=jnp.int32)
    return sym.reshape(B, d * d)[:, flat][..., None].astype(jnp.float32)


def lcmcov_reference(x, w, bn_scale, bn_bias, eps=1e-6):
    hi = jax.lax.Precision.HIGHEST
    B, Cin, H, W = x.shape
    M = H * W
    d = w.shape[0]
    xr = x.reshape(B, Cin, M).astype(jnp.float32)
    y = jnp.einsum('oc,bcm->bom', w, xr, precision=hi)
    y = jnp.maximum(y * bn_scale[None] + bn_bias[None], 0.0)
    i_hat = (-1.0 / M / M) * jnp.ones((M, M), jnp.float32) + (1.0 / M) * jnp.eye(M, dtype=jnp.float32)
    cov = jnp.einsum('bdm,mn,ben->bde', y, i_hat, y, precision=hi)
    a = cov + eps * jnp.eye(d, dtype=jnp.float32)
    l = jnp.linalg.cholesky(a)
    strict = jnp.tril(l, -1)
    logdiag = jnp.log(jnp.diagonal(l, axis1=-2, axis2=-1))
    tril_m = strict + jax.vmap(jnp.diag)(logdiag)
    return tril_m + jnp.swapaxes(tril_m, -1, -2)


if __name__ == "__main__":
    key = jax.random.PRNGKey(0)
    bn_eps = 1e-5
    eps = 1e-6

    def run_case(case_key, B, Cin, H, W, dr, **kw):
        k1, k2 = jax.random.split(case_key)
        x = jax.random.normal(k1, (B, Cin, H, W), dtype=jnp.float32)
        # Conv2d(Cin, dr, 1, bias=False), kaiming_normal_(fan_out, relu): std = sqrt(2 / dr)
        w = jax.random.normal(k2, (dr, Cin), dtype=jnp.float32) * jnp.sqrt(2.0 / dr)
        # BatchNorm2d(dr) folded in eval mode: gamma=1, beta=0, running_mean=0, running_var=1
        bn_scale = jnp.full((dr, 1), 1.0 / np.sqrt(1.0 + bn_eps), dtype=jnp.float32)
        bn_bias = jnp.zeros((dr, 1), dtype=jnp.float32)

        sym = lcmcov_pallas(x, w, bn_scale, bn_bias, eps=eps, **kw)
        out = triuvec(sym)                      # is_vec=True path
        jax.block_until_ready(out)
        ref = triuvec(lcmcov_reference(x, w, bn_scale, bn_bias, eps=eps))
        assert out.shape == (B, dr * (dr + 1) // 2, 1) and out.dtype == jnp.float32
        np.testing.assert_allclose(np.asarray(out), np.asarray(ref), rtol=2e-2, atol=2e-2)

    k1, k2 = jax.random.split(key)
    # case 1: d=8 (single Cholesky panel), bt=2, two M tiles -> exercises the M reduction axis
    run_case(k1, B=4, Cin=16, H=16, W=16, dr=8, mt=128)
    # case 2: d=16 (two panels + MXU SYRK trailing update), bt=1, single M tile
    run_case(k2, B=2, Cin=32, H=16, W=16, dr=16)
    print("KERNEL_OK")
</pallas_src>

<mosaic_0001>
module attributes {stable_mosaic.version = 11 : i64} {
  func.func @lcmcov_kernel(%arg0: i32, %arg1: i32, %arg2: memref<8x16xf32, #tpu.memory_space<vmem>>, %arg3: memref<8x1xf32, #tpu.memory_space<vmem>>, %arg4: memref<8x1xf32, #tpu.memory_space<vmem>>, %arg5: memref<2x16x128xf32, #tpu.memory_space<vmem>>, %arg6: memref<2x8x8xf32, #tpu.memory_space<vmem>>, %arg7: memref<2x8x8xf32, #tpu.memory_space<vmem>>, %arg8: memref<2x8x1xf32, #tpu.memory_space<vmem>>, %arg9: memref<2x1x8xf32, #tpu.memory_space<vmem>>) attributes {dimension_semantics = [#tpu.dimension_semantics<parallel>, #tpu.dimension_semantics<arbitrary>], iteration_bounds = array<i64: 2, 2>, scalar_prefetch = 0 : i64, scratch_operands = 3 : i64, tpu.core_type = #tpu.core_type<tc>, window_params = [{pipeline_mode = #tpu.pipeline_mode<synchronous>, transform_indices = @transform_0, window_bounds = array<i64: 8, 16>}, {pipeline_mode = #tpu.pipeline_mode<synchronous>, transform_indices = @transform_1, window_bounds = array<i64: 8, 1>}, {pipeline_mode = #tpu.pipeline_mode<synchronous>, transform_indices = @transform_2, window_bounds = array<i64: 8, 1>}, {transform_indices = @transform_3, window_bounds = array<i64: 2, 16, 128>}, {transform_indices = @transform_4, window_bounds = array<i64: 2, 8, 8>}]} {
    %c0_i32 = arith.constant 0 : i32
    %0 = arith.cmpi eq, %arg1, %c0_i32 : i32
    %1 = arith.extui %0 : i1 to i32
    %c0_i32_0 = arith.constant 0 : i32
    %2 = arith.cmpi ne, %1, %c0_i32_0 : i32
    scf.if %2 {
      %cst = arith.constant 0.000000e+00 : f32
      %10 = vector.broadcast %cst : f32 to vector<2x8x8xf32>
      %c0_10 = arith.constant 0 : index
      %c0_11 = arith.constant 0 : index
      %c0_12 = arith.constant 0 : index
      %11 = vector.load %arg7[%c0_10, %c0_11, %c0_12] : memref<2x8x8xf32, #tpu.memory_space<vmem>>, vector<2x8x8xf32>
      tpu.vector_store %arg7[%c0_10, %c0_11, %c0_12], %10 {strides = array<i32>} : memref<2x8x8xf32, #tpu.memory_space<vmem>>, vector<2x8x8xf32>,
      %cst_13 = arith.constant 0.000000e+00 : f32
      %12 = vector.broadcast %cst_13 : f32 to vector<2x8x1xf32>
      %c0_14 = arith.constant 0 : index
      %c0_15 = arith.constant 0 : index
      %c0_16 = arith.constant 0 : index
      %13 = vector.load %arg8[%c0_14, %c0_15, %c0_16] : memref<2x8x1xf32, #tpu.memory_space<vmem>>, vector<2x8x1xf32>
      tpu.vector_store %arg8[%c0_14, %c0_15, %c0_16], %12 {strides = array<i32>} : memref<2x8x1xf32, #tpu.memory_space<vmem>>, vector<2x8x1xf32>,
    } else {
    }
    %c0 = arith.constant 0 : index
    %c0_1 = arith.constant 0 : index
    %3 = vector.load %arg2[%c0, %c0_1] : memref<8x16xf32, #tpu.memory_space<vmem>>, vector<8x16xf32>
    %c0_2 = arith.constant 0 : index
    %c0_3 = arith.constant 0 : index
    %4 = vector.load %arg3[%c0_2, %c0_3] : memref<8x1xf32, #tpu.memory_space<vmem>>, vector<8x1xf32>
    %c0_4 = arith.constant 0 : index
    %c0_5 = arith.constant 0 : index
    %5 = vector.load %arg4[%c0_4, %c0_5] : memref<8x1xf32, #tpu.memory_space<vmem>>, vector<8x1xf32>
    %c0_i32_6 = arith.constant 0 : i32
    %c2_i32 = arith.constant 2 : i32
    %6 = arith.addi %c0_i32_6, %c2_i32 : i32
    %c1_i32 = arith.constant 1 : i32
    scf.for %arg10 = %c0_i32_6 to %6 step %c1_i32  : i32 {
      %c1_i32_10 = arith.constant 1 : i32
      %10 = arith.muli %arg10, %c1_i32_10 : i32
      %c0_i32_11 = arith.constant 0 : i32
      %11 = arith.addi %c0_i32_11, %10 : i32
      %12 = arith.index_cast %11 : i32 to index
      %c0_12 = arith.constant 0 : index
      %c0_13 = arith.constant 0 : index
      %13 = vector.load %arg5[%12, %c0_12, %c0_13] : memref<2x16x128xf32, #tpu.memory_space<vmem>>, vector<1x16x128xf32>
      %14 = vector.shape_cast %13 : vector<1x16x128xf32> to vector<16x128xf32>
      %cst = arith.constant dense<0.000000e+00> : vector<8x128xf32>
      %15 = tpu.matmul %3, %14, %cst {dimension_numbers = #tpu.dot_dimension_numbers<[1], [0], [0], [1], [0, 0, 1, 1], [], []>} : vector<8x16xf32>, vector<16x128xf32>, vector<8x128xf32> -> vector<8x128xf32>
      %16 = vector.broadcast %4 : vector<8x1xf32> to vector<8x128xf32>
      %17 = arith.mulf %15, %16 : vector<8x128xf32>
      %18 = vector.broadcast %5 : vector<8x1xf32> to vector<8x128xf32>
      %19 = arith.addf %17, %18 : vector<8x128xf32>
      %cst_14 = arith.constant 0.000000e+00 : f32
      %20 = vector.broadcast %cst_14 : f32 to vector<8x128xf32>
      %21 = arith.maximumf %19, %20 : vector<8x128xf32>
      %22 = arith.index_cast %11 : i32 to index
      %c0_15 = arith.constant 0 : index
      %c0_16 = arith.constant 0 : index
      %23 = vector.load %arg8[%22, %c0_15, %c0_16] : memref<2x8x1xf32, #tpu.memory_space<vmem>>, vector<1x8x1xf32>
      %24 = vector.shape_cast %23 : vector<1x8x1xf32> to vector<8x1xf32>
      %cst_17 = arith.constant dense<0.000000e+00> : vector<8xf32>
      %25 = vector.multi_reduction <add>, %21, %cst_17 [1] : vector<8x128xf32> to vector<8xf32>
      %26 = vector.shape_cast %25 : vector<8xf32> to vector<8x1xf32>
      %27 = arith.addf %24, %26 : vector<8x1xf32>
      %28 = arith.index_cast %11 : i32 to index
      %c0_18 = arith.constant 0 : index
      %c0_19 = arith.constant 0 : index
      %29 = vector.load %arg8[%28, %c0_18, %c0_19] : memref<2x8x1xf32, #tpu.memory_space<vmem>>, vector<1x8x1xf32>
      %30 = vector.shape_cast %29 : vector<1x8x1xf32> to vector<8x1xf32>
      %31 = vector.shape_cast %27 : vector<8x1xf32> to vector<1x8x1xf32>
      tpu.vector_store %arg8[%28, %c0_18, %c0_19], %31 {strides = array<i32>} : memref<2x8x1xf32, #tpu.memory_space<vmem>>, vector<1x8x1xf32>,
      %32 = arith.index_cast %11 : i32 to index
      %c0_20 = arith.constant 0 : index
      %c0_21 = arith.constant 0 : index
      %33 = vector.load %arg7[%32, %c0_20, %c0_21] : memref<2x8x8xf32, #tpu.memory_space<vmem>>, vector<1x8x8xf32>
      %34 = vector.shape_cast %33 : vector<1x8x8xf32> to vector<8x8xf32>
      %cst_22 = arith.constant dense<0.000000e+00> : vector<8x8xf32>
      %35 = tpu.matmul %21, %21, %cst_22 {dimension_numbers = #tpu.dot_dimension_numbers<[1], [1], [0], [0], [0, 0, 1, 0], [], []>, precision = #tpu.contract_precision<fp32>} : vector<8x128xf32>, vector<8x128xf32>, vector<8x8xf32> -> vector<8x8xf32>
      %36 = arith.addf %34, %35 : vector<8x8xf32>
      %37 = arith.index_cast %11 : i32 to index
      %c0_23 = arith.constant 0 : index
      %c0_24 = arith.constant 0 : index
      %38 = vector.load %arg7[%37, %c0_23, %c0_24] : memref<2x8x8xf32, #tpu.memory_space<vmem>>, vector<1x8x8xf32>
      %39 = vector.shape_cast %38 : vector<1x8x8xf32> to vector<8x8xf32>
      %40 = vector.shape_cast %36 : vector<8x8xf32> to vector<1x8x8xf32>
      tpu.vector_store %arg7[%37, %c0_23, %c0_24], %40 {strides = array<i32>} : memref<2x8x8xf32, #tpu.memory_space<vmem>>, vector<1x8x8xf32>,
    }
    %c2_i32_7 = arith.constant 2 : i32
    %c1_i32_8 = arith.constant 1 : i32
    %7 = arith.cmpi eq, %arg1, %c1_i32_8 : i32
    %8 = arith.extui %7 : i1 to i32
    %c0_i32_9 = arith.constant 0 : i32
    %9 = arith.cmpi ne, %8, %c0_i32_9 : i32
    scf.if %9 {
      %10 = tpu.iota {dimensions = array<i32: 0>} : vector<8x8xi32>
      %11 = tpu.iota {dimensions = array<i32: 1>} : vector<8x8xi32>
      %12 = tpu.iota {dimensions = array<i32: 1>} : vector<1x8xi32>
      %13 = tpu.iota {dimensions = array<i32: 0>} : vector<8x1xi32>
      %14 = tpu.iota {dimensions = array<i32: 0>} : vector<8x1xi32>
      %15 = arith.cmpi eq, %10, %11 : vector<8x8xi32>
      %cst = arith.constant 9.99999997E-7 : f32
      %cst_10 = arith.constant 0.000000e+00 : f32
      %16 = vector.broadcast %cst : f32 to vector<8x8xf32>
      %17 = vector.broadcast %cst_10 : f32 to vector<8x8xf32>
      %18 = arith.select %15, %16, %17 : vector<8x8xi1>, vector<8x8xf32>
      %c0_11 = arith.constant 0 : index
      %c0_12 = arith.constant 0 : index
      %c0_13 = arith.constant 0 : index
      %19 = vector.load %arg8[%c0_11, %c0_12, %c0_13] : memref<2x8x1xf32, #tpu.memory_space<vmem>>, vector<1x8x1xf32>
      %20 = vector.shape_cast %19 : vector<1x8x1xf32> to vector<8x1xf32>
      %cst_14 = arith.constant 3.906250e-03 : f32
      %21 = vector.broadcast %cst_14 : f32 to vector<8x1xf32>
      %22 = arith.mulf %20, %21 : vector<8x1xf32>
      %cst_15 = arith.constant dense<0.000000e+00> : vector<8x8xf32>
      %23 = tpu.matmul %22, %22, %cst_15 {dimension_numbers = #tpu.dot_dimension_numbers<[1], [1], [0], [0], [0, 0, 1, 0], [], []>, precision = #tpu.contract_precision<fp32>} : vector<8x1xf32>, vector<8x1xf32>, vector<8x8xf32> -> vector<8x8xf32>
      %c0_16 = arith.constant 0 : index
      %c0_17 = arith.constant 0 : index
      %c0_18 = arith.constant 0 : index
      %24 = vector.load %arg7[%c0_16, %c0_17, %c0_18] : memref<2x8x8xf32, #tpu.memory_space<vmem>>, vector<1x8x8xf32>
      %25 = vector.shape_cast %24 : vector<1x8x8xf32> to vector<8x8xf32>
      %cst_19 = arith.constant 3.906250e-03 : f32
      %26 = vector.broadcast %cst_19 : f32 to vector<8x8xf32>
      %27 = arith.mulf %25, %26 : vector<8x8xf32>
      %28 = arith.subf %27, %23 : vector<8x8xf32>
      %29 = arith.addf %28, %18 : vector<8x8xf32>
      %c0_20 = arith.constant 0 : index
      %c0_21 = arith.constant 0 : index
      %c0_22 = arith.constant 0 : index
      %30 = vector.load %arg7[%c0_20, %c0_21, %c0_22] : memref<2x8x8xf32, #tpu.memory_space<vmem>>, vector<1x8x8xf32>
      %31 = vector.shape_cast %30 : vector<1x8x8xf32> to vector<8x8xf32>
      %32 = vector.shape_cast %29 : vector<8x8xf32> to vector<1x8x8xf32>
      tpu.vector_store %arg7[%c0_20, %c0_21, %c0_22], %32 {strides = array<i32>} : memref<2x8x8xf32, #tpu.memory_space<vmem>>, vector<1x8x8xf32>,
      %c1 = arith.constant 1 : index
      %c0_23 = arith.constant 0 : index
      %c0_24 = arith.constant 0 : index
      %33 = vector.load %arg8[%c1, %c0_23, %c0_24] : memref<2x8x1xf32, #tpu.memory_space<vmem>>, vector<1x8x1xf32>
      %34 = vector.shape_cast %33 : vector<1x8x1xf32> to vector<8x1xf32>
      %cst_25 = arith.constant 3.906250e-03 : f32
      %35 = vector.broadcast %cst_25 : f32 to vector<8x1xf32>
      %36 = arith.mulf %34, %35 : vector<8x1xf32>
      %cst_26 = arith.constant dense<0.000000e+00> : vector<8x8xf32>
      %37 = tpu.matmul %36, %36, %cst_26 {dimension_numbers = #tpu.dot_dimension_numbers<[1], [1], [0], [0], [0, 0, 1, 0], [], []>, precision = #tpu.contract_precision<fp32>} : vector<8x1xf32>, vector<8x1xf32>, vector<8x8xf32> -> vector<8x8xf32>
      %c1_27 = arith.constant 1 : index
      %c0_28 = arith.constant 0 : index
      %c0_29 = arith.constant 0 : index
      %38 = vector.load %arg7[%c1_27, %c0_28, %c0_29] : memref<2x8x8xf32, #tpu.memory_space<vmem>>, vector<1x8x8xf32>
      %39 = vector.shape_cast %38 : vector<1x8x8xf32> to vector<8x8xf32>
      %cst_30 = arith.constant 3.906250e-03 : f32
      %40 = vector.broadcast %cst_30 : f32 to vector<8x8xf32>
      %41 = arith.mulf %39, %40 : vector<8x8xf32>
      %42 = arith.subf %41, %37 : vector<8x8xf32>
      %43 = arith.addf %42, %18 : vector<8x8xf32>
      %c1_31 = arith.constant 1 : index
      %c0_32 = arith.constant 0 : index
      %c0_33 = arith.constant 0 : index
      %44 = vector.load %arg7[%c1_31, %c0_32, %c0_33] : memref<2x8x8xf32, #tpu.memory_space<vmem>>, vector<1x8x8xf32>
      %45 = vector.shape_cast %44 : vector<1x8x8xf32> to vector<8x8xf32>
      %46 = vector.shape_cast %43 : vector<8x8xf32> to vector<1x8x8xf32>
      tpu.vector_store %arg7[%c1_31, %c0_32, %c0_33], %46 {strides = array<i32>} : memref<2x8x8xf32, #tpu.memory_space<vmem>>, vector<1x8x8xf32>,
      %c0_i32_34 = arith.constant 0 : i32
      %c1_i32_35 = arith.constant 1 : i32
      %47 = arith.muli %c0_i32_34, %c1_i32_35 : i32
      %c0_i32_36 = arith.constant 0 : i32
      %48 = arith.addi %c0_i32_36, %47 : i32
      %c8_i32 = arith.constant 8 : i32
      %49 = arith.muli %48, %c8_i32 : i32
      %50 = tpu.assume_multiple %49, 8 : i32
      %c0_37 = arith.constant 0 : index
      %51 = arith.index_cast %50 : i32 to index
      %c0_38 = arith.constant 0 : index
      %52 = vector.load %arg7[%c0_37, %51, %c0_38] : memref<2x8x8xf32, #tpu.memory_space<vmem>>, vector<1x8x8xf32>
      %53 = vector.shape_cast %52 : vector<1x8x8xf32> to vector<8x8xf32>
      %cst_39 = arith.constant 0.000000e+00 : f32
      %54 = vector.broadcast %cst_39 : f32 to vector<1x8xf32>
      %c0_i32_40 = arith.constant 0 : i32
      %55 = arith.addi %50, %c0_i32_40 : i32
      %56 = vector.extract_strided_slice %53 {offsets = [0, 0], sizes = [1, 8], strides = [1, 1]} : vector<8x8xf32> to vector<1x8xf32>
      %57 = vector.broadcast %55 : i32 to vector<1x8xi32>
      %58 = arith.cmpi eq, %12, %57 : vector<1x8xi32>
      %cst_41 = arith.constant 0.000000e+00 : f32
      %59 = vector.broadcast %cst_41 : f32 to vector<1x8xf32>
      %60 = arith.select %58, %56, %59 : vector<1x8xi1>, vector<1x8xf32>
      %cst_42 = arith.constant dense<0.000000e+00> : vector<1xf32>
      %61 = vector.multi_reduction <add>, %60, %cst_42 [1] : vector<1x8xf32> to vector<1xf32>
      %62 = vector.shape_cast %61 : vector<1xf32> to vector<1x1xf32>
      %cst_43 = arith.constant 1.000000e-30 : f32
      %63 = vector.broadcast %cst_43 : f32 to vector<1x1xf32>
      %64 = arith.maximumf %62, %63 : vector<1x1xf32>
      %65 = math.rsqrt %64 : vector<1x1xf32>
      %66 = vector.broadcast %55 : i32 to vector<1x8xi32>
      %67 = arith.cmpi slt, %12, %66 : vector<1x8xi32>
      %68 = vector.broadcast %55 : i32 to vector<1x8xi32>
      %69 = arith.cmpi eq, %12, %68 : vector<1x8xi32>
      %70 = arith.mulf %64, %65 : vector<1x1xf32>
      %71 = vector.broadcast %65 : vector<1x1xf32> to vector<1x8xf32>
      %72 = arith.mulf %56, %71 : vector<1x8xf32>
      %73 = vector.shape_cast %70 : vector<1x1xf32> to vector<1x1xf32>
      %74 = vector.broadcast %73 : vector<1x1xf32> to vector<1x8xf32>
      %75 = arith.select %69, %74, %72 : vector<1x8xi1>, vector<1x8xf32>
      %cst_44 = arith.constant 0.000000e+00 : f32
      %76 = vector.broadcast %cst_44 : f32 to vector<1x8xf32>
      %77 = arith.select %67, %76, %75 : vector<1x8xi1>, vector<1x8xf32>
      %78 = vector.broadcast %55 : i32 to vector<1x8xi32>
      %79 = arith.cmpi eq, %12, %78 : vector<1x8xi32>
      %80 = vector.shape_cast %64 : vector<1x1xf32> to vector<1x1xf32>
      %81 = vector.broadcast %80 : vector<1x1xf32> to vector<1x8xf32>
      %82 = arith.select %79, %81, %54 : vector<1x8xi1>, vector<1x8xf32>
      %83 = vector.broadcast %55 : i32 to vector<1x8xi32>
      %84 = arith.cmpi eq, %12, %83 : vector<1x8xi32>
      %cst_45 = arith.constant 0.000000e+00 : f32
      %85 = vector.shape_cast %84 : vector<1x8xi1> to vector<1x8xi1>
      %86 = vector.broadcast %85 : vector<1x8xi1> to vector<8x8xi1>
      %87 = vector.broadcast %cst_45 : f32 to vector<8x8xf32>
      %88 = arith.select %86, %53, %87 : vector<8x8xi1>, vector<8x8xf32>
      %cst_46 = arith.constant dense<0.000000e+00> : vector<8xf32>
      %89 = vector.multi_reduction <add>, %88, %cst_46 [1] : vector<8x8xf32> to vector<8xf32>
      %90 = vector.shape_cast %89 : vector<8xf32> to vector<8x1xf32>
      %91 = vector.broadcast %65 : vector<1x1xf32> to vector<8x1xf32>
      %92 = arith.mulf %90, %91 : vector<8x1xf32>
      %c0_i32_47 = arith.constant 0 : i32
      %93 = vector.broadcast %c0_i32_47 : i32 to vector<8x1xi32>
      %94 = arith.cmpi sle, %14, %93 : vector<8x1xi32>
      %cst_48 = arith.constant 0.000000e+00 : f32
      %95 = vector.broadcast %cst_48 : f32 to vector<8x1xf32>
      %96 = arith.select %94, %95, %92 : vector<8x1xi1>, vector<8x1xf32>
      %c0_i32_49 = arith.constant 0 : i32
      %97 = vector.broadcast %c0_i32_49 : i32 to vector<8x1xi32>
      %98 = arith.cmpi eq, %14, %97 : vector<8x1xi32>
      %99 = vector.broadcast %96 : vector<8x1xf32> to vector<8x8xf32>
      %100 = vector.broadcast %77 : vector<1x8xf32> to vector<8x8xf32>
      %101 = arith.mulf %99, %100 : vector<8x8xf32>
      %102 = arith.subf %53, %101 : vector<8x8xf32>
      %103 = vector.shape_cast %98 : vector<8x1xi1> to vector<8x1xi1>
      %104 = vector.broadcast %103 : vector<8x1xi1> to vector<8x8xi1>
      %105 = vector.shape_cast %77 : vector<1x8xf32> to vector<1x8xf32>
      %106 = vector.broadcast %105 : vector<1x8xf32> to vector<8x8xf32>
      %107 = arith.select %104, %106, %102 : vector<8x8xi1>, vector<8x8xf32>
      %c1_i32_50 = arith.constant 1 : i32
      %108 = arith.addi %50, %c1_i32_50 : i32
      %109 = vector.extract_strided_slice %107 {offsets = [1, 0], sizes = [1, 8], strides = [1, 1]} : vector<8x8xf32> to vector<1x8xf32>
      %110 = vector.broadcast %108 : i32 to vector<1x8xi32>
      %111 = arith.cmpi eq, %12, %110 : vector<1x8xi32>
      %cst_51 = arith.constant 0.000000e+00 : f32
      %112 = vector.broadcast %cst_51 : f32 to vector<1x8xf32>
      %113 = arith.select %111, %109, %112 : vector<1x8xi1>, vector<1x8xf32>
      %cst_52 = arith.constant dense<0.000000e+00> : vector<1xf32>
      %114 = vector.multi_reduction <add>, %113, %cst_52 [1] : vector<1x8xf32> to vector<1xf32>
      %115 = vector.shape_cast %114 : vector<1xf32> to vector<1x1xf32>
      %cst_53 = arith.constant 1.000000e-30 : f32
      %116 = vector.broadcast %cst_53 : f32 to vector<1x1xf32>
      %117 = arith.maximumf %115, %116 : vector<1x1xf32>
      %118 = math.rsqrt %117 : vector<1x1xf32>
      %119 = vector.broadcast %108 : i32 to vector<1x8xi32>
      %120 = arith.cmpi slt, %12, %119 : vector<1x8xi32>
      %121 = vector.broadcast %108 : i32 to vector<1x8xi32>
      %122 = arith.cmpi eq, %12, %121 : vector<1x8xi32>
      %123 = arith.mulf %117, %118 : vector<1x1xf32>
      %124 = vector.broadcast %118 : vector<1x1xf32> to vector<1x8xf32>
      %125 = arith.mulf %109, %124 : vector<1x8xf32>
      %126 = vector.shape_cast %123 : vector<1x1xf32> to vector<1x1xf32>
      %127 = vector.broadcast %126 : vector<1x1xf32> to vector<1x8xf32>
      %128 = arith.select %122, %127, %125 : vector<1x8xi1>, vector<1x8xf32>
      %cst_54 = arith.constant 0.000000e+00 : f32
      %129 = vector.broadcast %cst_54 : f32 to vector<1x8xf32>
      %130 = arith.select %120, %129, %128 : vector<1x8xi1>, vector<1x8xf32>
      %131 = vector.broadcast %108 : i32 to vector<1x8xi32>
      %132 = arith.cmpi eq, %12, %131 : vector<1x8xi32>
      %133 = vector.shape_cast %117 : vector<1x1xf32> to vector<1x1xf32>
      %134 = vector.broadcast %133 : vector<1x1xf32> to vector<1x8xf32>
      %135 = arith.select %132, %134, %82 : vector<1x8xi1>, vector<1x8xf32>
      %136 = vector.broadcast %108 : i32 to vector<1x8xi32>
      %137 = arith.cmpi eq, %12, %136 : vector<1x8xi32>
      %cst_55 = arith.constant 0.000000e+00 : f32
      %138 = vector.shape_cast %137 : vector<1x8xi1> to vector<1x8xi1>
      %139 = vector.broadcast %138 : vector<1x8xi1> to vector<8x8xi1>
      %140 = vector.broadcast %cst_55 : f32 to vector<8x8xf32>
      %141 = arith.select %139, %107, %140 : vector<8x8xi1>, vector<8x8xf32>
      %cst_56 = arith.constant dense<0.000000e+00> : vector<8xf32>
      %142 = vector.multi_reduction <add>, %141, %cst_56 [1] : vector<8x8xf32> to vector<8xf32>
      %143 = vector.shape_cast %142 : vector<8xf32> to vector<8x1xf32>
      %144 = vector.broadcast %118 : vector<1x1xf32> to vector<8x1xf32>
      %145 = arith.mulf %143, %144 : vector<8x1xf32>
      %c1_i32_57 = arith.constant 1 : i32
      %146 = vector.broadcast %c1_i32_57 : i32 to vector<8x1xi32>
      %147 = arith.cmpi sle, %14, %146 : vector<8x1xi32>
      %cst_58 = arith.constant 0.000000e+00 : f32
      %148 = vector.broadcast %cst_58 : f32 to vector<8x1xf32>
      %149 = arith.select %147, %148, %145 : vector<8x1xi1>, vector<8x1xf32>
      %c1_i32_59 = arith.constant 1 : i32
      %150 = vector.broadcast %c1_i32_59 : i32 to vector<8x1xi32>
      %151 = arith.cmpi eq, %14, %150 : vector<8x1xi32>
      %152 = vector.broadcast %149 : vector<8x1xf32> to vector<8x8xf32>
      %153 = vector.broadcast %130 : vector<1x8xf32> to vector<8x8xf32>
      %154 = arith.mulf %152, %153 : vector<8x8xf32>
      %155 = arith.subf %107, %154 : vector<8x8xf32>
      %156 = vector.shape_cast %151 : vector<8x1xi1> to vector<8x1xi1>
      %157 = vector.broadcast %156 : vector<8x1xi1> to vector<8x8xi1>
      %158 = vector.shape_cast %130 : vector<1x8xf32> to vector<1x8xf32>
      %159 = vector.broadcast %158 : vector<1x8xf32> to vector<8x8xf32>
      %160 = arith.select %157, %159, %155 : vector<8x8xi1>, vector<8x8xf32>
      %c2_i32_60 = arith.constant 2 : i32
      %161 = arith.addi %50, %c2_i32_60 : i32
      %162 = vector.extract_strided_slice %160 {offsets = [2, 0], sizes = [1, 8], strides = [1, 1]} : vector<8x8xf32> to vector<1x8xf32>
      %163 = vector.broadcast %161 : i32 to vector<1x8xi32>
      %164 = arith.cmpi eq, %12, %163 : vector<1x8xi32>
      %cst_61 = arith.constant 0.000000e+00 : f32
      %165 = vector.broadcast %cst_61 : f32 to vector<1x8xf32>
      %166 = arith.select %164, %162, %165 : vector<1x8xi1>, vector<1x8xf32>
      %cst_62 = arith.constant dense<0.000000e+00> : vector<1xf32>
      %167 = vector.multi_reduction <add>, %166, %cst_62 [1] : vector<1x8xf32> to vector<1xf32>
      %168 = vector.shape_cast %167 : vector<1xf32> to vector<1x1xf32>
      %cst_63 = arith.constant 1.000000e-30 : f32
      %169 = vector.broadcast %cst_63 : f32 to vector<1x1xf32>
      %170 = arith.maximumf %168, %169 : vector<1x1xf32>
      %171 = math.rsqrt %170 : vector<1x1xf32>
      %172 = vector.broadcast %161 : i32 to vector<1x8xi32>
      %173 = arith.cmpi slt, %12, %172 : vector<1x8xi32>
      %174 = vector.broadcast %161 : i32 to vector<1x8xi32>
      %175 = arith.cmpi eq, %12, %174 : vector<1x8xi32>
      %176 = arith.mulf %170, %171 : vector<1x1xf32>
      %177 = vector.broadcast %171 : vector<1x1xf32> to vector<1x8xf32>
      %178 = arith.mulf %162, %177 : vector<1x8xf32>
      %179 = vector.shape_cast %176 : vector<1x1xf32> to vector<1x1xf32>
      %180 = vector.broadcast %179 : vector<1x1xf32> to vector<1x8xf32>
      %181 = arith.select %175, %180, %178 : vector<1x8xi1>, vector<1x8xf32>
      %cst_64 = arith.constant 0.000000e+00 : f32
      %182 = vector.broadcast %cst_64 : f32 to vector<1x8xf32>
      %183 = arith.select %173, %182, %181 : vector<1x8xi1>, vector<1x8xf32>
      %184 = vector.broadcast %161 : i32 to vector<1x8xi32>
      %185 = arith.cmpi eq, %12, %184 : vector<1x8xi32>
      %186 = vector.shape_cast %170 : vector<1x1xf32> to vector<1x1xf32>
      %187 = vector.broadcast %186 : vector<1x1xf32> to vector<1x8xf32>
      %188 = arith.select %185, %187, %135 : vector<1x8xi1>, vector<1x8xf32>
      %189 = vector.broadcast %161 : i32 to vector<1x8xi32>
      %190 = arith.cmpi eq, %12, %189 : vector<1x8xi32>
      %cst_65 = arith.constant 0.000000e+00 : f32
      %191 = vector.shape_cast %190 : vector<1x8xi1> to vector<1x8xi1>
      %192 = vector.broadcast %191 : vector<1x8xi1> to vector<8x8xi1>
      %193 = vector.broadcast %cst_65 : f32 to vector<8x8xf32>
      %194 = arith.select %192, %160, %193 : vector<8x8xi1>, vector<8x8xf32>
      %cst_66 = arith.constant dense<0.000000e+00> : vector<8xf32>
      %195 = vector.multi_reduction <add>, %194, %cst_66 [1] : vector<8x8xf32> to vector<8xf32>
      %196 = vector.shape_cast %195 : vector<8xf32> to vector<8x1xf32>
      %197 = vector.broadcast %171 : vector<1x1xf32> to vector<8x1xf32>
      %198 = arith.mulf %196, %197 : vector<8x1xf32>
      %c2_i32_67 = arith.constant 2 : i32
      %199 = vector.broadcast %c2_i32_67 : i32 to vector<8x1xi32>
      %200 = arith.cmpi sle, %14, %199 : vector<8x1xi32>
      %cst_68 = arith.constant 0.000000e+00 : f32
      %201 = vector.broadcast %cst_68 : f32 to vector<8x1xf32>
      %202 = arith.select %200, %201, %198 : vector<8x1xi1>, vector<8x1xf32>
      %c2_i32_69 = arith.constant 2 : i32
      %203 = vector.broadcast %c2_i32_69 : i32 to vector<8x1xi32>
      %204 = arith.cmpi eq, %14, %203 : vector<8x1xi32>
      %205 = vector.broadcast %202 : vector<8x1xf32> to vector<8x8xf32>
      %206 = vector.broadcast %183 : vector<1x8xf32> to vector<8x8xf32>
      %207 = arith.mulf %205, %206 : vector<8x8xf32>
      %208 = arith.subf %160, %207 : vector<8x8xf32>
      %209 = vector.shape_cast %204 : vector<8x1xi1> to vector<8x1xi1>
      %210 = vector.broadcast %209 : vector<8x1xi1> to vector<8x8xi1>
      %211 = vector.shape_cast %183 : vector<1x8xf32> to vector<1x8xf32>
      %212 = vector.broadcast %211 : vector<1x8xf32> to vector<8x8xf32>
      %213 = arith.select %210, %212, %208 : vector<8x8xi1>, vector<8x8xf32>
      %c3_i32 = arith.constant 3 : i32
      %214 = arith.addi %50, %c3_i32 : i32
      %215 = vector.extract_strided_slice %213 {offsets = [3, 0], sizes = [1, 8], strides = [1, 1]} : vector<8x8xf32> to vector<1x8xf32>
      %216 = vector.broadcast %214 : i32 to vector<1x8xi32>
      %217 = arith.cmpi eq, %12, %216 : vector<1x8xi32>
      %cst_70 = arith.constant 0.000000e+00 : f32
      %218 = vector.broadcast %cst_70 : f32 to vector<1x8xf32>
      %219 = arith.select %217, %215, %218 : vector<1x8xi1>, vector<1x8xf32>
      %cst_71 = arith.constant dense<0.000000e+00> : vector<1xf32>
      %220 = vector.multi_reduction <add>, %219, %cst_71 [1] : vector<1x8xf32> to vector<1xf32>
      %221 = vector.shape_cast %220 : vector<1xf32> to vector<1x1xf32>
      %cst_72 = arith.constant 1.000000e-30 : f32
      %222 = vector.broadcast %cst_72 : f32 to vector<1x1xf32>
      %223 = arith.maximumf %221, %222 : vector<1x1xf32>
      %224 = math.rsqrt %223 : vector<1x1xf32>
      %225 = vector.broadcast %214 : i32 to vector<1x8xi32>
      %226 = arith.cmpi slt, %12, %225 : vector<1x8xi32>
      %227 = vector.broadcast %214 : i32 to vector<1x8xi32>
      %228 = arith.cmpi eq, %12, %227 : vector<1x8xi32>
      %229 = arith.mulf %223, %224 : vector<1x1xf32>
      %230 = vector.broadcast %224 : vector<1x1xf32> to vector<1x8xf32>
      %231 = arith.mulf %215, %230 : vector<1x8xf32>
      %232 = vector.shape_cast %229 : vector<1x1xf32> to vector<1x1xf32>
      %233 = vector.broadcast %232 : vector<1x1xf32> to vector<1x8xf32>
      %234 = arith.select %228, %233, %231 : vector<1x8xi1>, vector<1x8xf32>
      %cst_73 = arith.constant 0.000000e+00 : f32
      %235 = vector.broadcast %cst_73 : f32 to vector<1x8xf32>
      %236 = arith.select %226, %235, %234 : vector<1x8xi1>, vector<1x8xf32>
      %237 = vector.broadcast %214 : i32 to vector<1x8xi32>
      %238 = arith.cmpi eq, %12, %237 : vector<1x8xi32>
      %239 = vector.shape_cast %223 : vector<1x1xf32> to vector<1x1xf32>
      %240 = vector.broadcast %239 : vector<1x1xf32> to vector<1x8xf32>
      %241 = arith.select %238, %240, %188 : vector<1x8xi1>, vector<1x8xf32>
      %242 = vector.broadcast %214 : i32 to vector<1x8xi32>
      %243 = arith.cmpi eq, %12, %242 : vector<1x8xi32>
      %cst_74 = arith.constant 0.000000e+00 : f32
      %244 = vector.shape_cast %243 : vector<1x8xi1> to vector<1x8xi1>
      %245 = vector.broadcast %244 : vector<1x8xi1> to vector<8x8xi1>
      %246 = vector.broadcast %cst_74 : f32 to vector<8x8xf32>
      %247 = arith.select %245, %213, %246 : vector<8x8xi1>, vector<8x8xf32>
      %cst_75 = arith.constant dense<0.000000e+00> : vector<8xf32>
      %248 = vector.multi_reduction <add>, %247, %cst_75 [1] : vector<8x8xf32> to vector<8xf32>
      %249 = vector.shape_cast %248 : vector<8xf32> to vector<8x1xf32>
      %250 = vector.broadcast %224 : vector<1x1xf32> to vector<8x1xf32>
      %251 = arith.mulf %249, %250 : vector<8x1xf32>
      %c3_i32_76 = arith.constant 3 : i32
      %252 = vector.broadcast %c3_i32_76 : i32 to vector<8x1xi32>
      %253 = arith.cmpi sle, %14, %252 : vector<8x1xi32>
      %cst_77 = arith.constant 0.000000e+00 : f32
      %254 = vector.broadcast %cst_77 : f32 to vector<8x1xf32>
      %255 = arith.select %253, %254, %251 : vector<8x1xi1>, vector<8x1xf32>
      %c3_i32_78 = arith.constant 3 : i32
      %256 = vector.broadcast %c3_i32_78 : i32 to vector<8x1xi32>
      %257 = arith.cmpi eq, %14, %256 : vector<8x1xi32>
      %258 = vector.broadcast %255 : vector<8x1xf32> to vector<8x8xf32>
      %259 = vector.broadcast %236 : vector<1x8xf32> to vector<8x8xf32>
      %260 = arith.mulf %258, %259 : vector<8x8xf32>
      %261 = arith.subf %213, %260 : vector<8x8xf32>
      %262 = vector.shape_cast %257 : vector<8x1xi1> to vector<8x1xi1>
      %263 = vector.broadcast %262 : vector<8x1xi1> to vector<8x8xi1>
      %264 = vector.shape_cast %236 : vector<1x8xf32> to vector<1x8xf32>
      %265 = vector.broadcast %264 : vector<1x8xf32> to vector<8x8xf32>
      %266 = arith.select %263, %265, %261 : vector<8x8xi1>, vector<8x8xf32>
      %c4_i32 = arith.constant 4 : i32
      %267 = arith.addi %50, %c4_i32 : i32
      %268 = vector.extract_strided_slice %266 {offsets = [4, 0], sizes = [1, 8], strides = [1, 1]} : vector<8x8xf32> to vector<1x8xf32>
      %269 = vector.broadcast %267 : i32 to vector<1x8xi32>
      %270 = arith.cmpi eq, %12, %269 : vector<1x8xi32>
      %cst_79 = arith.constant 0.000000e+00 : f32
      %271 = vector.broadcast %cst_79 : f32 to vector<1x8xf32>
      %272 = arith.select %270, %268, %271 : vector<1x8xi1>, vector<1x8xf32>
      %cst_80 = arith.constant dense<0.000000e+00> : vector<1xf32>
      %273 = vector.multi_reduction <add>, %272, %cst_80 [1] : vector<1x8xf32> to vector<1xf32>
      %274 = vector.shape_cast %273 : vector<1xf32> to vector<1x1xf32>
      %cst_81 = arith.constant 1.000000e-30 : f32
      %275 = vector.broadcast %cst_81 : f32 to vector<1x1xf32>
      %276 = arith.maximumf %274, %275 : vector<1x1xf32>
      %277 = math.rsqrt %276 : vector<1x1xf32>
      %278 = vector.broadcast %267 : i32 to vector<1x8xi32>
      %279 = arith.cmpi slt, %12, %278 : vector<1x8xi32>
      %280 = vector.broadcast %267 : i32 to vector<1x8xi32>
      %281 = arith.cmpi eq, %12, %280 : vector<1x8xi32>
      %282 = arith.mulf %276, %277 : vector<1x1xf32>
      %283 = vector.broadcast %277 : vector<1x1xf32> to vector<1x8xf32>
      %284 = arith.mulf %268, %283 : vector<1x8xf32>
      %285 = vector.shape_cast %282 : vector<1x1xf32> to vector<1x1xf32>
      %286 = vector.broadcast %285 : vector<1x1xf32> to vector<1x8xf32>
      %287 = arith.select %281, %286, %284 : vector<1x8xi1>, vector<1x8xf32>
      %cst_82 = arith.constant 0.000000e+00 : f32
      %288 = vector.broadcast %cst_82 : f32 to vector<1x8xf32>
      %289 = arith.select %279, %288, %287 : vector<1x8xi1>, vector<1x8xf32>
      %290 = vector.broadcast %267 : i32 to vector<1x8xi32>
      %291 = arith.cmpi eq, %12, %290 : vector<1x8xi32>
      %292 = vector.shape_cast %276 : vector<1x1xf32> to vector<1x1xf32>
      %293 = vector.broadcast %292 : vector<1x1xf32> to vector<1x8xf32>
      %294 = arith.select %291, %293, %241 : vector<1x8xi1>, vector<1x8xf32>
      %295 = vector.broadcast %267 : i32 to vector<1x8xi32>
      %296 = arith.cmpi eq, %12, %295 : vector<1x8xi32>
      %cst_83 = arith.constant 0.000000e+00 : f32
      %297 = vector.shape_cast %296 : vector<1x8xi1> to vector<1x8xi1>
      %298 = vector.broadcast %297 : vector<1x8xi1> to vector<8x8xi1>
      %299 = vector.broadcast %cst_83 : f32 to vector<8x8xf32>
      %300 = arith.select %298, %266, %299 : vector<8x8xi1>, vector<8x8xf32>
      %cst_84 = arith.constant dense<0.000000e+00> : vector<8xf32>
      %301 = vector.multi_reduction <add>, %300, %cst_84 [1] : vector<8x8xf32> to vector<8xf32>
      %302 = vector.shape_cast %301 : vector<8xf32> to vector<8x1xf32>
      %303 = vector.broadcast %277 : vector<1x1xf32> to vector<8x1xf32>
      %304 = arith.mulf %302, %303 : vector<8x1xf32>
      %c4_i32_85 = arith.constant 4 : i32
      %305 = vector.broadcast %c4_i32_85 : i32 to vector<8x1xi32>
      %306 = arith.cmpi sle, %14, %305 : vector<8x1xi32>
      %cst_86 = arith.constant 0.000000e+00 : f32
      %307 = vector.broadcast %cst_86 : f32 to vector<8x1xf32>
      %308 = arith.select %306, %307, %304 : vector<8x1xi1>, vector<8x1xf32>
      %c4_i32_87 = arith.constant 4 : i32
      %309 = vector.broadcast %c4_i32_87 : i32 to vector<8x1xi32>
      %310 = arith.cmpi eq, %14, %309 : vector<8x1xi32>
      %311 = vector.broadcast %308 : vector<8x1xf32> to vector<8x8xf32>
      %312 = vector.broadcast %289 : vector<1x8xf32> to vector<8x8xf32>
      %313 = arith.mulf %311, %312 : vector<8x8xf32>
      %314 = arith.subf %266, %313 : vector<8x8xf32>
      %315 = vector.shape_cast %310 : vector<8x1xi1> to vector<8x1xi1>
      %316 = vector.broadcast %315 : vector<8x1xi1> to vector<8x8xi1>
      %317 = vector.shape_cast %289 : vector<1x8xf32> to vector<1x8xf32>
      %318 = vector.broadcast %317 : vector<1x8xf32> to vector<8x8xf32>
      %319 = arith.select %316, %318, %314 : vector<8x8xi1>, vector<8x8xf32>
      %c5_i32 = arith.constant 5 : i32
      %320 = arith.addi %50, %c5_i32 : i32
      %321 = vector.extract_strided_slice %319 {offsets = [5, 0], sizes = [1, 8], strides = [1, 1]} : vector<8x8xf32> to vector<1x8xf32>
      %322 = vector.broadcast %320 : i32 to vector<1x8xi32>
      %323 = arith.cmpi eq, %12, %322 : vector<1x8xi32>
      %cst_88 = arith.constant 0.000000e+00 : f32
      %324 = vector.broadcast %cst_88 : f32 to vector<1x8xf32>
      %325 = arith.select %323, %321, %324 : vector<1x8xi1>, vector<1x8xf32>
      %cst_89 = arith.constant dense<0.000000e+00> : vector<1xf32>
      %326 = vector.multi_reduction <add>, %325, %cst_89 [1] : vector<1x8xf32> to vector<1xf32>
      %327 = vector.shape_cast %326 : vector<1xf32> to vector<1x1xf32>
      %cst_90 = arith.constant 1.000000e-30 : f32
      %328 = vector.broadcast %cst_90 : f32 to vector<1x1xf32>
      %329 = arith.maximumf %327, %328 : vector<1x1xf32>
      %330 = math.rsqrt %329 : vector<1x1xf32>
      %331 = vector.broadcast %320 : i32 to vector<1x8xi32>
      %332 = arith.cmpi slt, %12, %331 : vector<1x8xi32>
      %333 = vector.broadcast %320 : i32 to vector<1x8xi32>
      %334 = arith.cmpi eq, %12, %333 : vector<1x8xi32>
      %335 = arith.mulf %329, %330 : vector<1x1xf32>
      %336 = vector.broadcast %330 : vector<1x1xf32> to vector<1x8xf32>
      %337 = arith.mulf %321, %336 : vector<1x8xf32>
      %338 = vector.shape_cast %335 : vector<1x1xf32> to vector<1x1xf32>
      %339 = vector.broadcast %338 : vector<1x1xf32> to vector<1x8xf32>
      %340 = arith.select %334, %339, %337 : vector<1x8xi1>, vector<1x8xf32>
      %cst_91 = arith.constant 0.000000e+00 : f32
      %341 = vector.broadcast %cst_91 : f32 to vector<1x8xf32>
      %342 = arith.select %332, %341, %340 : vector<1x8xi1>, vector<1x8xf32>
      %343 = vector.broadcast %320 : i32 to vector<1x8xi32>
      %344 = arith.cmpi eq, %12, %343 : vector<1x8xi32>
      %345 = vector.shape_cast %329 : vector<1x1xf32> to vector<1x1xf32>
      %346 = vector.broadcast %345 : vector<1x1xf32> to vector<1x8xf32>
      %347 = arith.select %344, %346, %294 : vector<1x8xi1>, vector<1x8xf32>
      %348 = vector.broadcast %320 : i32 to vector<1x8xi32>
      %349 = arith.cmpi eq, %12, %348 : vector<1x8xi32>
      %cst_92 = arith.constant 0.000000e+00 : f32
      %350 = vector.shape_cast %349 : vector<1x8xi1> to vector<1x8xi1>
      %351 = vector.broadcast %350 : vector<1x8xi1> to vector<8x8xi1>
      %352 = vector.broadcast %cst_92 : f32 to vector<8x8xf32>
      %353 = arith.select %351, %319, %352 : vector<8x8xi1>, vector<8x8xf32>
      %cst_93 = arith.constant dense<0.000000e+00> : vector<8xf32>
      %354 = vector.multi_reduction <add>, %353, %cst_93 [1] : vector<8x8xf32> to vector<8xf32>
      %355 = vector.shape_cast %354 : vector<8xf32> to vector<8x1xf32>
      %356 = vector.broadcast %330 : vector<1x1xf32> to vector<8x1xf32>
      %357 = arith.mulf %355, %356 : vector<8x1xf32>
      %c5_i32_94 = arith.constant 5 : i32
      %358 = vector.broadcast %c5_i32_94 : i32 to vector<8x1xi32>
      %359 = arith.cmpi sle, %14, %358 : vector<8x1xi32>
      %cst_95 = arith.constant 0.000000e+00 : f32
      %360 = vector.broadcast %cst_95 : f32 to vector<8x1xf32>
      %361 = arith.select %359, %360, %357 : vector<8x1xi1>, vector<8x1xf32>
      %c5_i32_96 = arith.constant 5 : i32
      %362 = vector.broadcast %c5_i32_96 : i32 to vector<8x1xi32>
      %363 = arith.cmpi eq, %14, %362 : vector<8x1xi32>
      %364 = vector.broadcast %361 : vector<8x1xf32> to vector<8x8xf32>
      %365 = vector.broadcast %342 : vector<1x8xf32> to vector<8x8xf32>
      %366 = arith.mulf %364, %365 : vector<8x8xf32>
      %367 = arith.subf %319, %366 : vector<8x8xf32>
      %368 = vector.shape_cast %363 : vector<8x1xi1> to vector<8x1xi1>
      %369 = vector.broadcast %368 : vector<8x1xi1> to vector<8x8xi1>
      %370 = vector.shape_cast %342 : vector<1x8xf32> to vector<1x8xf32>
      %371 = vector.broadcast %370 : vector<1x8xf32> to vector<8x8xf32>
      %372 = arith.select %369, %371, %367 : vector<8x8xi1>, vector<8x8xf32>
      %c6_i32 = arith.constant 6 : i32
      %373 = arith.addi %50, %c6_i32 : i32
      %374 = vector.extract_strided_slice %372 {offsets = [6, 0], sizes = [1, 8], strides = [1, 1]} : vector<8x8xf32> to vector<1x8xf32>
      %375 = vector.broadcast %373 : i32 to vector<1x8xi32>
      %376 = arith.cmpi eq, %12, %375 : vector<1x8xi32>
      %cst_97 = arith.constant 0.000000e+00 : f32
      %377 = vector.broadcast %cst_97 : f32 to vector<1x8xf32>
      %378 = arith.select %376, %374, %377 : vector<1x8xi1>, vector<1x8xf32>
      %cst_98 = arith.constant dense<0.000000e+00> : vector<1xf32>
      %379 = vector.multi_reduction <add>, %378, %cst_98 [1] : vector<1x8xf32> to vector<1xf32>
      %380 = vector.shape_cast %379 : vector<1xf32> to vector<1x1xf32>
      %cst_99 = arith.constant 1.000000e-30 : f32
      %381 = vector.broadcast %cst_99 : f32 to vector<1x1xf32>
      %382 = arith.maximumf %380, %381 : vector<1x1xf32>
      %383 = math.rsqrt %382 : vector<1x1xf32>
      %384 = vector.broadcast %373 : i32 to vector<1x8xi32>
      %385 = arith.cmpi slt, %12, %384 : vector<1x8xi32>
      %386 = vector.broadcast %373 : i32 to vector<1x8xi32>
      %387 = arith.cmpi eq, %12, %386 : vector<1x8xi32>
      %388 = arith.mulf %382, %383 : vector<1x1xf32>
      %389 = vector.broadcast %383 : vector<1x1xf32> to vector<1x8xf32>
      %390 = arith.mulf %374, %389 : vector<1x8xf32>
      %391 = vector.shape_cast %388 : vector<1x1xf32> to vector<1x1xf32>
      %392 = vector.broadcast %391 : vector<1x1xf32> to vector<1x8xf32>
      %393 = arith.select %387, %392, %390 : vector<1x8xi1>, vector<1x8xf32>
      %cst_100 = arith.constant 0.000000e+00 : f32
      %394 = vector.broadcast %cst_100 : f32 to vector<1x8xf32>
      %395 = arith.select %385, %394, %393 : vector<1x8xi1>, vector<1x8xf32>
      %396 = vector.broadcast %373 : i32 to vector<1x8xi32>
      %397 = arith.cmpi eq, %12, %396 : vector<1x8xi32>
      %398 = vector.shape_cast %382 : vector<1x1xf32> to vector<1x1xf32>
      %399 = vector.broadcast %398 : vector<1x1xf32> to vector<1x8xf32>
      %400 = arith.select %397, %399, %347 : vector<1x8xi1>, vector<1x8xf32>
      %401 = vector.broadcast %373 : i32 to vector<1x8xi32>
      %402 = arith.cmpi eq, %12, %401 : vector<1x8xi32>
      %cst_101 = arith.constant 0.000000e+00 : f32
      %403 = vector.shape_cast %402 : vector<1x8xi1> to vector<1x8xi1>
      %404 = vector.broadcast %403 : vector<1x8xi1> to vector<8x8xi1>
      %405 = vector.broadcast %cst_101 : f32 to vector<8x8xf32>
      %406 = arith.select %404, %372, %405 : vector<8x8xi1>, vector<8x8xf32>
      %cst_102 = arith.constant dense<0.000000e+00> : vector<8xf32>
      %407 = vector.multi_reduction <add>, %406, %cst_102 [1] : vector<8x8xf32> to vector<8xf32>
      %408 = vector.shape_cast %407 : vector<8xf32> to vector<8x1xf32>
      %409 = vector.broadcast %383 : vector<1x1xf32> to vector<8x1xf32>
      %410 = arith.mulf %408, %409 : vector<8x1xf32>
      %c6_i32_103 = arith.constant 6 : i32
      %411 = vector.broadcast %c6_i32_103 : i32 to vector<8x1xi32>
      %412 = arith.cmpi sle, %14, %411 : vector<8x1xi32>
      %cst_104 = arith.constant 0.000000e+00 : f32
      %413 = vector.broadcast %cst_104 : f32 to vector<8x1xf32>
      %414 = arith.select %412, %413, %410 : vector<8x1xi1>, vector<8x1xf32>
      %c6_i32_105 = arith.constant 6 : i32
      %415 = vector.broadcast %c6_i32_105 : i32 to vector<8x1xi32>
      %416 = arith.cmpi eq, %14, %415 : vector<8x1xi32>
      %417 = vector.broadcast %414 : vector<8x1xf32> to vector<8x8xf32>
      %418 = vector.broadcast %395 : vector<1x8xf32> to vector<8x8xf32>
      %419 = arith.mulf %417, %418 : vector<8x8xf32>
      %420 = arith.subf %372, %419 : vector<8x8xf32>
      %421 = vector.shape_cast %416 : vector<8x1xi1> to vector<8x1xi1>
      %422 = vector.broadcast %421 : vector<8x1xi1> to vector<8x8xi1>
      %423 = vector.shape_cast %395 : vector<1x8xf32> to vector<1x8xf32>
      %424 = vector.broadcast %423 : vector<1x8xf32> to vector<8x8xf32>
      %425 = arith.select %422, %424, %420 : vector<8x8xi1>, vector<8x8xf32>
      %c7_i32 = arith.constant 7 : i32
      %426 = arith.addi %50, %c7_i32 : i32
      %427 = vector.extract_strided_slice %425 {offsets = [7, 0], sizes = [1, 8], strides = [1, 1]} : vector<8x8xf32> to vector<1x8xf32>
      %428 = vector.broadcast %426 : i32 to vector<1x8xi32>
      %429 = arith.cmpi eq, %12, %428 : vector<1x8xi32>
      %cst_106 = arith.constant 0.000000e+00 : f32
      %430 = vector.broadcast %cst_106 : f32 to vector<1x8xf32>
      %431 = arith.select %429, %427, %430 : vector<1x8xi1>, vector<1x8xf32>
      %cst_107 = arith.constant dense<0.000000e+00> : vector<1xf32>
      %432 = vector.multi_reduction <add>, %431, %cst_107 [1] : vector<1x8xf32> to vector<1xf32>
      %433 = vector.shape_cast %432 : vector<1xf32> to vector<1x1xf32>
      %cst_108 = arith.constant 1.000000e-30 : f32
      %434 = vector.broadcast %cst_108 : f32 to vector<1x1xf32>
      %435 = arith.maximumf %433, %434 : vector<1x1xf32>
      %436 = math.rsqrt %435 : vector<1x1xf32>
      %437 = vector.broadcast %426 : i32 to vector<1x8xi32>
      %438 = arith.cmpi slt, %12, %437 : vector<1x8xi32>
      %439 = vector.broadcast %426 : i32 to vector<1x8xi32>
      %440 = arith.cmpi eq, %12, %439 : vector<1x8xi32>
      %441 = arith.mulf %435, %436 : vector<1x1xf32>
      %442 = vector.broadcast %436 : vector<1x1xf32> to vector<1x8xf32>
      %443 = arith.mulf %427, %442 : vector<1x8xf32>
      %444 = vector.shape_cast %441 : vector<1x1xf32> to vector<1x1xf32>
      %445 = vector.broadcast %444 : vector<1x1xf32> to vector<1x8xf32>
      %446 = arith.select %440, %445, %443 : vector<1x8xi1>, vector<1x8xf32>
      %cst_109 = arith.constant 0.000000e+00 : f32
      %447 = vector.broadcast %cst_109 : f32 to vector<1x8xf32>
      %448 = arith.select %438, %447, %446 : vector<1x8xi1>, vector<1x8xf32>
      %449 = vector.broadcast %426 : i32 to vector<1x8xi32>
      %450 = arith.cmpi eq, %12, %449 : vector<1x8xi32>
      %451 = vector.shape_cast %435 : vector<1x1xf32> to vector<1x1xf32>
      %452 = vector.broadcast %451 : vector<1x1xf32> to vector<1x8xf32>
      %453 = arith.select %450, %452, %400 : vector<1x8xi1>, vector<1x8xf32>
      %454 = vector.broadcast %426 : i32 to vector<1x8xi32>
      %455 = arith.cmpi eq, %12, %454 : vector<1x8xi32>
      %cst_110 = arith.constant 0.000000e+00 : f32
      %456 = vector.shape_cast %455 : vector<1x8xi1> to vector<1x8xi1>
      %457 = vector.broadcast %456 : vector<1x8xi1> to vector<8x8xi1>
      %458 = vector.broadcast %cst_110 : f32 to vector<8x8xf32>
      %459 = arith.select %457, %425, %458 : vector<8x8xi1>, vector<8x8xf32>
      %cst_111 = arith.constant dense<0.000000e+00> : vector<8xf32>
      %460 = vector.multi_reduction <add>, %459, %cst_111 [1] : vector<8x8xf32> to vector<8xf32>
      %461 = vector.shape_cast %460 : vector<8xf32> to vector<8x1xf32>
      %462 = vector.broadcast %436 : vector<1x1xf32> to vector<8x1xf32>
      %463 = arith.mulf %461, %462 : vector<8x1xf32>
      %c7_i32_112 = arith.constant 7 : i32
      %464 = vector.broadcast %c7_i32_112 : i32 to vector<8x1xi32>
      %465 = arith.cmpi sle, %14, %464 : vector<8x1xi32>
      %cst_113 = arith.constant 0.000000e+00 : f32
      %466 = vector.broadcast %cst_113 : f32 to vector<8x1xf32>
      %467 = arith.select %465, %466, %463 : vector<8x1xi1>, vector<8x1xf32>
      %c7_i32_114 = arith.constant 7 : i32
      %468 = vector.broadcast %c7_i32_114 : i32 to vector<8x1xi32>
      %469 = arith.cmpi eq, %14, %468 : vector<8x1xi32>
      %470 = vector.broadcast %467 : vector<8x1xf32> to vector<8x8xf32>
      %471 = vector.broadcast %448 : vector<1x8xf32> to vector<8x8xf32>
      %472 = arith.mulf %470, %471 : vector<8x8xf32>
      %473 = arith.subf %425, %472 : vector<8x8xf32>
      %474 = vector.shape_cast %469 : vector<8x1xi1> to vector<8x1xi1>
      %475 = vector.broadcast %474 : vector<8x1xi1> to vector<8x8xi1>
      %476 = vector.shape_cast %448 : vector<1x8xf32> to vector<1x8xf32>
      %477 = vector.broadcast %476 : vector<1x8xf32> to vector<8x8xf32>
      %478 = arith.select %475, %477, %473 : vector<8x8xi1>, vector<8x8xf32>
      %c0_115 = arith.constant 0 : index
      %479 = arith.index_cast %50 : i32 to index
      %c0_116 = arith.constant 0 : index
      %480 = vector.load %arg7[%c0_115, %479, %c0_116] : memref<2x8x8xf32, #tpu.memory_space<vmem>>, vector<1x8x8xf32>
      %481 = vector.shape_cast %480 : vector<1x8x8xf32> to vector<8x8xf32>
      %482 = vector.shape_cast %478 : vector<8x8xf32> to vector<1x8x8xf32>
      tpu.vector_store %arg7[%c0_115, %479, %c0_116], %482 {strides = array<i32>} : memref<2x8x8xf32, #tpu.memory_space<vmem>>, vector<1x8x8xf32>,
      %483 = vector.broadcast %50 : i32 to vector<1x8xi32>
      %484 = arith.cmpi sge, %12, %483 : vector<1x8xi32>
      %c8_i32_117 = arith.constant 8 : i32
      %485 = arith.addi %50, %c8_i32_117 : i32
      %486 = vector.broadcast %485 : i32 to vector<1x8xi32>
      %487 = arith.cmpi slt, %12, %486 : vector<1x8xi32>
      %488 = arith.andi %484, %487 : vector<1x8xi1>
      %c0_118 = arith.constant 0 : index
      %c0_119 = arith.constant 0 : index
      %c0_120 = arith.constant 0 : index
      %489 = vector.load %arg9[%c0_118, %c0_119, %c0_120] : memref<2x1x8xf32, #tpu.memory_space<vmem>>, vector<1x1x8xf32>
      %490 = vector.shape_cast %489 : vector<1x1x8xf32> to vector<1x8xf32>
      %491 = arith.select %488, %453, %490 : vector<1x8xi1>, vector<1x8xf32>
      %c0_121 = arith.constant 0 : index
      %c0_122 = arith.constant 0 : index
      %c0_123 = arith.constant 0 : index
      %492 = vector.load %arg9[%c0_121, %c0_122, %c0_123] : memref<2x1x8xf32, #tpu.memory_space<vmem>>, vector<1x1x8xf32>
      %493 = vector.shape_cast %492 : vector<1x1x8xf32> to vector<1x8xf32>
      %494 = vector.shape_cast %491 : vector<1x8xf32> to vector<1x1x8xf32>
      tpu.vector_store %arg9[%c0_121, %c0_122, %c0_123], %494 {strides = array<i32>} : memref<2x1x8xf32, #tpu.memory_space<vmem>>, vector<1x1x8xf32>,
      %c8_i32_124 = arith.constant 8 : i32
      %495 = arith.addi %50, %c8_i32_124 : i32
      %c8_i32_125 = arith.constant 8 : i32
      %496 = arith.cmpi slt, %495, %c8_i32_125 : i32
      %497 = arith.extui %496 : i1 to i32
      %c0_i32_126 = arith.constant 0 : i32
      %498 = arith.cmpi ne, %497, %c0_i32_126 : i32
      scf.if %498 {
        %cst_247 = arith.constant dense<0.000000e+00> : vector<8x8xf32>
        %989 = tpu.matmul %478, %478, %cst_247 {dimension_numbers = #tpu.dot_dimension_numbers<[0], [0], [1], [1], [0, 1, 1, 1], [], []>, precision = #tpu.contract_precision<fp32>} : vector<8x8xf32>, vector<8x8xf32>, vector<8x8xf32> -> vector<8x8xf32>
        %c0_248 = arith.constant 0 : index
        %c0_249 = arith.constant 0 : index
        %c0_250 = arith.constant 0 : index
        %990 = vector.load %arg7[%c0_248, %c0_249, %c0_250] : memref<2x8x8xf32, #tpu.memory_space<vmem>>, vector<1x8x8xf32>
        %991 = vector.shape_cast %990 : vector<1x8x8xf32> to vector<8x8xf32>
        %c8_i32_251 = arith.constant 8 : i32
        %992 = arith.addi %50, %c8_i32_251 : i32
        %993 = vector.broadcast %992 : i32 to vector<8x1xi32>
        %994 = arith.cmpi sge, %13, %993 : vector<8x1xi32>
        %cst_252 = arith.constant 0.000000e+00 : f32
        %995 = vector.shape_cast %994 : vector<8x1xi1> to vector<8x1xi1>
        %996 = vector.broadcast %995 : vector<8x1xi1> to vector<8x8xi1>
        %997 = vector.broadcast %cst_252 : f32 to vector<8x8xf32>
        %998 = arith.select %996, %989, %997 : vector<8x8xi1>, vector<8x8xf32>
        %999 = arith.subf %991, %998 : vector<8x8xf32>
        %c0_253 = arith.constant 0 : index
        %c0_254 = arith.constant 0 : index
        %c0_255 = arith.constant 0 : index
        %1000 = vector.load %arg7[%c0_253, %c0_254, %c0_255] : memref<2x8x8xf32, #tpu.memory_space<vmem>>, vector<1x8x8xf32>
        %1001 = vector.shape_cast %1000 : vector<1x8x8xf32> to vector<8x8xf32>
        %1002 = vector.shape_cast %999 : vector<8x8xf32> to vector<1x8x8xf32>
        tpu.vector_store %arg7[%c0_253, %c0_254, %c0_255], %1002 {strides = array<i32>} : memref<2x8x8xf32, #tpu.memory_space<vmem>>, vector<1x8x8xf32>,
      } else {
      }
      %c1_127 = arith.constant 1 : index
      %499 = arith.index_cast %50 : i32 to index
      %c0_128 = arith.constant 0 : index
      %500 = vector.load %arg7[%c1_127, %499, %c0_128] : memref<2x8x8xf32, #tpu.memory_space<vmem>>, vector<1x8x8xf32>
      %501 = vector.shape_cast %500 : vector<1x8x8xf32> to vector<8x8xf32>
      %cst_129 = arith.constant 0.000000e+00 : f32
      %502 = vector.broadcast %cst_129 : f32 to vector<1x8xf32>
      %c0_i32_130 = arith.constant 0 : i32
      %503 = arith.addi %50, %c0_i32_130 : i32
      %504 = vector.extract_strided_slice %501 {offsets = [0, 0], sizes = [1, 8], strides = [1, 1]} : vector<8x8xf32> to vector<1x8xf32>
      %505 = vector.broadcast %503 : i32 to vector<1x8xi32>
      %506 = arith.cmpi eq, %12, %505 : vector<1x8xi32>
      %cst_131 = arith.constant 0.000000e+00 : f32
      %507 = vector.broadcast %cst_131 : f32 to vector<1x8xf32>
      %508 = arith.select %506, %504, %507 : vector<1x8xi1>, vector<1x8xf32>
      %cst_132 = arith.constant dense<0.000000e+00> : vector<1xf32>
      %509 = vector.multi_reduction <add>, %508, %cst_132 [1] : vector<1x8xf32> to vector<1xf32>
      %510 = vector.shape_cast %509 : vector<1xf32> to vector<1x1xf32>
      %cst_133 = arith.constant 1.000000e-30 : f32
      %511 = vector.broadcast %cst_133 : f32 to vector<1x1xf32>
      %512 = arith.maximumf %510, %511 : vector<1x1xf32>
      %513 = math.rsqrt %512 : vector<1x1xf32>
      %514 = vector.broadcast %503 : i32 to vector<1x8xi32>
      %515 = arith.cmpi slt, %12, %514 : vector<1x8xi32>
      %516 = vector.broadcast %503 : i32 to vector<1x8xi32>
      %517 = arith.cmpi eq, %12, %516 : vector<1x8xi32>
      %518 = arith.mulf %512, %513 : vector<1x1xf32>
      %519 = vector.broadcast %513 : vector<1x1xf32> to vector<1x8xf32>
      %520 = arith.mulf %504, %519 : vector<1x8xf32>
      %521 = vector.shape_cast %518 : vector<1x1xf32> to vector<1x1xf32>
      %522 = vector.broadcast %521 : vector<1x1xf32> to vector<1x8xf32>
      %523 = arith.select %517, %522, %520 : vector<1x8xi1>, vector<1x8xf32>
      %cst_134 = arith.constant 0.000000e+00 : f32
      %524 = vector.broadcast %cst_134 : f32 to vector<1x8xf32>
      %525 = arith.select %515, %524, %523 : vector<1x8xi1>, vector<1x8xf32>
      %526 = vector.broadcast %503 : i32 to vector<1x8xi32>
      %527 = arith.cmpi eq, %12, %526 : vector<1x8xi32>
      %528 = vector.shape_cast %512 : vector<1x1xf32> to vector<1x1xf32>
      %529 = vector.broadcast %528 : vector<1x1xf32> to vector<1x8xf32>
      %530 = arith.select %527, %529, %502 : vector<1x8xi1>, vector<1x8xf32>
      %531 = vector.broadcast %503 : i32 to vector<1x8xi32>
      %532 = arith.cmpi eq, %12, %531 : vector<1x8xi32>
      %cst_135 = arith.constant 0.000000e+00 : f32
      %533 = vector.shape_cast %532 : vector<1x8xi1> to vector<1x8xi1>
      %534 = vector.broadcast %533 : vector<1x8xi1> to vector<8x8xi1>
      %535 = vector.broadcast %cst_135 : f32 to vector<8x8xf32>
      %536 = arith.select %534, %501, %535 : vector<8x8xi1>, vector<8x8xf32>
      %cst_136 = arith.constant dense<0.000000e+00> : vector<8xf32>
      %537 = vector.multi_reduction <add>, %536, %cst_136 [1] : vector<8x8xf32> to vector<8xf32>
      %538 = vector.shape_cast %537 : vector<8xf32> to vector<8x1xf32>
      %539 = vector.broadcast %513 : vector<1x1xf32> to vector<8x1xf32>
      %540 = arith.mulf %538, %539 : vector<8x1xf32>
      %c0_i32_137 = arith.constant 0 : i32
      %541 = vector.broadcast %c0_i32_137 : i32 to vector<8x1xi32>
      %542 = arith.cmpi sle, %14, %541 : vector<8x1xi32>
      %cst_138 = arith.constant 0.000000e+00 : f32
      %543 = vector.broadcast %cst_138 : f32 to vector<8x1xf32>
      %544 = arith.select %542, %543, %540 : vector<8x1xi1>, vector<8x1xf32>
      %c0_i32_139 = arith.constant 0 : i32
      %545 = vector.broadcast %c0_i32_139 : i32 to vector<8x1xi32>
      %546 = arith.cmpi eq, %14, %545 : vector<8x1xi32>
      %547 = vector.broadcast %544 : vector<8x1xf32> to vector<8x8xf32>
      %548 = vector.broadcast %525 : vector<1x8xf32> to vector<8x8xf32>
      %549 = arith.mulf %547, %548 : vector<8x8xf32>
      %550 = arith.subf %501, %549 : vector<8x8xf32>
      %551 = vector.shape_cast %546 : vector<8x1xi1> to vector<8x1xi1>
      %552 = vector.broadcast %551 : vector<8x1xi1> to vector<8x8xi1>
      %553 = vector.shape_cast %525 : vector<1x8xf32> to vector<1x8xf32>
      %554 = vector.broadcast %553 : vector<1x8xf32> to vector<8x8xf32>
      %555 = arith.select %552, %554, %550 : vector<8x8xi1>, vector<8x8xf32>
      %c1_i32_140 = arith.constant 1 : i32
      %556 = arith.addi %50, %c1_i32_140 : i32
      %557 = vector.extract_strided_slice %555 {offsets = [1, 0], sizes = [1, 8], strides = [1, 1]} : vector<8x8xf32> to vector<1x8xf32>
      %558 = vector.broadcast %556 : i32 to vector<1x8xi32>
      %559 = arith.cmpi eq, %12, %558 : vector<1x8xi32>
      %cst_141 = arith.constant 0.000000e+00 : f32
      %560 = vector.broadcast %cst_141 : f32 to vector<1x8xf32>
      %561 = arith.select %559, %557, %560 : vector<1x8xi1>, vector<1x8xf32>
      %cst_142 = arith.constant dense<0.000000e+00> : vector<1xf32>
      %562 = vector.multi_reduction <add>, %561, %cst_142 [1] : vector<1x8xf32> to vector<1xf32>
      %563 = vector.shape_cast %562 : vector<1xf32> to vector<1x1xf32>
      %cst_143 = arith.constant 1.000000e-30 : f32
      %564 = vector.broadcast %cst_143 : f32 to vector<1x1xf32>
      %565 = arith.maximumf %563, %564 : vector<1x1xf32>
      %566 = math.rsqrt %565 : vector<1x1xf32>
      %567 = vector.broadcast %556 : i32 to vector<1x8xi32>
      %568 = arith.cmpi slt, %12, %567 : vector<1x8xi32>
      %569 = vector.broadcast %556 : i32 to vector<1x8xi32>
      %570 = arith.cmpi eq, %12, %569 : vector<1x8xi32>
      %571 = arith.mulf %565, %566 : vector<1x1xf32>
      %572 = vector.broadcast %566 : vector<1x1xf32> to vector<1x8xf32>
      %573 = arith.mulf %557, %572 : vector<1x8xf32>
      %574 = vector.shape_cast %571 : vector<1x1xf32> to vector<1x1xf32>
      %575 = vector.broadcast %574 : vector<1x1xf32> to vector<1x8xf32>
      %576 = arith.select %570, %575, %573 : vector<1x8xi1>, vector<1x8xf32>
      %cst_144 = arith.constant 0.000000e+00 : f32
      %577 = vector.broadcast %cst_144 : f32 to vector<1x8xf32>
      %578 = arith.select %568, %577, %576 : vector<1x8xi1>, vector<1x8xf32>
      %579 = vector.broadcast %556 : i32 to vector<1x8xi32>
      %580 = arith.cmpi eq, %12, %579 : vector<1x8xi32>
      %581 = vector.shape_cast %565 : vector<1x1xf32> to vector<1x1xf32>
      %582 = vector.broadcast %581 : vector<1x1xf32> to vector<1x8xf32>
      %583 = arith.select %580, %582, %530 : vector<1x8xi1>, vector<1x8xf32>
      %584 = vector.broadcast %556 : i32 to vector<1x8xi32>
      %585 = arith.cmpi eq, %12, %584 : vector<1x8xi32>
      %cst_145 = arith.constant 0.000000e+00 : f32
      %586 = vector.shape_cast %585 : vector<1x8xi1> to vector<1x8xi1>
      %587 = vector.broadcast %586 : vector<1x8xi1> to vector<8x8xi1>
      %588 = vector.broadcast %cst_145 : f32 to vector<8x8xf32>
      %589 = arith.select %587, %555, %588 : vector<8x8xi1>, vector<8x8xf32>
      %cst_146 = arith.constant dense<0.000000e+00> : vector<8xf32>
      %590 = vector.multi_reduction <add>, %589, %cst_146 [1] : vector<8x8xf32> to vector<8xf32>
      %591 = vector.shape_cast %590 : vector<8xf32> to vector<8x1xf32>
      %592 = vector.broadcast %566 : vector<1x1xf32> to vector<8x1xf32>
      %593 = arith.mulf %591, %592 : vector<8x1xf32>
      %c1_i32_147 = arith.constant 1 : i32
      %594 = vector.broadcast %c1_i32_147 : i32 to vector<8x1xi32>
      %595 = arith.cmpi sle, %14, %594 : vector<8x1xi32>
      %cst_148 = arith.constant 0.000000e+00 : f32
      %596 = vector.broadcast %cst_148 : f32 to vector<8x1xf32>
      %597 = arith.select %595, %596, %593 : vector<8x1xi1>, vector<8x1xf32>
      %c1_i32_149 = arith.constant 1 : i32
      %598 = vector.broadcast %c1_i32_149 : i32 to vector<8x1xi32>
      %599 = arith.cmpi eq, %14, %598 : vector<8x1xi32>
      %600 = vector.broadcast %597 : vector<8x1xf32> to vector<8x8xf32>
      %601 = vector.broadcast %578 : vector<1x8xf32> to vector<8x8xf32>
      %602 = arith.mulf %600, %601 : vector<8x8xf32>
      %603 = arith.subf %555, %602 : vector<8x8xf32>
      %604 = vector.shape_cast %599 : vector<8x1xi1> to vector<8x1xi1>
      %605 = vector.broadcast %604 : vector<8x1xi1> to vector<8x8xi1>
      %606 = vector.shape_cast %578 : vector<1x8xf32> to vector<1x8xf32>
      %607 = vector.broadcast %606 : vector<1x8xf32> to vector<8x8xf32>
      %608 = arith.select %605, %607, %603 : vector<8x8xi1>, vector<8x8xf32>
      %c2_i32_150 = arith.constant 2 : i32
      %609 = arith.addi %50, %c2_i32_150 : i32
      %610 = vector.extract_strided_slice %608 {offsets = [2, 0], sizes = [1, 8], strides = [1, 1]} : vector<8x8xf32> to vector<1x8xf32>
      %611 = vector.broadcast %609 : i32 to vector<1x8xi32>
      %612 = arith.cmpi eq, %12, %611 : vector<1x8xi32>
      %cst_151 = arith.constant 0.000000e+00 : f32
      %613 = vector.broadcast %cst_151 : f32 to vector<1x8xf32>
      %614 = arith.select %612, %610, %613 : vector<1x8xi1>, vector<1x8xf32>
      %cst_152 = arith.constant dense<0.000000e+00> : vector<1xf32>
      %615 = vector.multi_reduction <add>, %614, %cst_152 [1] : vector<1x8xf32> to vector<1xf32>
      %616 = vector.shape_cast %615 : vector<1xf32> to vector<1x1xf32>
      %cst_153 = arith.constant 1.000000e-30 : f32
      %617 = vector.broadcast %cst_153 : f32 to vector<1x1xf32>
      %618 = arith.maximumf %616, %617 : vector<1x1xf32>
      %619 = math.rsqrt %618 : vector<1x1xf32>
      %620 = vector.broadcast %609 : i32 to vector<1x8xi32>
      %621 = arith.cmpi slt, %12, %620 : vector<1x8xi32>
      %622 = vector.broadcast %609 : i32 to vector<1x8xi32>
      %623 = arith.cmpi eq, %12, %622 : vector<1x8xi32>
      %624 = arith.mulf %618, %619 : vector<1x1xf32>
      %625 = vector.broadcast %619 : vector<1x1xf32> to vector<1x8xf32>
      %626 = arith.mulf %610, %625 : vector<1x8xf32>
      %627 = vector.shape_cast %624 : vector<1x1xf32> to vector<1x1xf32>
      %628 = vector.broadcast %627 : vector<1x1xf32> to vector<1x8xf32>
      %629 = arith.select %623, %628, %626 : vector<1x8xi1>, vector<1x8xf32>
      %cst_154 = arith.constant 0.000000e+00 : f32
      %630 = vector.broadcast %cst_154 : f32 to vector<1x8xf32>
      %631 = arith.select %621, %630, %629 : vector<1x8xi1>, vector<1x8xf32>
      %632 = vector.broadcast %609 : i32 to vector<1x8xi32>
      %633 = arith.cmpi eq, %12, %632 : vector<1x8xi32>
      %634 = vector.shape_cast %618 : vector<1x1xf32> to vector<1x1xf32>
      %635 = vector.broadcast %634 : vector<1x1xf32> to vector<1x8xf32>
      %636 = arith.select %633, %635, %583 : vector<1x8xi1>, vector<1x8xf32>
      %637 = vector.broadcast %609 : i32 to vector<1x8xi32>
      %638 = arith.cmpi eq, %12, %637 : vector<1x8xi32>
      %cst_155 = arith.constant 0.000000e+00 : f32
      %639 = vector.shape_cast %638 : vector<1x8xi1> to vector<1x8xi1>
      %640 = vector.broadcast %639 : vector<1x8xi1> to vector<8x8xi1>
      %641 = vector.broadcast %cst_155 : f32 to vector<8x8xf32>
      %642 = arith.select %640, %608, %641 : vector<8x8xi1>, vector<8x8xf32>
      %cst_156 = arith.constant dense<0.000000e+00> : vector<8xf32>
      %643 = vector.multi_reduction <add>, %642, %cst_156 [1] : vector<8x8xf32> to vector<8xf32>
      %644 = vector.shape_cast %643 : vector<8xf32> to vector<8x1xf32>
      %645 = vector.broadcast %619 : vector<1x1xf32> to vector<8x1xf32>
      %646 = arith.mulf %644, %645 : vector<8x1xf32>
      %c2_i32_157 = arith.constant 2 : i32
      %647 = vector.broadcast %c2_i32_157 : i32 to vector<8x1xi32>
      %648 = arith.cmpi sle, %14, %647 : vector<8x1xi32>
      %cst_158 = arith.constant 0.000000e+00 : f32
      %649 = vector.broadcast %cst_158 : f32 to vector<8x1xf32>
      %650 = arith.select %648, %649, %646 : vector<8x1xi1>, vector<8x1xf32>
      %c2_i32_159 = arith.constant 2 : i32
      %651 = vector.broadcast %c2_i32_159 : i32 to vector<8x1xi32>
      %652 = arith.cmpi eq, %14, %651 : vector<8x1xi32>
      %653 = vector.broadcast %650 : vector<8x1xf32> to vector<8x8xf32>
      %654 = vector.broadcast %631 : vector<1x8xf32> to vector<8x8xf32>
      %655 = arith.mulf %653, %654 : vector<8x8xf32>
      %656 = arith.subf %608, %655 : vector<8x8xf32>
      %657 = vector.shape_cast %652 : vector<8x1xi1> to vector<8x1xi1>
      %658 = vector.broadcast %657 : vector<8x1xi1> to vector<8x8xi1>
      %659 = vector.shape_cast %631 : vector<1x8xf32> to vector<1x8xf32>
      %660 = vector.broadcast %659 : vector<1x8xf32> to vector<8x8xf32>
      %661 = arith.select %658, %660, %656 : vector<8x8xi1>, vector<8x8xf32>
      %c3_i32_160 = arith.constant 3 : i32
      %662 = arith.addi %50, %c3_i32_160 : i32
      %663 = vector.extract_strided_slice %661 {offsets = [3, 0], sizes = [1, 8], strides = [1, 1]} : vector<8x8xf32> to vector<1x8xf32>
      %664 = vector.broadcast %662 : i32 to vector<1x8xi32>
      %665 = arith.cmpi eq, %12, %664 : vector<1x8xi32>
      %cst_161 = arith.constant 0.000000e+00 : f32
      %666 = vector.broadcast %cst_161 : f32 to vector<1x8xf32>
      %667 = arith.select %665, %663, %666 : vector<1x8xi1>, vector<1x8xf32>
      %cst_162 = arith.constant dense<0.000000e+00> : vector<1xf32>
      %668 = vector.multi_reduction <add>, %667, %cst_162 [1] : vector<1x8xf32> to vector<1xf32>
      %669 = vector.shape_cast %668 : vector<1xf32> to vector<1x1xf32>
      %cst_163 = arith.constant 1.000000e-30 : f32
      %670 = vector.broadcast %cst_163 : f32 to vector<1x1xf32>
      %671 = arith.maximumf %669, %670 : vector<1x1xf32>
      %672 = math.rsqrt %671 : vector<1x1xf32>
      %673 = vector.broadcast %662 : i32 to vector<1x8xi32>
      %674 = arith.cmpi slt, %12, %673 : vector<1x8xi32>
      %675 = vector.broadcast %662 : i32 to vector<1x8xi32>
      %676 = arith.cmpi eq, %12, %675 : vector<1x8xi32>
      %677 = arith.mulf %671, %672 : vector<1x1xf32>
      %678 = vector.broadcast %672 : vector<1x1xf32> to vector<1x8xf32>
      %679 = arith.mulf %663, %678 : vector<1x8xf32>
      %680 = vector.shape_cast %677 : vector<1x1xf32> to vector<1x1xf32>
      %681 = vector.broadcast %680 : vector<1x1xf32> to vector<1x8xf32>
      %682 = arith.select %676, %681, %679 : vector<1x8xi1>, vector<1x8xf32>
      %cst_164 = arith.constant 0.000000e+00 : f32
      %683 = vector.broadcast %cst_164 : f32 to vector<1x8xf32>
      %684 = arith.select %674, %683, %682 : vector<1x8xi1>, vector<1x8xf32>
      %685 = vector.broadcast %662 : i32 to vector<1x8xi32>
      %686 = arith.cmpi eq, %12, %685 : vector<1x8xi32>
      %687 = vector.shape_cast %671 : vector<1x1xf32> to vector<1x1xf32>
      %688 = vector.broadcast %687 : vector<1x1xf32> to vector<1x8xf32>
      %689 = arith.select %686, %688, %636 : vector<1x8xi1>, vector<1x8xf32>
      %690 = vector.broadcast %662 : i32 to vector<1x8xi32>
      %691 = arith.cmpi eq, %12, %690 : vector<1x8xi32>
      %cst_165 = arith.constant 0.000000e+00 : f32
      %692 = vector.shape_cast %691 : vector<1x8xi1> to vector<1x8xi1>
      %693 = vector.broadcast %692 : vector<1x8xi1> to vector<8x8xi1>
      %694 = vector.broadcast %cst_165 : f32 to vector<8x8xf32>
      %695 = arith.select %693, %661, %694 : vector<8x8xi1>, vector<8x8xf32>
      %cst_166 = arith.constant dense<0.000000e+00> : vector<8xf32>
      %696 = vector.multi_reduction <add>, %695, %cst_166 [1] : vector<8x8xf32> to vector<8xf32>
      %697 = vector.shape_cast %696 : vector<8xf32> to vector<8x1xf32>
      %698 = vector.broadcast %672 : vector<1x1xf32> to vector<8x1xf32>
      %699 = arith.mulf %697, %698 : vector<8x1xf32>
      %c3_i32_167 = arith.constant 3 : i32
      %700 = vector.broadcast %c3_i32_167 : i32 to vector<8x1xi32>
      %701 = arith.cmpi sle, %14, %700 : vector<8x1xi32>
      %cst_168 = arith.constant 0.000000e+00 : f32
      %702 = vector.broadcast %cst_168 : f32 to vector<8x1xf32>
      %703 = arith.select %701, %702, %699 : vector<8x1xi1>, vector<8x1xf32>
      %c3_i32_169 = arith.constant 3 : i32
      %704 = vector.broadcast %c3_i32_169 : i32 to vector<8x1xi32>
      %705 = arith.cmpi eq, %14, %704 : vector<8x1xi32>
      %706 = vector.broadcast %703 : vector<8x1xf32> to vector<8x8xf32>
      %707 = vector.broadcast %684 : vector<1x8xf32> to vector<8x8xf32>
      %708 = arith.mulf %706, %707 : vector<8x8xf32>
      %709 = arith.subf %661, %708 : vector<8x8xf32>
      %710 = vector.shape_cast %705 : vector<8x1xi1> to vector<8x1xi1>
      %711 = vector.broadcast %710 : vector<8x1xi1> to vector<8x8xi1>
      %712 = vector.shape_cast %684 : vector<1x8xf32> to vector<1x8xf32>
      %713 = vector.broadcast %712 : vector<1x8xf32> to vector<8x8xf32>
      %714 = arith.select %711, %713, %709 : vector<8x8xi1>, vector<8x8xf32>
      %c4_i32_170 = arith.constant 4 : i32
      %715 = arith.addi %50, %c4_i32_170 : i32
      %716 = vector.extract_strided_slice %714 {offsets = [4, 0], sizes = [1, 8], strides = [1, 1]} : vector<8x8xf32> to vector<1x8xf32>
      %717 = vector.broadcast %715 : i32 to vector<1x8xi32>
      %718 = arith.cmpi eq, %12, %717 : vector<1x8xi32>
      %cst_171 = arith.constant 0.000000e+00 : f32
      %719 = vector.broadcast %cst_171 : f32 to vector<1x8xf32>
      %720 = arith.select %718, %716, %719 : vector<1x8xi1>, vector<1x8xf32>
      %cst_172 = arith.constant dense<0.000000e+00> : vector<1xf32>
      %721 = vector.multi_reduction <add>, %720, %cst_172 [1] : vector<1x8xf32> to vector<1xf32>
      %722 = vector.shape_cast %721 : vector<1xf32> to vector<1x1xf32>
      %cst_173 = arith.constant 1.000000e-30 : f32
      %723 = vector.broadcast %cst_173 : f32 to vector<1x1xf32>
      %724 = arith.maximumf %722, %723 : vector<1x1xf32>
      %725 = math.rsqrt %724 : vector<1x1xf32>
      %726 = vector.broadcast %715 : i32 to vector<1x8xi32>
      %727 = arith.cmpi slt, %12, %726 : vector<1x8xi32>
      %728 = vector.broadcast %715 : i32 to vector<1x8xi32>
      %729 = arith.cmpi eq, %12, %728 : vector<1x8xi32>
      %730 = arith.mulf %724, %725 : vector<1x1xf32>
      %731 = vector.broadcast %725 : vector<1x1xf32> to vector<1x8xf32>
      %732 = arith.mulf %716, %731 : vector<1x8xf32>
      %733 = vector.shape_cast %730 : vector<1x1xf32> to vector<1x1xf32>
      %734 = vector.broadcast %733 : vector<1x1xf32> to vector<1x8xf32>
      %735 = arith.select %729, %734, %732 : vector<1x8xi1>, vector<1x8xf32>
      %cst_174 = arith.constant 0.000000e+00 : f32
      %736 = vector.broadcast %cst_174 : f32 to vector<1x8xf32>
      %737 = arith.select %727, %736, %735 : vector<1x8xi1>, vector<1x8xf32>
      %738 = vector.broadcast %715 : i32 to vector<1x8xi32>
      %739 = arith.cmpi eq, %12, %738 : vector<1x8xi32>
      %740 = vector.shape_cast %724 : vector<1x1xf32> to vector<1x1xf32>
      %741 = vector.broadcast %740 : vector<1x1xf32> to vector<1x8xf32>
      %742 = arith.select %739, %741, %689 : vector<1x8xi1>, vector<1x8xf32>
      %743 = vector.broadcast %715 : i32 to vector<1x8xi32>
      %744 = arith.cmpi eq, %12, %743 : vector<1x8xi32>
      %cst_175 = arith.constant 0.000000e+00 : f32
      %745 = vector.shape_cast %744 : vector<1x8xi1> to vector<1x8xi1>
      %746 = vector.broadcast %745 : vector<1x8xi1> to vector<8x8xi1>
      %747 = vector.broadcast %cst_175 : f32 to vector<8x8xf32>
      %748 = arith.select %746, %714, %747 : vector<8x8xi1>, vector<8x8xf32>
      %cst_176 = arith.constant dense<0.000000e+00> : vector<8xf32>
      %749 = vector.multi_reduction <add>, %748, %cst_176 [1] : vector<8x8xf32> to vector<8xf32>
      %750 = vector.shape_cast %749 : vector<8xf32> to vector<8x1xf32>
      %751 = vector.broadcast %725 : vector<1x1xf32> to vector<8x1xf32>
      %752 = arith.mulf %750, %751 : vector<8x1xf32>
      %c4_i32_177 = arith.constant 4 : i32
      %753 = vector.broadcast %c4_i32_177 : i32 to vector<8x1xi32>
      %754 = arith.cmpi sle, %14, %753 : vector<8x1xi32>
      %cst_178 = arith.constant 0.000000e+00 : f32
      %755 = vector.broadcast %cst_178 : f32 to vector<8x1xf32>
      %756 = arith.select %754, %755, %752 : vector<8x1xi1>, vector<8x1xf32>
      %c4_i32_179 = arith.constant 4 : i32
      %757 = vector.broadcast %c4_i32_179 : i32 to vector<8x1xi32>
      %758 = arith.cmpi eq, %14, %757 : vector<8x1xi32>
      %759 = vector.broadcast %756 : vector<8x1xf32> to vector<8x8xf32>
      %760 = vector.broadcast %737 : vector<1x8xf32> to vector<8x8xf32>
      %761 = arith.mulf %759, %760 : vector<8x8xf32>
      %762 = arith.subf %714, %761 : vector<8x8xf32>
      %763 = vector.shape_cast %758 : vector<8x1xi1> to vector<8x1xi1>
      %764 = vector.broadcast %763 : vector<8x1xi1> to vector<8x8xi1>
      %765 = vector.shape_cast %737 : vector<1x8xf32> to vector<1x8xf32>
      %766 = vector.broadcast %765 : vector<1x8xf32> to vector<8x8xf32>
      %767 = arith.select %764, %766, %762 : vector<8x8xi1>, vector<8x8xf32>
      %c5_i32_180 = arith.constant 5 : i32
      %768 = arith.addi %50, %c5_i32_180 : i32
      %769 = vector.extract_strided_slice %767 {offsets = [5, 0], sizes = [1, 8], strides = [1, 1]} : vector<8x8xf32> to vector<1x8xf32>
      %770 = vector.broadcast %768 : i32 to vector<1x8xi32>
      %771 = arith.cmpi eq, %12, %770 : vector<1x8xi32>
      %cst_181 = arith.constant 0.000000e+00 : f32
      %772 = vector.broadcast %cst_181 : f32 to vector<1x8xf32>
      %773 = arith.select %771, %769, %772 : vector<1x8xi1>, vector<1x8xf32>
      %cst_182 = arith.constant dense<0.000000e+00> : vector<1xf32>
      %774 = vector.multi_reduction <add>, %773, %cst_182 [1] : vector<1x8xf32> to vector<1xf32>
      %775 = vector.shape_cast %774 : vector<1xf32> to vector<1x1xf32>
      %cst_183 = arith.constant 1.000000e-30 : f32
      %776 = vector.broadcast %cst_183 : f32 to vector<1x1xf32>
      %777 = arith.maximumf %775, %776 : vector<1x1xf32>
      %778 = math.rsqrt %777 : vector<1x1xf32>
      %779 = vector.broadcast %768 : i32 to vector<1x8xi32>
      %780 = arith.cmpi slt, %12, %779 : vector<1x8xi32>
      %781 = vector.broadcast %768 : i32 to vector<1x8xi32>
      %782 = arith.cmpi eq, %12, %781 : vector<1x8xi32>
      %783 = arith.mulf %777, %778 : vector<1x1xf32>
      %784 = vector.broadcast %778 : vector<1x1xf32> to vector<1x8xf32>
      %785 = arith.mulf %769, %784 : vector<1x8xf32>
      %786 = vector.shape_cast %783 : vector<1x1xf32> to vector<1x1xf32>
      %787 = vector.broadcast %786 : vector<1x1xf32> to vector<1x8xf32>
      %788 = arith.select %782, %787, %785 : vector<1x8xi1>, vector<1x8xf32>
      %cst_184 = arith.constant 0.000000e+00 : f32
      %789 = vector.broadcast %cst_184 : f32 to vector<1x8xf32>
      %790 = arith.select %780, %789, %788 : vector<1x8xi1>, vector<1x8xf32>
      %791 = vector.broadcast %768 : i32 to vector<1x8xi32>
      %792 = arith.cmpi eq, %12, %791 : vector<1x8xi32>
      %793 = vector.shape_cast %777 : vector<1x1xf32> to vector<1x1xf32>
      %794 = vector.broadcast %793 : vector<1x1xf32> to vector<1x8xf32>
      %795 = arith.select %792, %794, %742 : vector<1x8xi1>, vector<1x8xf32>
      %796 = vector.broadcast %768 : i32 to vector<1x8xi32>
      %797 = arith.cmpi eq, %12, %796 : vector<1x8xi32>
      %cst_185 = arith.constant 0.000000e+00 : f32
      %798 = vector.shape_cast %797 : vector<1x8xi1> to vector<1x8xi1>
      %799 = vector.broadcast %798 : vector<1x8xi1> to vector<8x8xi1>
      %800 = vector.broadcast %cst_185 : f32 to vector<8x8xf32>
      %801 = arith.select %799, %767, %800 : vector<8x8xi1>, vector<8x8xf32>
      %cst_186 = arith.constant dense<0.000000e+00> : vector<8xf32>
      %802 = vector.multi_reduction <add>, %801, %cst_186 [1] : vector<8x8xf32> to vector<8xf32>
      %803 = vector.shape_cast %802 : vector<8xf32> to vector<8x1xf32>
      %804 = vector.broadcast %778 : vector<1x1xf32> to vector<8x1xf32>
      %805 = arith.mulf %803, %804 : vector<8x1xf32>
      %c5_i32_187 = arith.constant 5 : i32
      %806 = vector.broadcast %c5_i32_187 : i32 to vector<8x1xi32>
      %807 = arith.cmpi sle, %14, %806 : vector<8x1xi32>
      %cst_188 = arith.constant 0.000000e+00 : f32
      %808 = vector.broadcast %cst_188 : f32 to vector<8x1xf32>
      %809 = arith.select %807, %808, %805 : vector<8x1xi1>, vector<8x1xf32>
      %c5_i32_189 = arith.constant 5 : i32
      %810 = vector.broadcast %c5_i32_189 : i32 to vector<8x1xi32>
      %811 = arith.cmpi eq, %14, %810 : vector<8x1xi32>
      %812 = vector.broadcast %809 : vector<8x1xf32> to vector<8x8xf32>
      %813 = vector.broadcast %790 : vector<1x8xf32> to vector<8x8xf32>
      %814 = arith.mulf %812, %813 : vector<8x8xf32>
      %815 = arith.subf %767, %814 : vector<8x8xf32>
      %816 = vector.shape_cast %811 : vector<8x1xi1> to vector<8x1xi1>
      %817 = vector.broadcast %816 : vector<8x1xi1> to vector<8x8xi1>
      %818 = vector.shape_cast %790 : vector<1x8xf32> to vector<1x8xf32>
      %819 = vector.broadcast %818 : vector<1x8xf32> to vector<8x8xf32>
      %820 = arith.select %817, %819, %815 : vector<8x8xi1>, vector<8x8xf32>
      %c6_i32_190 = arith.constant 6 : i32
      %821 = arith.addi %50, %c6_i32_190 : i32
      %822 = vector.extract_strided_slice %820 {offsets = [6, 0], sizes = [1, 8], strides = [1, 1]} : vector<8x8xf32> to vector<1x8xf32>
      %823 = vector.broadcast %821 : i32 to vector<1x8xi32>
      %824 = arith.cmpi eq, %12, %823 : vector<1x8xi32>
      %cst_191 = arith.constant 0.000000e+00 : f32
      %825 = vector.broadcast %cst_191 : f32 to vector<1x8xf32>
      %826 = arith.select %824, %822, %825 : vector<1x8xi1>, vector<1x8xf32>
      %cst_192 = arith.constant dense<0.000000e+00> : vector<1xf32>
      %827 = vector.multi_reduction <add>, %826, %cst_192 [1] : vector<1x8xf32> to vector<1xf32>
      %828 = vector.shape_cast %827 : vector<1xf32> to vector<1x1xf32>
      %cst_193 = arith.constant 1.000000e-30 : f32
      %829 = vector.broadcast %cst_193 : f32 to vector<1x1xf32>
      %830 = arith.maximumf %828, %829 : vector<1x1xf32>
      %831 = math.rsqrt %830 : vector<1x1xf32>
      %832 = vector.broadcast %821 : i32 to vector<1x8xi32>
      %833 = arith.cmpi slt, %12, %832 : vector<1x8xi32>
      %834 = vector.broadcast %821 : i32 to vector<1x8xi32>
      %835 = arith.cmpi eq, %12, %834 : vector<1x8xi32>
      %836 = arith.mulf %830, %831 : vector<1x1xf32>
      %837 = vector.broadcast %831 : vector<1x1xf32> to vector<1x8xf32>
      %838 = arith.mulf %822, %837 : vector<1x8xf32>
      %839 = vector.shape_cast %836 : vector<1x1xf32> to vector<1x1xf32>
      %840 = vector.broadcast %839 : vector<1x1xf32> to vector<1x8xf32>
      %841 = arith.select %835, %840, %838 : vector<1x8xi1>, vector<1x8xf32>
      %cst_194 = arith.constant 0.000000e+00 : f32
      %842 = vector.broadcast %cst_194 : f32 to vector<1x8xf32>
      %843 = arith.select %833, %842, %841 : vector<1x8xi1>, vector<1x8xf32>
      %844 = vector.broadcast %821 : i32 to vector<1x8xi32>
      %845 = arith.cmpi eq, %12, %844 : vector<1x8xi32>
      %846 = vector.shape_cast %830 : vector<1x1xf32> to vector<1x1xf32>
      %847 = vector.broadcast %846 : vector<1x1xf32> to vector<1x8xf32>
      %848 = arith.select %845, %847, %795 : vector<1x8xi1>, vector<1x8xf32>
      %849 = vector.broadcast %821 : i32 to vector<1x8xi32>
      %850 = arith.cmpi eq, %12, %849 : vector<1x8xi32>
      %cst_195 = arith.constant 0.000000e+00 : f32
      %851 = vector.shape_cast %850 : vector<1x8xi1> to vector<1x8xi1>
      %852 = vector.broadcast %851 : vector<1x8xi1> to vector<8x8xi1>
      %853 = vector.broadcast %cst_195 : f32 to vector<8x8xf32>
      %854 = arith.select %852, %820, %853 : vector<8x8xi1>, vector<8x8xf32>
      %cst_196 = arith.constant dense<0.000000e+00> : vector<8xf32>
      %855 = vector.multi_reduction <add>, %854, %cst_196 [1] : vector<8x8xf32> to vector<8xf32>
      %856 = vector.shape_cast %855 : vector<8xf32> to vector<8x1xf32>
      %857 = vector.broadcast %831 : vector<1x1xf32> to vector<8x1xf32>
      %858 = arith.mulf %856, %857 : vector<8x1xf32>
      %c6_i32_197 = arith.constant 6 : i32
      %859 = vector.broadcast %c6_i32_197 : i32 to vector<8x1xi32>
      %860 = arith.cmpi sle, %14, %859 : vector<8x1xi32>
      %cst_198 = arith.constant 0.000000e+00 : f32
      %861 = vector.broadcast %cst_198 : f32 to vector<8x1xf32>
      %862 = arith.select %860, %861, %858 : vector<8x1xi1>, vector<8x1xf32>
      %c6_i32_199 = arith.constant 6 : i32
      %863 = vector.broadcast %c6_i32_199 : i32 to vector<8x1xi32>
      %864 = arith.cmpi eq, %14, %863 : vector<8x1xi32>
      %865 = vector.broadcast %862 : vector<8x1xf32> to vector<8x8xf32>
      %866 = vector.broadcast %843 : vector<1x8xf32> to vector<8x8xf32>
      %867 = arith.mulf %865, %866 : vector<8x8xf32>
      %868 = arith.subf %820, %867 : vector<8x8xf32>
      %869 = vector.shape_cast %864 : vector<8x1xi1> to vector<8x1xi1>
      %870 = vector.broadcast %869 : vector<8x1xi1> to vector<8x8xi1>
      %871 = vector.shape_cast %843 : vector<1x8xf32> to vector<1x8xf32>
      %872 = vector.broadcast %871 : vector<1x8xf32> to vector<8x8xf32>
      %873 = arith.select %870, %872, %868 : vector<8x8xi1>, vector<8x8xf32>
      %c7_i32_200 = arith.constant 7 : i32
      %874 = arith.addi %50, %c7_i32_200 : i32
      %875 = vector.extract_strided_slice %873 {offsets = [7, 0], sizes = [1, 8], strides = [1, 1]} : vector<8x8xf32> to vector<1x8xf32>
      %876 = vector.broadcast %874 : i32 to vector<1x8xi32>
      %877 = arith.cmpi eq, %12, %876 : vector<1x8xi32>
      %cst_201 = arith.constant 0.000000e+00 : f32
      %878 = vector.broadcast %cst_201 : f32 to vector<1x8xf32>
      %879 = arith.select %877, %875, %878 : vector<1x8xi1>, vector<1x8xf32>
      %cst_202 = arith.constant dense<0.000000e+00> : vector<1xf32>
      %880 = vector.multi_reduction <add>, %879, %cst_202 [1] : vector<1x8xf32> to vector<1xf32>
      %881 = vector.shape_cast %880 : vector<1xf32> to vector<1x1xf32>
      %cst_203 = arith.constant 1.000000e-30 : f32
      %882 = vector.broadcast %cst_203 : f32 to vector<1x1xf32>
      %883 = arith.maximumf %881, %882 : vector<1x1xf32>
      %884 = math.rsqrt %883 : vector<1x1xf32>
      %885 = vector.broadcast %874 : i32 to vector<1x8xi32>
      %886 = arith.cmpi slt, %12, %885 : vector<1x8xi32>
      %887 = vector.broadcast %874 : i32 to vector<1x8xi32>
      %888 = arith.cmpi eq, %12, %887 : vector<1x8xi32>
      %889 = arith.mulf %883, %884 : vector<1x1xf32>
      %890 = vector.broadcast %884 : vector<1x1xf32> to vector<1x8xf32>
      %891 = arith.mulf %875, %890 : vector<1x8xf32>
      %892 = vector.shape_cast %889 : vector<1x1xf32> to vector<1x1xf32>
      %893 = vector.broadcast %892 : vector<1x1xf32> to vector<1x8xf32>
      %894 = arith.select %888, %893, %891 : vector<1x8xi1>, vector<1x8xf32>
      %cst_204 = arith.constant 0.000000e+00 : f32
      %895 = vector.broadcast %cst_204 : f32 to vector<1x8xf32>
      %896 = arith.select %886, %895, %894 : vector<1x8xi1>, vector<1x8xf32>
      %897 = vector.broadcast %874 : i32 to vector<1x8xi32>
      %898 = arith.cmpi eq, %12, %897 : vector<1x8xi32>
      %899 = vector.shape_cast %883 : vector<1x1xf32> to vector<1x1xf32>
      %900 = vector.broadcast %899 : vector<1x1xf32> to vector<1x8xf32>
      %901 = arith.select %898, %900, %848 : vector<1x8xi1>, vector<1x8xf32>
      %902 = vector.broadcast %874 : i32 to vector<1x8xi32>
      %903 = arith.cmpi eq, %12, %902 : vector<1x8xi32>
      %cst_205 = arith.constant 0.000000e+00 : f32
      %904 = vector.shape_cast %903 : vector<1x8xi1> to vector<1x8xi1>
      %905 = vector.broadcast %904 : vector<1x8xi1> to vector<8x8xi1>
      %906 = vector.broadcast %cst_205 : f32 to vector<8x8xf32>
      %907 = arith.select %905, %873, %906 : vector<8x8xi1>, vector<8x8xf32>
      %cst_206 = arith.constant dense<0.000000e+00> : vector<8xf32>
      %908 = vector.multi_reduction <add>, %907, %cst_206 [1] : vector<8x8xf32> to vector<8xf32>
      %909 = vector.shape_cast %908 : vector<8xf32> to vector<8x1xf32>
      %910 = vector.broadcast %884 : vector<1x1xf32> to vector<8x1xf32>
      %911 = arith.mulf %909, %910 : vector<8x1xf32>
      %c7_i32_207 = arith.constant 7 : i32
      %912 = vector.broadcast %c7_i32_207 : i32 to vector<8x1xi32>
      %913 = arith.cmpi sle, %14, %912 : vector<8x1xi32>
      %cst_208 = arith.constant 0.000000e+00 : f32
      %914 = vector.broadcast %cst_208 : f32 to vector<8x1xf32>
      %915 = arith.select %913, %914, %911 : vector<8x1xi1>, vector<8x1xf32>
      %c7_i32_209 = arith.constant 7 : i32
      %916 = vector.broadcast %c7_i32_209 : i32 to vector<8x1xi32>
      %917 = arith.cmpi eq, %14, %916 : vector<8x1xi32>
      %918 = vector.broadcast %915 : vector<8x1xf32> to vector<8x8xf32>
      %919 = vector.broadcast %896 : vector<1x8xf32> to vector<8x8xf32>
      %920 = arith.mulf %918, %919 : vector<8x8xf32>
      %921 = arith.subf %873, %920 : vector<8x8xf32>
      %922 = vector.shape_cast %917 : vector<8x1xi1> to vector<8x1xi1>
      %923 = vector.broadcast %922 : vector<8x1xi1> to vector<8x8xi1>
      %924 = vector.shape_cast %896 : vector<1x8xf32> to vector<1x8xf32>
      %925 = vector.broadcast %924 : vector<1x8xf32> to vector<8x8xf32>
      %926 = arith.select %923, %925, %921 : vector<8x8xi1>, vector<8x8xf32>
      %c1_210 = arith.constant 1 : index
      %927 = arith.index_cast %50 : i32 to index
      %c0_211 = arith.constant 0 : index
      %928 = vector.load %arg7[%c1_210, %927, %c0_211] : memref<2x8x8xf32, #tpu.memory_space<vmem>>, vector<1x8x8xf32>
      %929 = vector.shape_cast %928 : vector<1x8x8xf32> to vector<8x8xf32>
      %930 = vector.shape_cast %926 : vector<8x8xf32> to vector<1x8x8xf32>
      tpu.vector_store %arg7[%c1_210, %927, %c0_211], %930 {strides = array<i32>} : memref<2x8x8xf32, #tpu.memory_space<vmem>>, vector<1x8x8xf32>,
      %931 = vector.broadcast %50 : i32 to vector<1x8xi32>
      %932 = arith.cmpi sge, %12, %931 : vector<1x8xi32>
      %c8_i32_212 = arith.constant 8 : i32
      %933 = arith.addi %50, %c8_i32_212 : i32
      %934 = vector.broadcast %933 : i32 to vector<1x8xi32>
      %935 = arith.cmpi slt, %12, %934 : vector<1x8xi32>
      %936 = arith.andi %932, %935 : vector<1x8xi1>
      %c1_213 = arith.constant 1 : index
      %c0_214 = arith.constant 0 : index
      %c0_215 = arith.constant 0 : index
      %937 = vector.load %arg9[%c1_213, %c0_214, %c0_215] : memref<2x1x8xf32, #tpu.memory_space<vmem>>, vector<1x1x8xf32>
      %938 = vector.shape_cast %937 : vector<1x1x8xf32> to vector<1x8xf32>
      %939 = arith.select %936, %901, %938 : vector<1x8xi1>, vector<1x8xf32>
      %c1_216 = arith.constant 1 : index
      %c0_217 = arith.constant 0 : index
      %c0_218 = arith.constant 0 : index
      %940 = vector.load %arg9[%c1_216, %c0_217, %c0_218] : memref<2x1x8xf32, #tpu.memory_space<vmem>>, vector<1x1x8xf32>
      %941 = vector.shape_cast %940 : vector<1x1x8xf32> to vector<1x8xf32>
      %942 = vector.shape_cast %939 : vector<1x8xf32> to vector<1x1x8xf32>
      tpu.vector_store %arg9[%c1_216, %c0_217, %c0_218], %942 {strides = array<i32>} : memref<2x1x8xf32, #tpu.memory_space<vmem>>, vector<1x1x8xf32>,
      %c8_i32_219 = arith.constant 8 : i32
      %943 = arith.addi %50, %c8_i32_219 : i32
      %c8_i32_220 = arith.constant 8 : i32
      %944 = arith.cmpi slt, %943, %c8_i32_220 : i32
      %945 = arith.extui %944 : i1 to i32
      %c0_i32_221 = arith.constant 0 : i32
      %946 = arith.cmpi ne, %945, %c0_i32_221 : i32
      scf.if %946 {
        %cst_247 = arith.constant dense<0.000000e+00> : vector<8x8xf32>
        %989 = tpu.matmul %926, %926, %cst_247 {dimension_numbers = #tpu.dot_dimension_numbers<[0], [0], [1], [1], [0, 1, 1, 1], [], []>, precision = #tpu.contract_precision<fp32>} : vector<8x8xf32>, vector<8x8xf32>, vector<8x8xf32> -> vector<8x8xf32>
        %c1_248 = arith.constant 1 : index
        %c0_249 = arith.constant 0 : index
        %c0_250 = arith.constant 0 : index
        %990 = vector.load %arg7[%c1_248, %c0_249, %c0_250] : memref<2x8x8xf32, #tpu.memory_space<vmem>>, vector<1x8x8xf32>
        %991 = vector.shape_cast %990 : vector<1x8x8xf32> to vector<8x8xf32>
        %c8_i32_251 = arith.constant 8 : i32
        %992 = arith.addi %50, %c8_i32_251 : i32
        %993 = vector.broadcast %992 : i32 to vector<8x1xi32>
        %994 = arith.cmpi sge, %13, %993 : vector<8x1xi32>
        %cst_252 = arith.constant 0.000000e+00 : f32
        %995 = vector.shape_cast %994 : vector<8x1xi1> to vector<8x1xi1>
        %996 = vector.broadcast %995 : vector<8x1xi1> to vector<8x8xi1>
        %997 = vector.broadcast %cst_252 : f32 to vector<8x8xf32>
        %998 = arith.select %996, %989, %997 : vector<8x8xi1>, vector<8x8xf32>
        %999 = arith.subf %991, %998 : vector<8x8xf32>
        %c1_253 = arith.constant 1 : index
        %c0_254 = arith.constant 0 : index
        %c0_255 = arith.constant 0 : index
        %1000 = vector.load %arg7[%c1_253, %c0_254, %c0_255] : memref<2x8x8xf32, #tpu.memory_space<vmem>>, vector<1x8x8xf32>
        %1001 = vector.shape_cast %1000 : vector<1x8x8xf32> to vector<8x8xf32>
        %1002 = vector.shape_cast %999 : vector<8x8xf32> to vector<1x8x8xf32>
        tpu.vector_store %arg7[%c1_253, %c0_254, %c0_255], %1002 {strides = array<i32>} : memref<2x8x8xf32, #tpu.memory_space<vmem>>, vector<1x8x8xf32>,
      } else {
      }
      %c1_i32_222 = arith.constant 1 : i32
      %c0_223 = arith.constant 0 : index
      %c0_224 = arith.constant 0 : index
      %c0_225 = arith.constant 0 : index
      %947 = vector.load %arg7[%c0_223, %c0_224, %c0_225] : memref<2x8x8xf32, #tpu.memory_space<vmem>>, vector<1x8x8xf32>
      %948 = vector.shape_cast %947 : vector<1x8x8xf32> to vector<8x8xf32>
      %949 = arith.cmpi slt, %10, %11 : vector<8x8xi32>
      %cst_226 = arith.constant 0.000000e+00 : f32
      %950 = vector.broadcast %cst_226 : f32 to vector<8x8xf32>
      %951 = arith.select %949, %948, %950 : vector<8x8xi1>, vector<8x8xf32>
      %c0_227 = arith.constant 0 : index
      %c0_228 = arith.constant 0 : index
      %c0_229 = arith.constant 0 : index
      %952 = vector.load %arg9[%c0_227, %c0_228, %c0_229] : memref<2x1x8xf32, #tpu.memory_space<vmem>>, vector<1x1x8xf32>
      %953 = vector.shape_cast %952 : vector<1x1x8xf32> to vector<1x8xf32>
      %cst_230 = arith.constant 1.000000e-30 : f32
      %954 = vector.broadcast %cst_230 : f32 to vector<1x8xf32>
      %955 = arith.maximumf %953, %954 : vector<1x8xf32>
      %956 = math.log %955 : vector<1x8xf32>
      %957 = tpu.transpose %951, [1, 0] : vector<8x8xf32> -> vector<8x8xf32>
      %958 = arith.addf %951, %957 : vector<8x8xf32>
      %959 = arith.cmpi eq, %10, %11 : vector<8x8xi32>
      %cst_231 = arith.constant 0.000000e+00 : f32
      %960 = vector.shape_cast %956 : vector<1x8xf32> to vector<1x8xf32>
      %961 = vector.broadcast %960 : vector<1x8xf32> to vector<8x8xf32>
      %962 = vector.broadcast %cst_231 : f32 to vector<8x8xf32>
      %963 = arith.select %959, %961, %962 : vector<8x8xi1>, vector<8x8xf32>
      %964 = arith.addf %958, %963 : vector<8x8xf32>
      %c0_232 = arith.constant 0 : index
      %c0_233 = arith.constant 0 : index
      %c0_234 = arith.constant 0 : index
      %965 = vector.load %arg6[%c0_232, %c0_233, %c0_234] : memref<2x8x8xf32, #tpu.memory_space<vmem>>, vector<1x8x8xf32>
      %966 = vector.shape_cast %965 : vector<1x8x8xf32> to vector<8x8xf32>
      %967 = vector.shape_cast %964 : vector<8x8xf32> to vector<1x8x8xf32>
      tpu.vector_store %arg6[%c0_232, %c0_233, %c0_234], %967 {strides = array<i32>} : memref<2x8x8xf32, #tpu.memory_space<vmem>>, vector<1x8x8xf32>,
      %c1_235 = arith.constant 1 : index
      %c0_236 = arith.constant 0 : index
      %c0_237 = arith.constant 0 : index
      %968 = vector.load %arg7[%c1_235, %c0_236, %c0_237] : memref<2x8x8xf32, #tpu.memory_space<vmem>>, vector<1x8x8xf32>
      %969 = vector.shape_cast %968 : vector<1x8x8xf32> to vector<8x8xf32>
      %970 = arith.cmpi slt, %10, %11 : vector<8x8xi32>
      %cst_238 = arith.constant 0.000000e+00 : f32
      %971 = vector.broadcast %cst_238 : f32 to vector<8x8xf32>
      %972 = arith.select %970, %969, %971 : vector<8x8xi1>, vector<8x8xf32>
      %c1_239 = arith.constant 1 : index
      %c0_240 = arith.constant 0 : index
      %c0_241 = arith.constant 0 : index
      %973 = vector.load %arg9[%c1_239, %c0_240, %c0_241] : memref<2x1x8xf32, #tpu.memory_space<vmem>>, vector<1x1x8xf32>
      %974 = vector.shape_cast %973 : vector<1x1x8xf32> to vector<1x8xf32>
      %cst_242 = arith.constant 1.000000e-30 : f32
      %975 = vector.broadcast %cst_242 : f32 to vector<1x8xf32>
      %976 = arith.maximumf %974, %975 : vector<1x8xf32>
      %977 = math.log %976 : vector<1x8xf32>
      %978 = tpu.transpose %972, [1, 0] : vector<8x8xf32> -> vector<8x8xf32>
      %979 = arith.addf %972, %978 : vector<8x8xf32>
      %980 = arith.cmpi eq, %10, %11 : vector<8x8xi32>
      %cst_243 = arith.constant 0.000000e+00 : f32
      %981 = vector.shape_cast %977 : vector<1x8xf32> to vector<1x8xf32>
      %982 = vector.broadcast %981 : vector<1x8xf32> to vector<8x8xf32>
      %983 = vector.broadcast %cst_243 : f32 to vector<8x8xf32>
      %984 = arith.select %980, %982, %983 : vector<8x8xi1>, vector<8x8xf32>
      %985 = arith.addf %979, %984 : vector<8x8xf32>
      %c1_244 = arith.constant 1 : index
      %c0_245 = arith.constant 0 : index
      %c0_246 = arith.constant 0 : index
      %986 = vector.load %arg6[%c1_244, %c0_245, %c0_246] : memref<2x8x8xf32, #tpu.memory_space<vmem>>, vector<1x8x8xf32>
      %987 = vector.shape_cast %986 : vector<1x8x8xf32> to vector<8x8xf32>
      %988 = vector.shape_cast %985 : vector<8x8xf32> to vector<1x8x8xf32>
      tpu.vector_store %arg6[%c1_244, %c0_245, %c0_246], %988 {strides = array<i32>} : memref<2x8x8xf32, #tpu.memory_space<vmem>>, vector<1x8x8xf32>,
    } else {
    }
    return
  }
  func.func @transform_0(%arg0: i32, %arg1: i32) -> (i32, i32) {
    %c0_i32 = arith.constant 0 : i32
    %c0_i32_0 = arith.constant 0 : i32
    %c0_i32_1 = arith.constant 0 : i32
    return %c0_i32, %c0_i32_0 : i32, i32
  }
  func.func @transform_1(%arg0: i32, %arg1: i32) -> (i32, i32) {
    %c0_i32 = arith.constant 0 : i32
    %c0_i32_0 = arith.constant 0 : i32
    %c0_i32_1 = arith.constant 0 : i32
    return %c0_i32, %c0_i32_0 : i32, i32
  }
  func.func @transform_2(%arg0: i32, %arg1: i32) -> (i32, i32) {
    %c0_i32 = arith.constant 0 : i32
    %c0_i32_0 = arith.constant 0 : i32
    %c0_i32_1 = arith.constant 0 : i32
    return %c0_i32, %c0_i32_0 : i32, i32
  }
  func.func @transform_3(%arg0: i32, %arg1: i32) -> (i32, i32, i32) {
    %c0_i32 = arith.constant 0 : i32
    %c0_i32_0 = arith.constant 0 : i32
    return %arg0, %c0_i32, %arg1 : i32, i32, i32
  }
  func.func @transform_4(%arg0: i32, %arg1: i32) -> (i32, i32, i32) {
    %c0_i32 = arith.constant 0 : i32
    %c0_i32_0 = arith.constant 0 : i32
    %c0_i32_1 = arith.constant 0 : i32
    return %arg0, %c0_i32, %c0_i32_0 : i32, i32, i32
  }
}

</mosaic_0001>

<bundles_post_ra>
// kernel: tpu_custom_call.1
= control target key start
LH: loop header
LB: loop body
LE: loop exit
PB: predicated region body
PF: predicated region fallthrough
CT: control target
= control target key end

     0   :  { %s4611_s0 = inlined_call_operand.vmem [shape: f32[8,16], index: 0, kind: input, shape index: {}]   ;;  %s4612_s1 = inlined_call_operand.vmem [shape: f32[8,1], index: 1, kind: input, shape index: {}]   ;;  %s4613_s2 = inlined_call_operand.vmem [shape: f32[8,1], index: 2, kind: input, shape index: {}]   ;;  %s4614_s3 = inlined_call_operand.hbm [shape: f32[4,16,256], index: 3, kind: input, shape index: {}]   ;;  %s4615_s4 = inlined_call_operand.hbm [shape: f32[4,8,8], index: 4, kind: output, shape index: {}]  }
   0x1   :  { %4620 = sst [smem:[#allocation15_spill]] %s4615_s4 }
   0x2   :  { %9 = vsyncpa [#allocation6], 0 }
   0x3   :  { %11 = vsyncpa [#allocation6 + $0x1], 0 }
   0x4   :  { %12 = vsyncpa [#allocation7], 0 }
   0x5   :  { %14 = vsyncpa [#allocation7 + $0x1], 0  ;;  %s4044_s15 = smov 0   ;;  %s4046_s16 = smov 0  }
   0x6   :  { %s4048_s17 = smov 0   ;;  %s4050_s18 = smov 0  }
   0x7   :  { %s4052_s19 = smov 0   ;;  %s4054_s20 = smov 0  }
   0x8   :  { %s4056_s21 = smov 0   ;;  %s4058_s22 = smov 0  }
   0x9   :  { %s4060_s23 = smov 0   ;;  %s4062_s24 = smov 0  }
   0xa   :  { %s4064_s25 = smov 0  }
   0xb LB: > { %4621 = sst [smem:[#allocation11_spill]] %s3980_s20  ;;  %s3528_s26 = sadd.s32 4294967295, %s4000_s25   ;;  %s4000_s25 = sphi %s4064_s25, %s20_s25   ;;  %s3996_s24 = sphi %s4062_s24, %s4643_s24   ;;  %s3992_s23 = sphi %s4060_s23, %s4642_s23   ;;  %s3988_s22 = sphi %s4058_s22, %s4641_s22   ;;  %s3984_s21 = sphi %s4056_s21, %s4640_s21   ;;  %s3980_s20 = sphi %s4054_s20, %s4632_s20   ;;  %s3976_s19 = sphi %s4052_s19, %s4639_s19   ;;  %s3972_s18 = sphi %s4050_s18, %s4638_s18   ;;  %s3968_s17 = sphi %s4048_s17, %s4637_s17   ;;  %s3964_s16 = sphi %s4046_s16, %s4636_s16   ;;  %s3960_s15 = sphi %s4044_s15, %s4635_s15  }
   0xc   : > { %s3529_s27 = sadd.s32 4294967294, %s4000_s25   ;;  %s29_s28 = sadd.s32 1, %s3992_s23 }
   0xd   : > { %s32_s29 = sadd.s32 1, %s3996_s24  ;;  %p30_p0 = scmp.ge.s32.totalorder %s29_s28, 2 }
   0xe   : > { %s104_s30 = sadd.s32 1, %s3980_s20  ;;  %p111_p1 = scmp.ne.s32.totalorder %s3980_s20, %s3976_s19 }
   0xf   : > { %p112_p2 = scmp.eq.s32.totalorder %s4000_s25, 0  ;;  %s4645_s28 = smov (%p30_p0, %s29_s28), 0 }
  0x10   : > { %4622 = sst [smem:[#allocation12_spill]] %s4645_s28  ;;  %s4647_s29 = smov (!%p30_p0, %s32_s29), %s3996_s24 }
  0x11   : > { %s100_s5 = ssub.s32 %s3992_s23, %s4645_s28  ;;  %p4110_p3 = por %p112_p2, %p111_p1 }
  0x12   : > { %p34_p4 = scmp.ge.s32.totalorder %s4647_s29, 2  ;;  %p117_p5 = scmp.ne.s32.totalorder %s3976_s19, %s3972_s18 }
  0x13   : > { %p118_p6 = scmp.eq.s32.totalorder %s3528_s26, 0  ;;  %s130_s7 = sadd.s32 1, %s3968_s17 }
  0x14   : > { %s4649_s29 = smov (%p34_p4, %s4647_s29), 0  ;;  %p140_p8 = scmp.ne.s32.totalorder %s3968_s17, %s3964_s16 }
  0x15   : > { %4624 = sst [smem:[#allocation13_spill]] %s4649_s29  ;;  %p4118_p7 = por %p118_p6, %p117_p5 }
  0x16   : > { %s99_s9 = ssub.s32 %s3996_s24, %s4649_s29  ;;  %p141_p9 = scmp.eq.s32.totalorder %s3528_s26, 3 }
  0x17   : > { %s101_s10 = sor.u32 %s100_s5, %s99_s9  ;;  %p128_p10 = scmp.eq.s32.totalorder %s99_s9, 0 }
  0x18   : > { %p102_p11 = scmp.eq.s32.totalorder %s101_s10, 0  ;;  %p4126_p12 = por %p141_p9, %p140_p8 }
  0x19   : > { %s4131_s12 = scalar_select %p128_p10, %s3968_s17, %s130_s7  }
  0x1a   : > { %s4134_s13 = scalar_select %p102_p11, %s3980_s20, %s104_s30  }
  0x1b   : > { %p146_p13 = scmp.ne.s32.totalorder %s3964_s16, %s3960_s15  ;;  %p147_p0 = scmp.eq.s32.totalorder %s3529_s27, 3 }
  0x1c   : > { %4627 = sst [smem:[#allocation14_spill]] %s4134_s13  ;;  %p3702_p1 = scmp.lt.s32.totalorder %s4000_s25, 4 }
  0x1d   : > { %p4139_p2 = por %p147_p0, %p146_p13  ;;  %s176_s18 = sand.u32 1, %s3980_s20  }
  0x1e   : > { %s3532_s26 = sshll.u32 %s176_s18, 5  ;;  %s3552_s5 = sshll.u32 %s3996_s24, 3 }
  0x1f   : > { %s186_s9 = sadd.s32 %s3992_s23, %s3552_s5  ;;  %s180_s10 = scalar_lea.vmem [#allocation5], %s3532_s26 }
  0x20   : > { %s189_s29 = sshll.u32 %s180_s10, 4  ;;  %s3535_s28 = sshll.u32 %s186_s9, 7  ;;  %s190_s29 = int_to_ptr.vmem [resolvable:$true] %s189_s29 }
  0x21   : > { %s188_s30 = scalar_lea.hbm %s4614_s3, %s3535_s28  ;;  %p4151_p4 = pnand %p3702_p1, %p4110_p3 }
  0x22   : > { %s177_s13 = scalar_lea.sflag [#allocation6], %s176_s18  ;;  %s3861_s20 = scalar_lea.vmem %s190_s29, 512 }
  0x23   : > { %p3850_p5 = pneg %p4151_p4  ;;  %p3862_p6 = scmp.ne.s32.totalorder %s190_s29, %s3861_s20 }
  0x24   : > { %s4006_s26 = smov [#allocation5]  }
  0x25   : > { %p3864_p8 = pnand %p3862_p6, %p3850_p5  ;;  %s3866_s5 = sshll.u32 %s4006_s26, 4  ;;  %s3867_s5 = int_to_ptr.vmem [resolvable:$false] %s3866_s5 }
  0x26   : > { %s3868_s9 = scalar_lea.vmem %s3867_s5, 1024  ;;  %p3869_p10 = scmp.lt.s32.totalorder %s190_s29, %s3867_s5 }
  0x27   : > { %p3865_p9 = pneg %p3864_p8  ;;  %p3870_p11 = scmp.lt.s32.totalorder %s3868_s9, %s3861_s20 }
  0x29   : > { %p3871_p13 = por %p3870_p11, %p3869_p10 }
  0x2b   : > { %p3872_p0 = pnand %p3871_p13, %p3865_p9 }
  0x2d   : > { %3875 = shalt.err (!%p3872_p0)
}
  0x2e   : > { %s4007_s4 = smov 256   ;;  %s4008_s28 = smov 128  }
  0x2f   : > { %s4009_s6 = smov 8   ;;  %p3536_p3 = scmp.ge.s32.totalorder %s4000_s25, 1 }
  0x30   : > { %3697 = dma.hbm_to_vmem [thread:$0]  (!%p4151_p4), %s188_s30, 512, %s190_s29, %s177_s13, %s4007_s4, %s4008_s28, %s4009_s6  }
  0x31   : > { %p197_p1 = scmp.lt.s32.totalorder %s4000_s25, 5 }
  0x33   : > { %p198_p5 = pnand %p3536_p3, %p197_p1 }
  0x34   : > { %s203_s18 = sand.u32 (!%p198_p5), 1, %s3976_s19  }
  0x35   : > { %201 = sbr.rel (%p198_p5) target bundleno = 2244 (0x8c4), region = 36  ;;  %s4162_s10 = sshll.u32 (!%p198_p5), %s203_s18, 5 }
  0x36   : > { %s204_s20 = scalar_lea.sflag (!%p198_p5), [#allocation6], %s203_s18  ;;  %s207_s7 = scalar_lea.vmem (!%p198_p5), [#allocation5], %s4162_s10 }
  0x3a   : > { %3951 = dma.done.wait (%p4118_p7), %s204_s20, 512  }
  0x3b   : > { %3953 = vsyncadd (%p4118_p7), %s204_s20, 4294966784  ;;  %s229_s29 = sand.u32 1, %s3964_s16   ;;  %p3539_p4 = scmp.ne.s32.totalorder %s3984_s21, 0 }
  0x3c   : > { %s3538_s13 = sshll.u32 %s229_s29, 4 }
  0x3d   : > { %s4172_s30 = scalar_lea.vmem [#allocation8], %s3538_s13  ;;  %237 = sbr.rel (%p3539_p4) target bundleno = 69 (0x45), region = 44 }
  0x42   : > { %vm238_vm0 = vcmask 64512   ;;  %vm241_vm1 = vcmask 7168   ;;  %v4010_v0 = vmov 0.0  }
  0x43   : > { %239 = vst.msk [vmem:[#allocation2] sm:$0xff] %vm238_vm0, %v4010_v0  ;;  %240 = vst.msk [vmem:[#allocation2 + $0x8] sm:$0xff] %vm238_vm0, %v4010_v0 }
  0x44   : > { %242 = vst.msk [vmem:[#allocation3] sm:$0xff] %vm241_vm1, %v4010_v0  ;;  %243 = vst.msk [vmem:[#allocation3 + $0x8] sm:$0xff] %vm241_vm1, %v4010_v0 }
  0x45 PF: > { %v4178_v1 = vld [vmem:[%s4611_s0] sm:$0xff]  ;;  %s4190_s28 = smov 0  }
  0x46   : > { %v4183_v2 = vld [vmem:[%s4612_s1] sm:$0xff] }
  0x47   : > { %v4188_v3 = vld [vmem:[%s4613_s2] sm:$0xff] }
  0x48 LB: >> { %v4011_v4 = vmov 0.0   ;;  %vm4012_vm2 = vmmov 0   ;;  %s3540_s6 = sshll.u32 %s4004_s28, 4  ;;  %v4013_v5 = vmov 0   ;;  %vm257_vm3 = vcmask 130048   ;;  %s3542_s20 = sshll.u32 %s4004_s28, 3  ;;  %s4004_s28 = sphi %s4190_s28, %s252_s28  }
  0x49   : >> { %3593 = vmatprep.subr.mxu0 %v4011_v4  ;;  %3597 = vmatprep.mubr.msk.f32.mxu0 %vm4012_vm2, %v4011_v4  ;;  %s254_s18 = scalar_lea.vmem %s207_s7, %s3540_s6 [#allocation5]  ;;  %s345_s13 = scalar_lea.vmem [#allocation3], %s3542_s20  ;;  %vm350_vm4 = vcmask 7168   ;;  %vm801_vm5 = vcmask 64512  }
  0x4a   : >> { %3811 = vset.pattern.permute.xlu0 %v4013_v5  ;;  %3600 = vmatprep.subr.mxu1 %v4011_v4  ;;  %v256_v6 = vld [vmem:[%s254_s18 + $0x8] sm:$0xff]  ;;  %v255_v7 = vld [vmem:[%s254_s18] sm:$0xff]  ;;  %s352_s8 = scalar_lea.vmem [#allocation2], %s3542_s20  ;;  %s252_s28 = sadd.s32 1, %s4004_s28  }
  0x4b   : >> { %333 = vperm.xlu0 %3811, %v4183_v2   ;;  %3602 = vmatprep.mubr.msk.f32.mxu1 %vm4012_vm2, %v4011_v4  ;;  %v346_v20 = vld [vmem:[%s345_s13] sm:$0xff]  ;;  %p249_p7 = scmp.ge.s32.totalorder %s252_s28, 2  }
  0x4c   : >> { %3594 = vmatpush3.msra.mxu0 %v256_v6  ;;  %v353_v37 = vld [vmem:[%s352_s8] sm:$0xff]  ;;  %p3543_p6 = scmp.ne.s32.totalorder (%p249_p7), %s3984_s21, 1 }
  0x4d   : >> { %3595 = vmatprep.subr.mxu0 %v4011_v4 }
  0x4e   : >> { %3596 = vmatpush3.msra.mxu0 %v255_v7 }
  0x4f   : >> { %339 = vperm.xlu0 %3811, %v4188_v3   ;;  %3598 = vmatmul.mubr.msk.f32.vlgmr.msra.gmra.mxu0 %vm257_vm3, %v4178_v1 }
  0x50   : >> { %3605 = vmatprep.subr.mxu0 %v4011_v4  ;;  %3607 = vmatprep.mubr.msk.f32.mxu0 %vm4012_vm2, %v4011_v4 }
  0xc6   : >> { %v334_v8 = vpop.permute.xlu0 %333 }
  0xca   : >> { %v340_v11 = vpop.permute.xlu0 %339 }
 0x10f   : >> { %v327_v9 = vpop.f32.mrf.mxu0 }
 0x110   : >> { %v336_v10 = vmul.f32 %v334_v8, %v327_v9 }
 0x111   : >> { %v3599_v12 = vpop.f32.mrf.mxu0 }
 0x112   : >> { %v342_v13 = vadd.f32 %v340_v11, %v336_v10 }
 0x114   : >> { %v343_v14 = vmax.f32 %v342_v13, 0.0 }
 0x116   : >> { %v385_v15 = vand.u32 4294901760, %v343_v14  ;;  %347 = vadd.xlane.f32.xlu1 %v343_v14 }
 0x118   : >> { %v421_v16 = vsub.f32 %v343_v14, %v385_v15  ;;  %3601 = vmatpush3.xpose.msra.mxu1 %v385_v15 }
 0x119   : >> { %3610 = vmatprep.subr.mxu1 %v4011_v4 }
 0x11a   : >> { %v422_v17 = vand.u32 4294901760, %v421_v16 }
 0x11c   : >> { %v423_v18 = vsub.f32 %v421_v16, %v422_v17 }
 0x11e   : >> { %v424_v19 = vand.u32 4294901760, %v423_v18 }
 0x120   : >> { %3603 = vmatmul.mubr.f32.vlgmr.msra.gmra.mxu1 %v424_v19  ;;  %3606 = vmatpush3.xpose.msra.mxu0 %v424_v19 }
 0x121   : >> { %3611 = vmatpush3.xpose.msra.mxu1 %v421_v16  ;;  %3612 = vmatprep.mubr.msk.f32.mxu1 %vm4012_vm2, %v4011_v4 }
 0x122   : >> { %3615 = vmatprep.subr.mxu0 %v4011_v4  ;;  %3620 = vmatprep.subr.mxu1 %v4011_v4 }
 0x123   : >> { %3608 = vmatmul.mubr.f32.vlgmr.msra.gmra.mxu0 %v385_v15 }
 0x124   : >> { %3613 = vmatmul.mubr.f32.vlgmr.msra.gmra.mxu1 %v421_v16  ;;  %3616 = vmatpush3.xpose.msra.mxu0 %v385_v15 }
 0x125   : >> { %3621 = vmatpush3.xpose.msra.mxu1 %v422_v17  ;;  %3617 = vmatprep.mubr.msk.f32.mxu0 %vm4012_vm2, %v4011_v4 }
 0x126   : >> { %3622 = vmatprep.mubr.msk.f32.mxu1 %vm4012_vm2, %v4011_v4  ;;  %3625 = vmatprep.subr.mxu0 %v4011_v4 }
 0x127   : >> { %3618 = vmatmul.mubr.f32.vlgmr.msra.gmra.mxu0 %v422_v17 }
 0x128   : >> { %3623 = vmatmul.mubr.f32.vlgmr.msra.gmra.mxu1 %v385_v15  ;;  %3626 = vmatpush3.xpose.msra.mxu0 %v385_v15 }
 0x129   : >> { %3627 = vmatprep.mubr.msk.f32.mxu0 %vm4012_vm2, %v4011_v4 }
 0x12b   : >> { %3628 = vmatmul.mubr.f32.vlgmr.msra.gmra.mxu0 %v385_v15 }
 0x19f   : >> { %v348_v21 = vpop.xlane.xlu1 %347 }
 0x1a0   : >> { %v349_v22 = vadd.f32 %v348_v21, %v346_v20 }
 0x1a2   : >> { %351 = vst.msk [vmem:[%s345_s13] sm:$0xff] %vm350_vm4, %v349_v22 }
 0x1e0   : >> { %v426_v23 = vpop.f32.mrf.mxu1 }
 0x1e2   : >> { %v3604_v24 = vpop.f32.mrf.mxu1 }
 0x1e3   : >> { %v502_v25 = vpop.f32.mrf.mxu0 }
 0x1e4   : >> { %v503_v26 = vadd.f32 %v502_v25, %v426_v23  ;;  %v576_v27 = vpop.f32.mrf.mxu1 }
 0x1e5   : >> { %v3609_v28 = vpop.f32.mrf.mxu0 }
 0x1e6   : >> { %v577_v29 = vadd.f32 %v576_v27, %v503_v26  ;;  %v3614_v30 = vpop.f32.mrf.mxu1 }
 0x1e7   : >> { %v650_v31 = vpop.f32.mrf.mxu0 }
 0x1e8   : >> { %v651_v32 = vadd.f32 %v650_v31, %v577_v29  ;;  %v724_v33 = vpop.f32.mrf.mxu1 }
 0x1e9   : >> { %v3619_v34 = vpop.f32.mrf.mxu0 }
 0x1ea   : >> { %v725_v35 = vadd.f32 %v724_v33, %v651_v32  ;;  %v3624_v36 = vpop.f32.mrf.mxu1 }
 0x1eb   : >> { %v796_v38 = vpop.f32.mrf.mxu0 }
 0x1ec   : >> { %v797_v39 = vadd.f32 %v796_v38, %v725_v35  ;;  %251 = sbr.rel (!%p249_p7) target bundleno = 72 (0x48), region = 112 }
 0x1ed   : >> { %v3629_v40 = vpop.f32.mrf.mxu0 }
 0x1ee   : >> { %v800_v41 = vadd.f32 %v797_v39, %v353_v37 }
 0x1f0   : >> { %802 = vst.msk [vmem:[%s352_s8] sm:$0xff] %vm801_vm5, %v800_v41 }
 0x1f1   : > { %806 = sbr.rel (%p3543_p6) target bundleno = 2220 (0x8ac), region = 55 }
 0x1f6   : > { %v813_v42 = vld [vmem:[#allocation3] sm:$0xff]  ;;  %v1272_v43 = vld [vmem:[#allocation3 + $0x8] sm:$0xff]  ;;  %v4014_v44 = vmov 0.0   ;;  %vm4015_vm6 = vmmov 0   ;;  %v807_v61 = vlaneseq  ;;  %vm1733_vm9 = vcmask 57344  }
 0x1f7   : > { %3630 = vmatprep.subr.mxu0 %v4014_v44  ;;  %v814_v45 = vmul.f32 0.00390625, %v813_v42  ;;  %3632 = vmatprep.mubr.msk.f32.mxu0 %vm4015_vm6, %v4014_v44  ;;  %v1273_v46 = vmul.f32 0.00390625, %v1272_v43  ;;  %v1265_v7 = vld [vmem:[#allocation2] sm:$0xff]  ;;  %v1724_v29 = vld [vmem:[#allocation2 + $0x8] sm:$0xff]  ;;  %vm1772_vm13 = vcmask 58369   ;;  %vm1814_vm2 = vcmask 59394  }
 0x1f8   : > { %3635 = vmatprep.subr.mxu1 %v4014_v44  ;;  %3637 = vmatprep.mubr.msk.f32.mxu1 %vm4015_vm6, %v4014_v44  ;;  %v4253_v4 = vshrl.u32 %v807_v61, 7  ;;  %v4255_v5 = vand.u32 127, %v807_v61  ;;  %v1266_v13 = vmul.f32 0.00390625, %v1265_v7  ;;  %v1725_v35 = vmul.f32 0.00390625, %v1724_v29 }
 0x1f9   : > { %v817_v47 = vsel %vm350_vm4, %v814_v45, 0  ;;  %v1275_v48 = vsel %vm350_vm4, %v1273_v46, 0 }
 0x1fa   : > { %v850_v49 = vand.u32 4294901760, %v817_v47  ;;  %v1308_v51 = vand.u32 4294901760, %v1275_v48  ;;  %vm811_vm7 = vcmp.eq.s32.totalorder %v4253_v4, %v4255_v5  ;;  %vm1731_vm8 = vcmp.eq.s32.totalorder %v4255_v5, 0 }
 0x1fb   : > { %v812_v17 = vsel %vm811_vm7, 1e-06, %v4014_v44  ;;  %vm1756_vm10 = vcmp.le.s32.totalorder %v4253_v4, 0  ;;  %vm1758_vm11 = vcmp.eq.s32.totalorder %v4253_v4, 0  ;;  %vm1770_vm12 = vcmp.eq.s32.totalorder %v4255_v5, 1 }
 0x1fc   : > { %3631 = vmatpush3.xpose.msra.mxu0 %v850_v49  ;;  %v886_v50 = vsub.f32 %v817_v47, %v850_v49  ;;  %v1344_v54 = vsub.f32 %v1275_v48, %v1308_v51  ;;  %vm1778_vm14 = vcmp.lt.s32.totalorder %v4255_v5, 1  ;;  %vm1798_vm15 = vcmp.le.s32.totalorder %v4253_v4, 1 }
 0x1fd   : > { %3640 = vmatprep.subr.mxu0 %v4014_v44  ;;  %vm1800_vm0 = vcmp.eq.s32.totalorder %v4253_v4, 1  ;;  %vm1812_vm1 = vcmp.eq.s32.totalorder %v4255_v5, 2  ;;  %vm1820_vm3 = vcmp.lt.s32.totalorder %v4255_v5, 2  ;;  %vm1840_vm4 = vcmp.le.s32.totalorder %v4253_v4, 2 }
 0x1fe   : > { %v887_v52 = vand.u32 4294901760, %v886_v50  ;;  %v1345_v56 = vand.u32 4294901760, %v1344_v54 }
 0x200   : > { %v888_v53 = vsub.f32 %v886_v50, %v887_v52  ;;  %v1346_v57 = vsub.f32 %v1344_v54, %v1345_v56 }
 0x202   : > { %v889_v55 = vand.u32 4294901760, %v888_v53  ;;  %v1347_v58 = vand.u32 4294901760, %v1346_v57  ;;  %v4273_v53 = vsub.s32 0, %v4253_v4 }
 0x204   : > { %3633 = vmatmul.mubr.f32.vlgmr.msra.gmra.mxu0 %v889_v55  ;;  %3636 = vmatpush3.xpose.msra.mxu1 %v889_v55 }
 0x205   : > { %3641 = vmatpush3.xpose.msra.mxu0 %v886_v50  ;;  %3642 = vmatprep.mubr.msk.f32.mxu0 %vm4015_vm6, %v4014_v44 }
 0x206   : > { %3645 = vmatprep.subr.mxu1 %v4014_v44  ;;  %3650 = vmatprep.subr.mxu0 %v4014_v44 }
 0x207   : > { %3638 = vmatmul.mubr.f32.vlgmr.msra.gmra.mxu1 %v850_v49 }
 0x208   : > { %3643 = vmatmul.mubr.f32.vlgmr.msra.gmra.mxu0 %v886_v50  ;;  %3646 = vmatpush3.xpose.msra.mxu1 %v850_v49 }
 0x209   : > { %3651 = vmatpush3.xpose.msra.mxu0 %v887_v52  ;;  %3647 = vmatprep.mubr.msk.f32.mxu1 %vm4015_vm6, %v4014_v44 }
 0x20a   : > { %3652 = vmatprep.mubr.msk.f32.mxu0 %vm4015_vm6, %v4014_v44  ;;  %3655 = vmatprep.subr.mxu1 %v4014_v44 }
 0x20b   : > { %3648 = vmatmul.mubr.f32.vlgmr.msra.gmra.mxu1 %v887_v52  ;;  %3660 = vmatprep.subr.mxu0 %v4014_v44 }
 0x20c   : > { %3653 = vmatmul.mubr.f32.vlgmr.msra.gmra.mxu0 %v850_v49  ;;  %3656 = vmatpush3.xpose.msra.mxu1 %v850_v49 }
 0x20d   : > { %3661 = vmatpush3.xpose.msra.mxu0 %v1308_v51  ;;  %3657 = vmatprep.mubr.msk.f32.mxu1 %vm4015_vm6, %v4014_v44 }
 0x20e   : > { %3662 = vmatprep.mubr.msk.f32.mxu0 %vm4015_vm6, %v4014_v44  ;;  %3665 = vmatprep.subr.mxu1 %v4014_v44 }
 0x20f   : > { %3658 = vmatmul.mubr.f32.vlgmr.msra.gmra.mxu1 %v850_v49  ;;  %3670 = vmatprep.subr.mxu0 %v4014_v44 }
 0x210   : > { %3663 = vmatmul.mubr.f32.vlgmr.msra.gmra.mxu0 %v1347_v58  ;;  %3666 = vmatpush3.xpose.msra.mxu1 %v1347_v58 }
 0x211   : > { %3671 = vmatpush3.xpose.msra.mxu0 %v1344_v54  ;;  %3667 = vmatprep.mubr.msk.f32.mxu1 %vm4015_vm6, %v4014_v44 }
 0x212   : > { %3672 = vmatprep.mubr.msk.f32.mxu0 %vm4015_vm6, %v4014_v44  ;;  %3675 = vmatprep.subr.mxu1 %v4014_v44 }
 0x213   : > { %3668 = vmatmul.mubr.f32.vlgmr.msra.gmra.mxu1 %v1308_v51  ;;  %3680 = vmatprep.subr.mxu0 %v4014_v44 }
 0x214   : > { %3673 = vmatmul.mubr.f32.vlgmr.msra.gmra.mxu0 %v1344_v54  ;;  %3676 = vmatpush3.xpose.msra.mxu1 %v1308_v51 }
 0x215   : > { %3681 = vmatpush3.xpose.msra.mxu0 %v1345_v56  ;;  %3677 = vmatprep.mubr.msk.f32.mxu1 %vm4015_vm6, %v4014_v44 }
 0x216   : > { %3682 = vmatprep.mubr.msk.f32.mxu0 %vm4015_vm6, %v4014_v44  ;;  %3685 = vmatprep.subr.mxu1 %v4014_v44 }
 0x217   : > { %3678 = vmatmul.mubr.f32.vlgmr.msra.gmra.mxu1 %v1345_v56 }
 0x218   : > { %3683 = vmatmul.mubr.f32.vlgmr.msra.gmra.mxu0 %v1308_v51  ;;  %3686 = vmatpush3.xpose.msra.mxu1 %v1308_v51 }
 0x219   : > { %3687 = vmatprep.mubr.msk.f32.mxu1 %vm4015_vm6, %v4014_v44  ;;  %vm1842_vm6 = vcmp.eq.s32.totalorder %v4253_v4, 2 }
 0x21b   : > { %3688 = vmatmul.mubr.f32.vlgmr.msra.gmra.mxu1 %v1308_v51 }
 0x2c4   : > { %v891_v59 = vpop.f32.mrf.mxu0 }
 0x2c6   : > { %v3634_v60 = vpop.f32.mrf.mxu0 }
 0x2c7   : > { %v967_v62 = vpop.f32.mrf.mxu1 }
 0x2c8   : > { %v968_v63 = vadd.f32 %v967_v62, %v891_v59  ;;  %v1041_v0 = vpop.f32.mrf.mxu0 }
 0x2c9   : > { %v3639_v1 = vpop.f32.mrf.mxu1 }
 0x2ca   : > { %v1042_v2 = vadd.f32 %v1041_v0, %v968_v63  ;;  %v3644_v3 = vpop.f32.mrf.mxu0 }
 0x2cb   : > { %v1115_v6 = vpop.f32.mrf.mxu1 }
 0x2cc   : > { %v1116_v8 = vadd.f32 %v1115_v6, %v1042_v2  ;;  %v1189_v9 = vpop.f32.mrf.mxu0 }
 0x2cd   : > { %v3649_v10 = vpop.f32.mrf.mxu1 }
 0x2ce   : > { %v1190_v11 = vadd.f32 %v1189_v9, %v1116_v8  ;;  %v3654_v12 = vpop.f32.mrf.mxu0 }
 0x2cf   : > { %v1261_v14 = vpop.f32.mrf.mxu1 }
 0x2d0   : > { %v1262_v15 = vadd.f32 %v1261_v14, %v1190_v11  ;;  %v1349_v16 = vpop.f32.mrf.mxu0 }
 0x2d1   : > { %v3659_v18 = vpop.f32.mrf.mxu1 }
 0x2d2   : > { %v1267_v19 = vsub.f32 %v1266_v13, %v1262_v15  ;;  %v3664_v20 = vpop.f32.mrf.mxu0 }
 0x2d3   : > { %v1425_v21 = vpop.f32.mrf.mxu1 }
 0x2d4   : > { %v1268_v22 = vadd.f32 %v1267_v19, %v812_v17  ;;  %v1426_v23 = vadd.f32 %v1425_v21, %v1349_v16  ;;  %v1499_v24 = vpop.f32.mrf.mxu0 }
 0x2d5   : > { %v3669_v25 = vpop.f32.mrf.mxu1 }
 0x2d6   : > { %1270 = vst.msk [vmem:[#allocation2] sm:$0xff] %vm801_vm5, %v1268_v22  ;;  %v1500_v26 = vadd.f32 %v1499_v24, %v1426_v23  ;;  %v3674_v27 = vpop.f32.mrf.mxu0 }
 0x2d7   : > { %v1573_v28 = vpop.f32.mrf.mxu1 }
 0x2d8   : > { %v1574_v30 = vadd.f32 %v1573_v28, %v1500_v26  ;;  %v1647_v31 = vpop.f32.mrf.mxu0 }
 0x2d9   : > { %v3679_v32 = vpop.f32.mrf.mxu1 }
 0x2da   : > { %v1648_v33 = vadd.f32 %v1647_v31, %v1574_v30  ;;  %v3684_v34 = vpop.f32.mrf.mxu0  ;;  %v1795_v30 = vsub.s32 1, %v4253_v4 }
 0x2db   : > { %v1719_v36 = vpop.f32.mrf.mxu1 }
 0x2dc   : > { %v1720_v37 = vadd.f32 %v1719_v36, %v1648_v33 }
 0x2dd   : > { %v3689_v38 = vpop.f32.mrf.mxu1  ;;  %v1729_v39 = vld [vmem:[#allocation2] sm:$0xff] }
 0x2de   : > { %v1726_v40 = vsub.f32 %v1725_v35, %v1720_v37  ;;  %v1732_v41 = vsel %vm1731_vm8, %v1729_v39, 0.0 }
 0x2df   : > { %v1748_v42 = vsel %vm801_vm5, %v1732_v41, 0.0  ;;  %v1734_v43 = vsel %vm1733_vm9, %v1732_v41, 0.0 }
 0x2e0   : > { %v1727_v44 = vadd.f32 %v1726_v40, %v812_v17  ;;  %1749 = vadd.xlane.f32.xlu1 %v1748_v42  ;;  %1735 = vadd.xlane.f32.xlu0 %v1734_v43 }
 0x2e2   : > { %1728 = vst.msk [vmem:[#allocation2 + $0x8] sm:$0xff] %vm801_vm5, %v1727_v44 }
 0x2e9   : > { %v2570_v45 = vld [vmem:[#allocation2 + $0x8] sm:$0xff] }
 0x2ea   : > { %v2571_v46 = vsel %vm1731_vm8, %v2570_v45, 0.0 }
 0x2eb   : > { %v2583_v47 = vsel %vm801_vm5, %v2571_v46, 0.0  ;;  %v2572_v48 = vsel %vm1733_vm9, %v2571_v46, 0.0  ;;  %vm1856_vm9 = vcmask 60419  }
 0x2ec   : > { %2584 = vadd.xlane.f32.xlu1 %v2583_v47  ;;  %2573 = vadd.xlane.f32.xlu0 %v2572_v48 }
 0x369   : > { %v1736_v49 = vpop.xlane.xlu0 %1735  ;;  %v1750_v58 = vpop.xlane.xlu1 %1749 }
 0x36a   : > { %v1737_v50 = vmax.f32 %v1736_v49, 1e-30 }
 0x36c   : > { %3812 = vrsqrt.f32 %v1737_v50  ;;  %v1744_v22 = vsel %vm1731_vm8, %v1737_v50, 0.0 }
 0x36d   : > { %v1784_v24 = vrot.slane %v1744_v22, 7 }
 0x375   : > { %v2574_v51 = vpop.xlane.xlu0 %2573  ;;  %v2585_v10 = vpop.xlane.xlu1 %2584 }
 0x376   : > { %v2575_v52 = vmax.f32 %v2574_v51, 1e-30 }
 0x378   : > { %3814 = vrsqrt.f32 %v2575_v52  ;;  %v2581_v27 = vsel %vm1731_vm8, %v2575_v52, 0.0 }
 0x379   : > { %v3813_v54 = vpop.eup %3812  ;;  %v2610_v29 = vrot.slane %v2581_v27, 7 }
 0x37a   : > { %v1740_v55 = vmul.f32 %v3813_v54, %v1737_v50  ;;  %v1741_v56 = vmul.f32 %v3813_v54, %v1729_v39  ;;  %v1754_v57 = vrot.slane %v3813_v54, %v4273_v53 }
 0x37c   : > { %v1742_v59 = vsel %vm1731_vm8, %v1740_v55, %v1741_v56  ;;  %v1755_v60 = vmul.f32 %v1754_v57, %v1750_v58 }
 0x37d   : > { %v1762_v61 = vrot.slane %v1742_v59, %v4273_v53 }
 0x37e   : > { %v1757_v62 = vsel %vm1756_vm10, 0.0, %v1755_v60 }
 0x37f   : > { %v1763_v63 = vmul.f32 %v1762_v61, %v1757_v62 }
 0x381   : > { %v1764_v0 = vsub.f32 %v1729_v39, %v1763_v63 }
 0x383   : > { %v1767_v1 = vsel %vm1758_vm11, %v1762_v61, %v1764_v0 }
 0x384   : > { %v1771_v2 = vsel %vm1770_vm12, %v1767_v1, 0.0 }
 0x385   : > { %v3815_v3 = vpop.eup %3814  ;;  %v1773_v6 = vsel %vm1772_vm13, %v1771_v2, 0.0  ;;  %v1790_v13 = vsel %vm801_vm5, %v1771_v2, 0.0 }
 0x386   : > { %v2577_v7 = vmul.f32 %v3815_v3, %v2575_v52  ;;  %1774 = vadd.xlane.f32.xlu0 %v1773_v6  ;;  %v2578_v8 = vmul.f32 %v3815_v3, %v2570_v45  ;;  %v2589_v9 = vrot.slane %v3815_v3, %v4273_v53 }
 0x388   : > { %v2579_v11 = vsel %vm1731_vm8, %v2577_v7, %v2578_v8  ;;  %v2590_v12 = vmul.f32 %v2589_v9, %v2585_v10  ;;  %v1837_v10 = vsub.s32 2, %v4253_v4  ;;  %vm1854_vm8 = vcmp.eq.s32.totalorder %v4255_v5, 3 }
 0x389   : > { %v2595_v14 = vrot.slane %v2579_v11, %v4273_v53 }
 0x38a   : > { %1791 = vadd.xlane.f32.xlu0 %v1790_v13  ;;  %v2591_v15 = vsel %vm1756_vm10, 0.0, %v2590_v12  ;;  %vm1862_vm10 = vcmp.lt.s32.totalorder %v4255_v5, 3 }
 0x38b   : > { %v2596_v16 = vmul.f32 %v2595_v14, %v2591_v15 }
 0x38d   : > { %v2597_v17 = vsub.f32 %v2570_v45, %v2596_v16 }
 0x38f   : > { %v2598_v18 = vsel %vm1758_vm11, %v2595_v14, %v2597_v17  ;;  %vm1882_vm11 = vcmp.le.s32.totalorder %v4253_v4, 3 }
 0x390   : > { %v2599_v19 = vsel %vm1770_vm12, %v2598_v18, 0.0 }
 0x391   : > { %v2600_v20 = vsel %vm1772_vm13, %v2599_v19, 0.0  ;;  %v2614_v21 = vsel %vm801_vm5, %v2599_v19, 0.0  ;;  %vm1896_vm13 = vcmp.eq.s32.totalorder %v4255_v5, 4 }
 0x392   : > { %2601 = vadd.xlane.f32.xlu1 %v2600_v20 }
 0x396   : > { %2615 = vadd.xlane.f32.xlu1 %v2614_v21 }
 0x40f   : > { %v1775_v23 = vpop.xlane.xlu0 %1774 }
 0x410   : > { %v1776_v25 = vmax.f32 %v1775_v23, 1e-30 }
 0x412   : > { %3816 = vrsqrt.f32 %v1776_v25  ;;  %v1786_v26 = vsel %vm1770_vm12, %v1776_v25, %v1784_v24 }
 0x413   : > { %v1792_v37 = vpop.xlane.xlu0 %1791  ;;  %v1826_v3 = vrot.slane %v1786_v26, 7 }
 0x41b   : > { %v2602_v28 = vpop.xlane.xlu1 %2601 }
 0x41c   : > { %v2603_v31 = vmax.f32 %v2602_v28, 1e-30 }
 0x41e   : > { %3818 = vrsqrt.f32 %v2603_v31  ;;  %v2612_v32 = vsel %vm1770_vm12, %v2603_v31, %v2610_v29 }
 0x41f   : > { %v3817_v33 = vpop.eup %3816  ;;  %v2616_v52 = vpop.xlane.xlu1 %2615  ;;  %v2641_v9 = vrot.slane %v2612_v32, 7 }
 0x420   : > { %v1779_v34 = vmul.f32 %v3817_v33, %v1776_v25  ;;  %v1780_v35 = vmul.f32 %v3817_v33, %v1767_v1  ;;  %v1796_v36 = vrot.slane %v3817_v33, %v1795_v30 }
 0x422   : > { %v1781_v38 = vsel %vm1770_vm12, %v1779_v34, %v1780_v35  ;;  %v1797_v39 = vmul.f32 %v1796_v36, %v1792_v37 }
 0x423   : > { %v1782_v40 = vsel %vm1778_vm14, 0.0, %v1781_v38 }
 0x424   : > { %v1804_v41 = vrot.slane %v1782_v40, %v1795_v30  ;;  %v1799_v42 = vsel %vm1798_vm15, 0.0, %v1797_v39 }
 0x426   : > { %v1805_v43 = vmul.f32 %v1804_v41, %v1799_v42 }
 0x428   : > { %v1806_v44 = vsub.f32 %v1767_v1, %v1805_v43 }
 0x42a   : > { %v1809_v45 = vsel %vm1800_vm0, %v1804_v41, %v1806_v44 }
 0x42b   : > { %v3819_v46 = vpop.eup %3818  ;;  %v1813_v47 = vsel %vm1812_vm1, %v1809_v45, 0.0 }
 0x42c   : > { %v2605_v48 = vmul.f32 %v3819_v46, %v2603_v31  ;;  %v2606_v49 = vmul.f32 %v3819_v46, %v2598_v18  ;;  %v2620_v50 = vrot.slane %v3819_v46, %v1795_v30  ;;  %v1815_v51 = vsel %vm1814_vm2, %v1813_v47, 0.0 }
 0x42d   : > { %1816 = vadd.xlane.f32.xlu0 %v1815_v51  ;;  %v1832_v59 = vsel %vm801_vm5, %v1813_v47, 0.0  ;;  %v1879_v51 = vsub.s32 3, %v4253_v4 }
 0x42e   : > { %v2607_v54 = vsel %vm1770_vm12, %v2605_v48, %v2606_v49  ;;  %v2621_v55 = vmul.f32 %v2620_v50, %v2616_v52  ;;  %vm1884_vm12 = vcmp.eq.s32.totalorder %v4253_v4, 3 }
 0x42f   : > { %v2608_v56 = vsel %vm1778_vm14, 0.0, %v2607_v54  ;;  %vm1898_vm14 = vcmask 61444  }
 0x430   : > { %v2626_v57 = vrot.slane %v2608_v56, %v1795_v30  ;;  %v2622_v58 = vsel %vm1798_vm15, 0.0, %v2621_v55  ;;  %vm1904_vm15 = vcmp.lt.s32.totalorder %v4255_v5, 4 }
 0x431   : > { %1833 = vadd.xlane.f32.xlu0 %v1832_v59 }
 0x432   : > { %v2627_v60 = vmul.f32 %v2626_v57, %v2622_v58 }
 0x434   : > { %v2628_v61 = vsub.f32 %v2598_v18, %v2627_v60 }
 0x436   : > { %v2629_v62 = vsel %vm1800_vm0, %v2626_v57, %v2628_v61  ;;  %vm1924_vm0 = vcmp.le.s32.totalorder %v4253_v4, 4 }
 0x437   : > { %v2630_v63 = vsel %vm1812_vm1, %v2629_v62, 0.0 }
 0x438   : > { %v2631_v0 = vsel %vm1814_vm2, %v2630_v63, 0.0  ;;  %v2645_v1 = vsel %vm801_vm5, %v2630_v63, 0.0  ;;  %vm1938_vm2 = vcmp.eq.s32.totalorder %v4255_v5, 5 }
 0x439   : > { %2632 = vadd.xlane.f32.xlu1 %v2631_v0 }
 0x43d   : > { %2646 = vadd.xlane.f32.xlu1 %v2645_v1 }
 0x4b6   : > { %v1817_v2 = vpop.xlane.xlu0 %1816 }
 0x4b7   : > { %v1818_v6 = vmax.f32 %v1817_v2, 1e-30 }
 0x4b9   : > { %3820 = vrsqrt.f32 %v1818_v6  ;;  %v1828_v7 = vsel %vm1812_vm1, %v1818_v6, %v1826_v3 }
 0x4ba   : > { %v1834_v17 = vpop.xlane.xlu0 %1833  ;;  %v1868_v46 = vrot.slane %v1828_v7, 7 }
 0x4c2   : > { %v2633_v8 = vpop.xlane.xlu1 %2632 }
 0x4c3   : > { %v2634_v11 = vmax.f32 %v2633_v8, 1e-30 }
 0x4c5   : > { %3822 = vrsqrt.f32 %v2634_v11  ;;  %v2643_v12 = vsel %vm1812_vm1, %v2634_v11, %v2641_v9 }
 0x4c6   : > { %v3821_v13 = vpop.eup %3820  ;;  %v2647_v32 = vpop.xlane.xlu1 %2646  ;;  %v2672_v50 = vrot.slane %v2643_v12, 7 }
 0x4c7   : > { %v1821_v14 = vmul.f32 %v3821_v13, %v1818_v6  ;;  %v1822_v15 = vmul.f32 %v3821_v13, %v1809_v45  ;;  %v1838_v16 = vrot.slane %v3821_v13, %v1837_v10 }
 0x4c9   : > { %v1823_v18 = vsel %vm1812_vm1, %v1821_v14, %v1822_v15  ;;  %v1839_v19 = vmul.f32 %v1838_v16, %v1834_v17 }
 0x4ca   : > { %v1824_v20 = vsel %vm1820_vm3, 0.0, %v1823_v18 }
 0x4cb   : > { %v1846_v21 = vrot.slane %v1824_v20, %v1837_v10  ;;  %v1841_v22 = vsel %vm1840_vm4, 0.0, %v1839_v19 }
 0x4cd   : > { %v1847_v23 = vmul.f32 %v1846_v21, %v1841_v22 }
 0x4cf   : > { %v1848_v24 = vsub.f32 %v1809_v45, %v1847_v23 }
 0x4d1   : > { %v1851_v25 = vsel %vm1842_vm6, %v1846_v21, %v1848_v24 }
 0x4d2   : > { %v3823_v26 = vpop.eup %3822  ;;  %v1855_v27 = vsel %vm1854_vm8, %v1851_v25, 0.0 }
 0x4d3   : > { %v2636_v28 = vmul.f32 %v3823_v26, %v2634_v11  ;;  %v2637_v29 = vmul.f32 %v3823_v26, %v2629_v62  ;;  %v2651_v30 = vrot.slane %v3823_v26, %v1837_v10  ;;  %v1857_v31 = vsel %vm1856_vm9, %v1855_v27, 0.0 }
 0x4d4   : > { %1858 = vadd.xlane.f32.xlu0 %v1857_v31  ;;  %v1874_v38 = vsel %vm801_vm5, %v1855_v27, 0.0  ;;  %v1921_v31 = vsub.s32 4, %v4253_v4 }
 0x4d5   : > { %v2638_v33 = vsel %vm1812_vm1, %v2636_v28, %v2637_v29  ;;  %v2652_v34 = vmul.f32 %v2651_v30, %v2647_v32  ;;  %vm1926_vm1 = vcmp.eq.s32.totalorder %v4253_v4, 4 }
 0x4d6   : > { %v2639_v35 = vsel %vm1820_vm3, 0.0, %v2638_v33  ;;  %vm1940_vm3 = vcmask 62469  }
 0x4d7   : > { %v2657_v36 = vrot.slane %v2639_v35, %v1837_v10  ;;  %v2653_v37 = vsel %vm1840_vm4, 0.0, %v2652_v34  ;;  %vm1946_vm4 = vcmp.lt.s32.totalorder %v4255_v5, 5 }
 0x4d8   : > { %1875 = vadd.xlane.f32.xlu0 %v1874_v38 }
 0x4d9   : > { %v2658_v39 = vmul.f32 %v2657_v36, %v2653_v37 }
 0x4db   : > { %v2659_v40 = vsub.f32 %v2629_v62, %v2658_v39 }
 0x4dd   : > { %v2660_v41 = vsel %vm1842_vm6, %v2657_v36, %v2659_v40  ;;  %vm1966_vm6 = vcmp.le.s32.totalorder %v4253_v4, 5 }
 0x4de   : > { %v2661_v42 = vsel %vm1854_vm8, %v2660_v41, 0.0 }
 0x4df   : > { %v2662_v43 = vsel %vm1856_vm9, %v2661_v42, 0.0  ;;  %v2676_v44 = vsel %vm801_vm5, %v2661_v42, 0.0  ;;  %vm1980_vm9 = vcmp.eq.s32.totalorder %v4255_v5, 6 }
 0x4e0   : > { %2663 = vadd.xlane.f32.xlu1 %v2662_v43 }
 0x4e4   : > { %2677 = vadd.xlane.f32.xlu1 %v2676_v44 }
 0x55d   : > { %v1859_v45 = vpop.xlane.xlu0 %1858 }
 0x55e   : > { %v1860_v47 = vmax.f32 %v1859_v45, 1e-30 }
 0x560   : > { %3824 = vrsqrt.f32 %v1860_v47  ;;  %v1870_v48 = vsel %vm1854_vm8, %v1860_v47, %v1868_v46 }
 0x561   : > { %v1876_v59 = vpop.xlane.xlu0 %1875  ;;  %v1910_v26 = vrot.slane %v1870_v48, 7 }
 0x569   : > { %v2664_v49 = vpop.xlane.xlu1 %2663 }
 0x56a   : > { %v2665_v52 = vmax.f32 %v2664_v49, 1e-30 }
 0x56c   : > { %3826 = vrsqrt.f32 %v2665_v52  ;;  %v2674_v54 = vsel %vm1854_vm8, %v2665_v52, %v2672_v50 }
 0x56d   : > { %v3825_v55 = vpop.eup %3824  ;;  %v2678_v12 = vpop.xlane.xlu1 %2677  ;;  %v2703_v30 = vrot.slane %v2674_v54, 7 }
 0x56e   : > { %v1863_v56 = vmul.f32 %v3825_v55, %v1860_v47  ;;  %v1864_v57 = vmul.f32 %v3825_v55, %v1851_v25  ;;  %v1880_v58 = vrot.slane %v3825_v55, %v1879_v51 }
 0x570   : > { %v1865_v60 = vsel %vm1854_vm8, %v1863_v56, %v1864_v57  ;;  %v1881_v61 = vmul.f32 %v1880_v58, %v1876_v59 }
 0x571   : > { %v1866_v62 = vsel %vm1862_vm10, 0.0, %v1865_v60 }
 0x572   : > { %v1888_v63 = vrot.slane %v1866_v62, %v1879_v51  ;;  %v1883_v0 = vsel %vm1882_vm11, 0.0, %v1881_v61 }
 0x574   : > { %v1889_v1 = vmul.f32 %v1888_v63, %v1883_v0 }
 0x576   : > { %v1890_v2 = vsub.f32 %v1851_v25, %v1889_v1 }
 0x578   : > { %v1893_v3 = vsel %vm1884_vm12, %v1888_v63, %v1890_v2 }
 0x579   : > { %v3827_v6 = vpop.eup %3826  ;;  %v1897_v7 = vsel %vm1896_vm13, %v1893_v3, 0.0 }
 0x57a   : > { %v2667_v8 = vmul.f32 %v3827_v6, %v2665_v52  ;;  %v2668_v9 = vmul.f32 %v3827_v6, %v2660_v41  ;;  %v2682_v10 = vrot.slane %v3827_v6, %v1879_v51  ;;  %v1899_v11 = vsel %vm1898_vm14, %v1897_v7, 0.0 }
 0x57b   : > { %1900 = vadd.xlane.f32.xlu0 %v1899_v11  ;;  %v1916_v18 = vsel %vm801_vm5, %v1897_v7, 0.0  ;;  %v1963_v11 = vsub.s32 5, %v4253_v4 }
 0x57c   : > { %v2669_v13 = vsel %vm1854_vm8, %v2667_v8, %v2668_v9  ;;  %v2683_v14 = vmul.f32 %v2682_v10, %v2678_v12  ;;  %vm1968_vm8 = vcmp.eq.s32.totalorder %v4253_v4, 5 }
 0x57d   : > { %v2670_v15 = vsel %vm1862_vm10, 0.0, %v2669_v13  ;;  %vm1982_vm10 = vcmask 63494  }
 0x57e   : > { %v2688_v16 = vrot.slane %v2670_v15, %v1879_v51  ;;  %v2684_v17 = vsel %vm1882_vm11, 0.0, %v2683_v14  ;;  %vm1988_vm11 = vcmp.lt.s32.totalorder %v4255_v5, 6 }
 0x57f   : > { %1917 = vadd.xlane.f32.xlu0 %v1916_v18 }
 0x580   : > { %v2689_v19 = vmul.f32 %v2688_v16, %v2684_v17 }
 0x582   : > { %v2690_v20 = vsub.f32 %v2660_v41, %v2689_v19 }
 0x584   : > { %v2691_v21 = vsel %vm1884_vm12, %v2688_v16, %v2690_v20  ;;  %vm2008_vm12 = vcmp.le.s32.totalorder %v4253_v4, 6 }
 0x585   : > { %v2692_v22 = vsel %vm1896_vm13, %v2691_v21, 0.0 }
 0x586   : > { %v2693_v23 = vsel %vm1898_vm14, %v2692_v22, 0.0  ;;  %v2707_v24 = vsel %vm801_vm5, %v2692_v22, 0.0  ;;  %vm2022_vm14 = vcmp.eq.s32.totalorder %v4255_v5, 7 }
 0x587   : > { %2694 = vadd.xlane.f32.xlu1 %v2693_v23 }
 0x58b   : > { %2708 = vadd.xlane.f32.xlu1 %v2707_v24 }
 0x604   : > { %v1901_v25 = vpop.xlane.xlu0 %1900 }
 0x605   : > { %v1902_v27 = vmax.f32 %v1901_v25, 1e-30 }
 0x607   : > { %3828 = vrsqrt.f32 %v1902_v27  ;;  %v1912_v28 = vsel %vm1896_vm13, %v1902_v27, %v1910_v26 }
 0x608   : > { %v1918_v38 = vpop.xlane.xlu0 %1917  ;;  %v1952_v6 = vrot.slane %v1912_v28, 7 }
 0x610   : > { %v2695_v29 = vpop.xlane.xlu1 %2694 }
 0x611   : > { %v2696_v32 = vmax.f32 %v2695_v29, 1e-30 }
 0x613   : > { %3830 = vrsqrt.f32 %v2696_v32  ;;  %v2705_v33 = vsel %vm1896_vm13, %v2696_v32, %v2703_v30 }
 0x614   : > { %v3829_v34 = vpop.eup %3828  ;;  %v2709_v54 = vpop.xlane.xlu1 %2708  ;;  %v2734_v10 = vrot.slane %v2705_v33, 7 }
 0x615   : > { %v1905_v35 = vmul.f32 %v3829_v34, %v1902_v27  ;;  %v1906_v36 = vmul.f32 %v3829_v34, %v1893_v3  ;;  %v1922_v37 = vrot.slane %v3829_v34, %v1921_v31 }
 0x617   : > { %v1907_v39 = vsel %vm1896_vm13, %v1905_v35, %v1906_v36  ;;  %v1923_v40 = vmul.f32 %v1922_v37, %v1918_v38 }
 0x618   : > { %v1908_v41 = vsel %vm1904_vm15, 0.0, %v1907_v39 }
 0x619   : > { %v1930_v42 = vrot.slane %v1908_v41, %v1921_v31  ;;  %v1925_v43 = vsel %vm1924_vm0, 0.0, %v1923_v40 }
 0x61b   : > { %v1931_v44 = vmul.f32 %v1930_v42, %v1925_v43 }
 0x61d   : > { %v1932_v45 = vsub.f32 %v1893_v3, %v1931_v44 }
 0x61f   : > { %v1935_v46 = vsel %vm1926_vm1, %v1930_v42, %v1932_v45 }
 0x620   : > { %v3831_v47 = vpop.eup %3830  ;;  %v1939_v48 = vsel %vm1938_vm2, %v1935_v46, 0.0 }
 0x621   : > { %v2698_v49 = vmul.f32 %v3831_v47, %v2696_v32  ;;  %v2699_v50 = vmul.f32 %v3831_v47, %v2691_v21  ;;  %v2713_v51 = vrot.slane %v3831_v47, %v1921_v31  ;;  %v1941_v52 = vsel %vm1940_vm3, %v1939_v48, 0.0 }
 0x622   : > { %1942 = vadd.xlane.f32.xlu0 %v1941_v52  ;;  %v1958_v60 = vsel %vm801_vm5, %v1939_v48, 0.0  ;;  %v2005_v52 = vsub.s32 6, %v4253_v4 }
 0x623   : > { %v2700_v55 = vsel %vm1896_vm13, %v2698_v49, %v2699_v50  ;;  %v2714_v56 = vmul.f32 %v2713_v51, %v2709_v54  ;;  %vm2010_vm13 = vcmp.eq.s32.totalorder %v4253_v4, 6 }
 0x624   : > { %v2701_v57 = vsel %vm1904_vm15, 0.0, %v2700_v55  ;;  %vm2024_vm15 = vcmask 64519  }
 0x625   : > { %v2719_v58 = vrot.slane %v2701_v57, %v1921_v31  ;;  %v2715_v59 = vsel %vm1924_vm0, 0.0, %v2714_v56  ;;  %vm2066_vm0 = vcmp.lt.s32.totalorder %v4255_v5, 8 }
 0x626   : > { %1959 = vadd.xlane.f32.xlu0 %v1958_v60 }
 0x627   : > { %v2720_v61 = vmul.f32 %v2719_v58, %v2715_v59 }
 0x629   : > { %v2721_v62 = vsub.f32 %v2691_v21, %v2720_v61 }
 0x62b   : > { %v2722_v63 = vsel %vm1926_vm1, %v2719_v58, %v2721_v62  ;;  %vm2030_vm1 = vcmp.lt.s32.totalorder %v4255_v5, 7 }
 0x62c   : > { %v2723_v0 = vsel %vm1938_vm2, %v2722_v63, 0.0 }
 0x62d   : > { %v2724_v1 = vsel %vm1940_vm3, %v2723_v0, 0.0  ;;  %v2738_v2 = vsel %vm801_vm5, %v2723_v0, 0.0  ;;  %vm3319_vm3 = vcmp.lt.s32.totalorder %v4253_v4, %v4255_v5 }
 0x62e   : > { %2725 = vadd.xlane.f32.xlu1 %v2724_v1 }
 0x632   : > { %2739 = vadd.xlane.f32.xlu1 %v2738_v2 }
 0x6ab   : > { %v1943_v3 = vpop.xlane.xlu0 %1942 }
 0x6ac   : > { %v1944_v7 = vmax.f32 %v1943_v3, 1e-30 }
 0x6ae   : > { %3832 = vrsqrt.f32 %v1944_v7  ;;  %v1954_v8 = vsel %vm1938_vm2, %v1944_v7, %v1952_v6 }
 0x6af   : > { %v1960_v18 = vpop.xlane.xlu0 %1959  ;;  %v1994_v47 = vrot.slane %v1954_v8, 7 }
 0x6b7   : > { %v2726_v9 = vpop.xlane.xlu1 %2725 }
 0x6b8   : > { %v2727_v12 = vmax.f32 %v2726_v9, 1e-30 }
 0x6ba   : > { %3834 = vrsqrt.f32 %v2727_v12  ;;  %v2736_v13 = vsel %vm1938_vm2, %v2727_v12, %v2734_v10 }
 0x6bb   : > { %v3833_v14 = vpop.eup %3832  ;;  %v2740_v33 = vpop.xlane.xlu1 %2739  ;;  %v2765_v51 = vrot.slane %v2736_v13, 7 }
 0x6bc   : > { %v1947_v15 = vmul.f32 %v3833_v14, %v1944_v7  ;;  %v1948_v16 = vmul.f32 %v3833_v14, %v1935_v46  ;;  %v1964_v17 = vrot.slane %v3833_v14, %v1963_v11 }
 0x6be   : > { %v1949_v19 = vsel %vm1938_vm2, %v1947_v15, %v1948_v16  ;;  %v1965_v20 = vmul.f32 %v1964_v17, %v1960_v18 }
 0x6bf   : > { %v1950_v21 = vsel %vm1946_vm4, 0.0, %v1949_v19 }
 0x6c0   : > { %v1972_v22 = vrot.slane %v1950_v21, %v1963_v11  ;;  %v1967_v23 = vsel %vm1966_vm6, 0.0, %v1965_v20 }
 0x6c2   : > { %v1973_v24 = vmul.f32 %v1972_v22, %v1967_v23 }
 0x6c4   : > { %v1974_v25 = vsub.f32 %v1935_v46, %v1973_v24 }
 0x6c6   : > { %v1977_v26 = vsel %vm1968_vm8, %v1972_v22, %v1974_v25 }
 0x6c7   : > { %v3835_v27 = vpop.eup %3834  ;;  %v1981_v28 = vsel %vm1980_vm9, %v1977_v26, 0.0 }
 0x6c8   : > { %v2729_v29 = vmul.f32 %v3835_v27, %v2727_v12  ;;  %v2730_v30 = vmul.f32 %v3835_v27, %v2722_v63  ;;  %v2744_v31 = vrot.slane %v3835_v27, %v1963_v11  ;;  %v1983_v32 = vsel %vm1982_vm10, %v1981_v28, 0.0 }
 0x6c9   : > { %1984 = vadd.xlane.f32.xlu0 %v1983_v32  ;;  %v2000_v39 = vsel %vm801_vm5, %v1981_v28, 0.0  ;;  %v3545_v32 = vld [vmem:[#allocation4 + $0x1] ss:$0 sm:$0xff] }
 0x6ca   : > { %v2731_v34 = vsel %vm1938_vm2, %v2729_v29, %v2730_v30  ;;  %v2745_v35 = vmul.f32 %v2744_v31, %v2740_v33  ;;  %vm2052_vm2 = vcmp.eq.s32.totalorder %v4253_v4, 7 }
 0x6cb   : > { %v2732_v36 = vsel %vm1946_vm4, 0.0, %v2731_v34 }
 0x6cc   : > { %v2750_v37 = vrot.slane %v2732_v36, %v1963_v11  ;;  %v2746_v38 = vsel %vm1966_vm6, 0.0, %v2745_v35 }
 0x6cd   : > { %2001 = vadd.xlane.f32.xlu0 %v2000_v39 }
 0x6ce   : > { %v2751_v40 = vmul.f32 %v2750_v37, %v2746_v38 }
 0x6d0   : > { %v2752_v41 = vsub.f32 %v2722_v63, %v2751_v40 }
 0x6d2   : > { %v2753_v42 = vsel %vm1968_vm8, %v2750_v37, %v2752_v41  ;;  %v2055_v37 = vsub.s32 7, %v4253_v4 }
 0x6d3   : > { %v2754_v43 = vsel %vm1980_vm9, %v2753_v42, 0.0 }
 0x6d4   : > { %v2755_v44 = vsel %vm1982_vm10, %v2754_v43, 0.0  ;;  %v2769_v45 = vsel %vm801_vm5, %v2754_v43, 0.0 }
 0x6d5   : > { %2756 = vadd.xlane.f32.xlu1 %v2755_v44 }
 0x6d9   : > { %2770 = vadd.xlane.f32.xlu1 %v2769_v45 }
 0x752   : > { %v1985_v46 = vpop.xlane.xlu0 %1984 }
 0x753   : > { %v1986_v48 = vmax.f32 %v1985_v46, 1e-30 }
 0x755   : > { %3836 = vrsqrt.f32 %v1986_v48  ;;  %v1996_v49 = vsel %vm1980_vm9, %v1986_v48, %v1994_v47 }
 0x756   : > { %v2002_v60 = vpop.xlane.xlu0 %2001  ;;  %v2036_v25 = vrot.slane %v1996_v49, 7 }
 0x75e   : > { %v2757_v50 = vpop.xlane.xlu1 %2756 }
 0x75f   : > { %v2758_v54 = vmax.f32 %v2757_v50, 1e-30 }
 0x761   : > { %3838 = vrsqrt.f32 %v2758_v54  ;;  %v2767_v55 = vsel %vm1980_vm9, %v2758_v54, %v2765_v51 }
 0x762   : > { %v3837_v56 = vpop.eup %3836  ;;  %v2771_v13 = vpop.xlane.xlu1 %2770  ;;  %v2796_v31 = vrot.slane %v2767_v55, 7 }
 0x763   : > { %v1989_v57 = vmul.f32 %v3837_v56, %v1986_v48  ;;  %v1990_v58 = vmul.f32 %v3837_v56, %v1977_v26  ;;  %v2006_v59 = vrot.slane %v3837_v56, %v2005_v52 }
 0x765   : > { %v1991_v61 = vsel %vm1980_vm9, %v1989_v57, %v1990_v58  ;;  %v2007_v62 = vmul.f32 %v2006_v59, %v2002_v60 }
 0x766   : > { %v1992_v63 = vsel %vm1988_vm11, 0.0, %v1991_v61 }
 0x767   : > { %v2014_v0 = vrot.slane %v1992_v63, %v2005_v52  ;;  %v2009_v1 = vsel %vm2008_vm12, 0.0, %v2007_v62 }
 0x769   : > { %v2015_v2 = vmul.f32 %v2014_v0, %v2009_v1 }
 0x76b   : > { %v2016_v3 = vsub.f32 %v1977_v26, %v2015_v2  ;;  %v3544_v26 = vld [vmem:[#allocation4] ss:$0 sm:$0xff] }
 0x76d   : > { %v2019_v6 = vsel %vm2010_vm13, %v2014_v0, %v2016_v3 }
 0x76e   : > { %v3839_v7 = vpop.eup %3838  ;;  %v2023_v8 = vsel %vm2022_vm14, %v2019_v6, 0.0 }
 0x76f   : > { %v2760_v9 = vmul.f32 %v3839_v7, %v2758_v54  ;;  %v2761_v10 = vmul.f32 %v3839_v7, %v2753_v42  ;;  %v2775_v11 = vrot.slane %v3839_v7, %v2005_v52  ;;  %v2025_v12 = vsel %vm2024_vm15, %v2023_v8, 0.0 }
 0x770   : > { %2026 = vadd.xlane.f32.xlu0 %v2025_v12 }
 0x771   : > { %v2762_v14 = vsel %vm1980_vm9, %v2760_v9, %v2761_v10  ;;  %v2776_v15 = vmul.f32 %v2775_v11, %v2771_v13 }
 0x772   : > { %v2763_v16 = vsel %vm1988_vm11, 0.0, %v2762_v14 }
 0x773   : > { %v2781_v17 = vrot.slane %v2763_v16, %v2005_v52  ;;  %v2777_v18 = vsel %vm2008_vm12, 0.0, %v2776_v15 }
 0x775   : > { %v2782_v19 = vmul.f32 %v2781_v17, %v2777_v18 }
 0x777   : > { %v2783_v20 = vsub.f32 %v2753_v42, %v2782_v19 }
 0x779   : > { %v2784_v21 = vsel %vm2010_vm13, %v2781_v17, %v2783_v20 }
 0x77a   : > { %v2785_v22 = vsel %vm2022_vm14, %v2784_v21, 0.0 }
 0x77b   : > { %v2786_v23 = vsel %vm2024_vm15, %v2785_v22, 0.0 }
 0x77c   : > { %2787 = vadd.xlane.f32.xlu1 %v2786_v23 }
 0x7f9   : > { %v2027_v24 = vpop.xlane.xlu0 %2026 }
 0x7fa   : > { %v2028_v27 = vmax.f32 %v2027_v24, 1e-30 }
 0x7fc   : > { %3840 = vrsqrt.f32 %v2028_v27  ;;  %v2038_v28 = vsel %vm2022_vm14, %v2028_v27, %v2036_v25 }
 0x7fd   : > { %v2075_v29 = vsel %vm2066_vm0, %v2038_v28, %v3544_v26 }
 0x7fe   : > { %2076 = vst.msk [vmem:[#allocation4 - $0x7] sm:$0x80] %vm2024_vm15, %v2075_v29 }
 0x805   : > { %v2788_v30 = vpop.xlane.xlu1 %2787  ;;  %v3321_v60 = vld [vmem:[#allocation4] sm:$0x1] }
 0x806   : > { %v2789_v33 = vmax.f32 %v2788_v30, 1e-30  ;;  %v3322_v61 = vmax.f32 %v3321_v60, 1e-30 }
 0x808   : > { %3842 = vrsqrt.f32 %v2789_v33  ;;  %v2798_v34 = vsel %vm2022_vm14, %v2789_v33, %v2796_v31 }
 0x809   : > { %v3841_v35 = vpop.eup %3840  ;;  %v2825_v36 = vsel %vm2066_vm0, %v2798_v34, %v3545_v32  ;;  %3844 = vlog2.f32 %v3322_v61 }
 0x80a   : > { %v2031_v38 = vmul.f32 %v3841_v35, %v2028_v27  ;;  %v2032_v39 = vmul.f32 %v3841_v35, %v2019_v6  ;;  %2826 = vst.msk [vmem:[#allocation4 - $0x6] sm:$0x80] %vm2024_vm15, %v2825_v36 }
 0x80c   : > { %v2033_v40 = vsel %vm2022_vm14, %v2031_v38, %v2032_v39 }
 0x80d   : > { %v2034_v41 = vsel %vm2030_vm1, 0.0, %v2033_v40 }
 0x80e   : > { %v2056_v42 = vrot.slane %v2034_v41, %v2055_v37 }
 0x810   : > { %v2057_v43 = vmul.f32 0.0, %v2056_v42 }
 0x811   : > { %v3369_v62 = vld [vmem:[#allocation4 + $0x1] sm:$0x1] }
 0x812   : > { %v2058_v44 = vsub.f32 %v2019_v6, %v2057_v43  ;;  %v3370_v63 = vmax.f32 %v3369_v62, 1e-30 }
 0x814   : > { %v2061_v45 = vsel %vm2052_vm2, %v2056_v42, %v2058_v44  ;;  %3846 = vlog2.f32 %v3370_v63 }
 0x815   : > { %v3843_v46 = vpop.eup %3842  ;;  %2062 = vst.msk [vmem:[#allocation2] sm:$0xff] %vm801_vm5, %v2061_v45 }
 0x816   : > { %v2791_v47 = vmul.f32 %v3843_v46, %v2789_v33  ;;  %v2792_v48 = vmul.f32 %v3843_v46, %v2784_v21  ;;  %v3845_v0 = vpop.eup %3844 }
 0x817   : > { %v3324_v1 = vmul.f32 0.6931472, %v3845_v0 }
 0x818   : > { %v2793_v49 = vsel %vm2022_vm14, %v2791_v47, %v2792_v48 }
 0x819   : > { %v2794_v50 = vsel %vm2030_vm1, 0.0, %v2793_v49  ;;  %v3362_v2 = vrot.slane %v3324_v1, %v4273_v53 }
 0x81a   : > { %v2812_v51 = vrot.slane %v2794_v50, %v2055_v37 }
 0x81b   : > { %v3364_v7 = vsel %vm811_vm7, %v3362_v2, 0.0 }
 0x81c   : > { %v2813_v52 = vmul.f32 0.0, %v2812_v51  ;;  %v3318_v54 = vld [vmem:[#allocation2] sm:$0xff] }
 0x81d   : > { %v3320_v55 = vsel %vm3319_vm3, %v3318_v54, 0.0 }
 0x81e   : > { %v2814_v56 = vsub.f32 %v2784_v21, %v2813_v52  ;;  %3325 = vxpose.xlu0.b32.start.end [1/1] (short) (narrow) %v3320_v55, 8 }
 0x820   : > { %v2815_v57 = vsel %vm2052_vm2, %v2812_v51, %v2814_v56 }
 0x821   : > { %2816 = vst.msk [vmem:[#allocation2 + $0x8] sm:$0xff] %vm801_vm5, %v2815_v57  ;;  %v3847_v8 = vpop.eup %3846 }
 0x822   : > { %v3372_v10 = vmul.f32 0.6931472, %v3847_v8 }
 0x824   : > { %v3410_v11 = vrot.slane %v3372_v10, %v4273_v53 }
 0x826   : > { %v3412_v14 = vsel %vm811_vm7, %v3410_v11, 0.0 }
 0x828   : > { %v3367_v58 = vld [vmem:[#allocation2 + $0x8] sm:$0xff] }
 0x829   : > { %v3368_v59 = vsel %vm3319_vm3, %v3367_v58, 0.0 }
 0x82a   : > { %3373 = vxpose.xlu1.b32.start.end [1/1] (short) (narrow) %v3368_v59, 8 }
 0x89a   : > { %v3341_v3 = vpop.trf.xlu0 }
 0x89b   : > { %v3357_v6 = vadd.f32 %v3341_v3, %v3320_v55 }
 0x89d   : > { %v3365_v9 = vadd.f32 %v3364_v7, %v3357_v6 }
 0x89f   : > { %3366 = vst.msk [vmem:[%s4172_s30] sm:$0xff] %vm801_vm5, %v3365_v9 }
 0x8a6   : > { %v3389_v12 = vpop.trf.xlu1 }
 0x8a7   : > { %v3405_v13 = vadd.f32 %v3389_v12, %v3368_v59 }
 0x8a9   : > { %v3413_v15 = vadd.f32 %v3412_v14, %v3405_v13 }
 0x8ab   : > { %3546 = vst.msk [vmem:[%s4172_s30 + $0x8] sm:$0xff] %vm801_vm5, %v3413_v15 }
 0x8ac PF: > { %s3553_s21 = sshll.u32 %s3988_s22, 8  ;;  %s4630_s27 = sld [smem:[#allocation15_spill]] }
 0x8ad   : > { %s3430_s5 = sshll.u32 %s4172_s30, 4  ;;  %s4551_s9 = scalar_lea.sflag [#allocation7], %s229_s29  ;;  %s4547_s5 = int_to_ptr.vmem [resolvable:$true] %s3430_s5 }
 0x8ae   : > { %s3876_s4 = scalar_lea.vmem %s4547_s5, 256  ;;  %s4016_s22 = smov [#allocation8]  }
 0x8af   : > { %p3877_p8 = scmp.ne.s32.totalorder %s4547_s5, %s3876_s4  ;;  %s3880_s28 = sshll.u32 %s4016_s22, 4  ;;  %s3881_s28 = int_to_ptr.vmem [resolvable:$false] %s3880_s28 }
 0x8b0   : > { %s3882_s6 = scalar_lea.vmem %s3881_s28, 512  ;;  %p3883_p11 = scmp.lt.s32.totalorder %s4547_s5, %s3881_s28 }
 0x8b1   : > { %p3878_p9 = pnand %p3877_p8, %p4126_p12  ;;  %p3884_p13 = scmp.lt.s32.totalorder %s3882_s6, %s3876_s4 }
 0x8b2   : > { %s4544_s26 = scalar_lea.hbm %s4630_s27, %s3553_s21 }
 0x8b3   : > { %p3879_p10 = pneg %p3878_p9  ;;  %p3885_p0 = por %p3884_p13, %p3883_p11 }
 0x8b5   : > { %p3886_p3 = pnand %p3885_p0, %p3879_p10 }
 0x8b7   : > { %3889 = shalt.err (!%p3886_p3)
}
 0x8b8   : > { %s3890_s29 = scalar_lea.hbm %s4544_s26, 256  ;;  %s3894_s20 = scalar_lea.hbm %s4630_s27, 512 }
 0x8b9   : > { %p3891_p1 = scmp.ne.s32.totalorder %s4544_s26, %s3890_s29  ;;  %p3895_p7 = scmp.lt.s32.totalorder %s4544_s26, %s4630_s27 }
 0x8ba   : > { %p3896_p6 = scmp.lt.s32.totalorder %s3894_s20, %s3890_s29 }
 0x8bb   : > { %p3892_p5 = pnand %p3891_p1, %p4126_p12 }
 0x8bc   : > { %p3897_p8 = por %p3896_p6, %p3895_p7 }
 0x8bd   : > { %p3893_p4 = pneg %p3892_p5 }
 0x8bf   : > { %p3898_p9 = pnand %p3897_p8, %p3893_p4 }
 0x8c1   : > { %3901 = shalt.err (!%p3898_p9)
}
 0x8c2   : > { %s4017_s21 = smov 128   ;;  %s4018_s10 = smov 8  }
 0x8c3   : > { %3692 = dma.vmem_to_hbm [thread:$0]  (%p4126_p12), %s4547_s5, 256, %s4544_s26, %s4551_s9, %s4017_s21, %s4017_s21, %s4018_s10  }
 0x8c4 PF: > { %p3703_p10 = scmp.ge.s32.totalorder %s4000_s25, 2  ;;  %s3445_s7 = sand.u32 1, %s3960_s15  }
 0x8c5   : > { %s3446_s4 = scalar_lea.sflag [#allocation7], %s3445_s7 }
 0x8c6   : > { %p3699_p11 = pnand %p3703_p10, %p4139_p2 }
 0x8c8   : > { %p3700_p13 = pneg %p3699_p11 }
 0x8ca   : > { %3955 = dma.done.wait (%p3700_p13), %s3446_s4, 256  }
 0x8cb   : > { %3957 = vsyncadd (%p3700_p13), %s3446_s4, 4294967040  ;;  %s20_s25 = sadd.s32 1, %s4000_s25   ;;  %s4631_s11 = sld [smem:[#allocation11_spill]] }
 0x8cc   : > { %p17_p0 = scmp.ge.s32.totalorder %s20_s25, 6   ;;  %s4632_s20 = sld [smem:[#allocation14_spill]] }
 0x8cd   : > { %s4633_s26 = sld [smem:[#allocation12_spill]]  ;;  %s4635_s15 = smov %s3964_s16 }
 0x8ce   : > { %s4634_s5 = sld [smem:[#allocation13_spill]]  ;;  %s4636_s16 = smov %s3968_s17 }
 0x8cf   : > { %s4637_s17 = smov %s4131_s12  ;;  %s4638_s18 = smov %s3976_s19 }
 0x8d0   : > { %s4640_s21 = smov %s3992_s23  ;;  %s4641_s22 = smov %s3996_s24 }
 0x8d1   : > { %s4639_s19 = smov %s4631_s11  ;;  %19 = sbr.rel (!%p17_p0) target bundleno = 11 (0xb), region = 123 }
 0x8d3   : > { %s4642_s23 = smov %s4633_s26 }
 0x8d4   : > { %s4643_s24 = smov %s4634_s5 }
 0x8d6   :  { %3451 = vsyncpa [#allocation6], 1 }
 0x8d7   :  { %3453 = vsyncpa [#allocation6 + $0x1], 1 }
 0x8d8   :  { %3454 = vsyncpa [#allocation7], 1 }
 0x8d9   :  { %3456 = vsyncpa [#allocation7 + $0x1], 1 }

</bundles_post_ra>
